<compile_context>
chip_gen: v7x
topology: tpu7x:2x2x1
jax: 0.10.0
libtpu: 0.0.40
codegen_flags: <defaults>
</compile_context>

<pallas_src>
import functools

import jax
import jax.numpy as jnp
from jax import lax
from jax.experimental import pallas as pl
from jax.experimental.pallas import tpu as pltpu

KSIZE = 7
PAD = 3


def _spatial_attention_kernel(C, w_ref, x_ref, o_ref,
                              sum_ref, max_ref, avgp_ref, maxp_ref):
    # w_ref:    SMEM (2*KSIZE*KSIZE,) f32  conv weights, [avg-channel | max-channel]
    # x_ref:    VMEM (1, TC, H, W)         one channel tile of one batch element
    # o_ref:    VMEM (1, 1, H, W) f32
    # sum_ref:  VMEM (H, W) f32    running channel sum  (persists across C steps)
    # max_ref:  VMEM (H, W) f32    running channel max
    # avgp_ref: VMEM (Hp, Wp) f32  zero-padded mean map (built on last C step)
    # maxp_ref: VMEM (Hp, Wp) f32  zero-padded max map
    c_blk = pl.program_id(1)
    n_c_blk = pl.num_programs(1)
    TC = x_ref.shape[1]
    H, W = o_ref.shape[2], o_ref.shape[3]
    Hp = H + 2 * PAD

    @pl.when(c_blk == 0)
    def _init():
        sum_ref[...] = jnp.zeros_like(sum_ref)
        max_ref[...] = jnp.full_like(max_ref, -jnp.inf)
        avgp_ref[...] = jnp.zeros_like(avgp_ref)   # zero border for the conv
        maxp_ref[...] = jnp.zeros_like(maxp_ref)

    # Fused single-pass channel sum + max: each x plane is loaded exactly once.
    exact = (C % TC) == 0   # no out-of-range channels in the last channel tile

    def body(c, carry):
        s, m = carry
        v = x_ref[0, c].astype(jnp.float32)          # (H, W)
        if exact:
            return s + v, jnp.maximum(m, v)
        valid = (c_blk * TC + c) < C                 # mask padded tail channels
        s = s + jnp.where(valid, v, 0.0)
        m = jnp.maximum(m, jnp.where(valid, v, -jnp.inf))
        return s, m

    s, m = lax.fori_loop(0, TC, body, (sum_ref[...], max_ref[...]),
                         unroll=min(TC, 8))
    sum_ref[...] = s
    max_ref[...] = m

    @pl.when(c_blk == n_c_blk - 1)
    def _finalize():
        # Place the reduced maps inside their zeroed borders (padding lives only
        # in these tiny VMEM buffers, never in HBM).
        avgp_ref[pl.ds(PAD, H), pl.ds(PAD, W)] = sum_ref[...] * (1.0 / C)
        maxp_ref[pl.ds(PAD, H), pl.ds(PAD, W)] = max_ref[...]
        avg_p = avgp_ref[...]                        # (Hp, Wp)
        max_p = maxp_ref[...]

        # Hoisted scalar weight reads (SMEM) — once, outside the tap loops.
        w_a = [w_ref[i] for i in range(KSIZE * KSIZE)]
        w_m = [w_ref[KSIZE * KSIZE + i] for i in range(KSIZE * KSIZE)]

        # 7 lane-offset slices per map (14 total) instead of 98 shifted slices;
        # the ki direction then needs only 7 sublane-offset slices.
        A = [avg_p[:, kj:kj + W] for kj in range(KSIZE)]   # (Hp, W) each
        M = [max_p[:, kj:kj + W] for kj in range(KSIZE)]

        acc = jnp.zeros((H, W), jnp.float32)
        for ki in range(KSIZE):
            t = jnp.zeros((Hp, W), jnp.float32)
            for kj in range(KSIZE):
                idx = ki * KSIZE + kj
                t = t + w_a[idx] * A[kj] + w_m[idx] * M[kj]
            acc = acc + t[ki:ki + H, :]
        o_ref[...] = jax.nn.sigmoid(acc).astype(o_ref.dtype)[None, None]


@functools.partial(jax.jit, static_argnames=("c_tile_bytes",))
def spatial_attention(x, conv_w, *, c_tile_bytes=4 * 1024 * 1024):
    """x: (N, C, H, W) float; conv_w: (1, 2, 7, 7) -> (N, 1, H, W) f32."""
    N, C, H, W = x.shape
    Hp, Wp = H + 2 * PAD, W + 2 * PAD

    # Channel tile: biggest tile whose double-buffered x block stays inside a
    # VMEM budget that is comfortable on v5e/v6e (128 MiB) and v7x (64 MiB).
    plane_bytes = H * W * jnp.dtype(x.dtype).itemsize
    tc = int(max(1, min(C, c_tile_bytes // max(1, plane_bytes))))
    n_c_blk = pl.cdiv(C, tc)

    w_flat = conv_w.reshape(2 * KSIZE * KSIZE).astype(jnp.float32)
    kernel = functools.partial(_spatial_attention_kernel, C)

    return pl.pallas_call(
        kernel,
        out_shape=jax.ShapeDtypeStruct((N, 1, H, W), jnp.float32),
        grid_spec=pltpu.PrefetchScalarGridSpec(
            num_scalar_prefetch=0,
            grid=(N, n_c_blk),                       # channel (reduction) axis last
            in_specs=[
                pl.BlockSpec(memory_space=pltpu.SMEM),                   # weights
                pl.BlockSpec((1, tc, H, W), lambda n, c: (n, c, 0, 0)),  # x tile
            ],
            out_specs=pl.BlockSpec((1, 1, H, W), lambda n, c: (n, 0, 0, 0)),
            scratch_shapes=[
                pltpu.VMEM((H, W), jnp.float32),     # running channel sum
                pltpu.VMEM((H, W), jnp.float32),     # running channel max
                pltpu.VMEM((Hp, Wp), jnp.float32),   # zero-padded mean map
                pltpu.VMEM((Hp, Wp), jnp.float32),   # zero-padded max map
            ],
        ),
        compiler_params=pltpu.CompilerParams(
            dimension_semantics=("parallel", "arbitrary")),
    )(w_flat, x)


def _reference(x, conv_w):
    avg = jnp.mean(x, axis=1, keepdims=True)
    mx = jnp.max(x, axis=1, keepdims=True)
    cat = jnp.concatenate([avg, mx], axis=1)
    out = jax.lax.conv_general_dilated(
        cat, conv_w, window_strides=(1, 1),
        padding=((PAD, PAD), (PAD, PAD)),
        dimension_numbers=("NCHW", "OIHW", "NCHW"))
    return jax.nn.sigmoid(out)


if __name__ == "__main__":
    key = jax.random.PRNGKey(0)
    k_x, k_w = jax.random.split(key)

    N, C, H, W = 2, 4, 16, 16
    x = jax.random.normal(k_x, (N, C, H, W), dtype=jnp.float32)
    # Deterministic synthetic conv weight, shape (out=1, in=2, 7, 7), no bias.
    conv_w = 0.1 * jax.random.normal(k_w, (1, 2, KSIZE, KSIZE), dtype=jnp.float32)

    out = spatial_attention(x, conv_w)
    jax.block_until_ready(out)

    ref = _reference(x, conv_w)
    assert out.shape == (N, 1, H, W), out.shape
    assert jnp.allclose(out, ref, atol=1e-5, rtol=1e-5), float(jnp.max(jnp.abs(out - ref)))

    print("KERNEL_OK")
</pallas_src>

<mosaic_0001>
module attributes {stable_mosaic.version = 11 : i64} {
  func.func @_spatial_attention_kernel(%arg0: i32, %arg1: i32, %arg2: memref<98xf32, #tpu.memory_space<smem>>, %arg3: memref<1x4x16x16xf32, #tpu.memory_space<vmem>>, %arg4: memref<1x1x16x16xf32, #tpu.memory_space<vmem>>, %arg5: memref<16x16xf32, #tpu.memory_space<vmem>>, %arg6: memref<16x16xf32, #tpu.memory_space<vmem>>, %arg7: memref<22x22xf32, #tpu.memory_space<vmem>>, %arg8: memref<22x22xf32, #tpu.memory_space<vmem>>) attributes {dimension_semantics = [#tpu.dimension_semantics<parallel>, #tpu.dimension_semantics<arbitrary>], iteration_bounds = array<i64: 2, 1>, scalar_prefetch = 0 : i64, scratch_operands = 4 : i64, tpu.core_type = #tpu.core_type<tc>, window_params = [{transform_indices = @transform_0, window_bounds = array<i64: 98>}, {transform_indices = @transform_1, window_bounds = array<i64: 1, 4, 16, 16>}, {transform_indices = @transform_2, window_bounds = array<i64: 1, 1, 16, 16>}]} {
    %c0_i32 = arith.constant 0 : i32
    %0 = arith.cmpi eq, %arg1, %c0_i32 : i32
    %1 = arith.extui %0 : i1 to i32
    %c0_i32_0 = arith.constant 0 : i32
    %2 = arith.cmpi ne, %1, %c0_i32_0 : i32
    scf.if %2 {
      %cst = arith.constant 0.000000e+00 : f32
      %30 = vector.broadcast %cst : f32 to vector<16x16xf32>
      %c0_23 = arith.constant 0 : index
      %c0_24 = arith.constant 0 : index
      %31 = vector.load %arg5[%c0_23, %c0_24] : memref<16x16xf32, #tpu.memory_space<vmem>>, vector<16x16xf32>
      tpu.vector_store %arg5[%c0_23, %c0_24], %30 {strides = array<i32>} : memref<16x16xf32, #tpu.memory_space<vmem>>, vector<16x16xf32>,
      %cst_25 = arith.constant 0xFF800000 : f32
      %32 = vector.broadcast %cst_25 : f32 to vector<16x16xf32>
      %c0_26 = arith.constant 0 : index
      %c0_27 = arith.constant 0 : index
      %33 = vector.load %arg6[%c0_26, %c0_27] : memref<16x16xf32, #tpu.memory_space<vmem>>, vector<16x16xf32>
      tpu.vector_store %arg6[%c0_26, %c0_27], %32 {strides = array<i32>} : memref<16x16xf32, #tpu.memory_space<vmem>>, vector<16x16xf32>,
      %cst_28 = arith.constant 0.000000e+00 : f32
      %34 = vector.broadcast %cst_28 : f32 to vector<22x22xf32>
      %c0_29 = arith.constant 0 : index
      %c0_30 = arith.constant 0 : index
      %35 = vector.load %arg7[%c0_29, %c0_30] : memref<22x22xf32, #tpu.memory_space<vmem>>, vector<22x22xf32>
      tpu.vector_store %arg7[%c0_29, %c0_30], %34 {strides = array<i32>} : memref<22x22xf32, #tpu.memory_space<vmem>>, vector<22x22xf32>,
      %cst_31 = arith.constant 0.000000e+00 : f32
      %36 = vector.broadcast %cst_31 : f32 to vector<22x22xf32>
      %c0_32 = arith.constant 0 : index
      %c0_33 = arith.constant 0 : index
      %37 = vector.load %arg8[%c0_32, %c0_33] : memref<22x22xf32, #tpu.memory_space<vmem>>, vector<22x22xf32>
      tpu.vector_store %arg8[%c0_32, %c0_33], %36 {strides = array<i32>} : memref<22x22xf32, #tpu.memory_space<vmem>>, vector<22x22xf32>,
    } else {
    }
    %c0 = arith.constant 0 : index
    %c0_1 = arith.constant 0 : index
    %3 = vector.load %arg5[%c0, %c0_1] : memref<16x16xf32, #tpu.memory_space<vmem>>, vector<16x16xf32>
    %c0_2 = arith.constant 0 : index
    %c0_3 = arith.constant 0 : index
    %4 = vector.load %arg6[%c0_2, %c0_3] : memref<16x16xf32, #tpu.memory_space<vmem>>, vector<16x16xf32>
    %c0_i32_4 = arith.constant 0 : i32
    %c0_5 = arith.constant 0 : index
    %5 = arith.index_cast %c0_i32_4 : i32 to index
    %c0_6 = arith.constant 0 : index
    %c0_7 = arith.constant 0 : index
    %6 = vector.load %arg3[%c0_5, %5, %c0_6, %c0_7] : memref<1x4x16x16xf32, #tpu.memory_space<vmem>>, vector<1x1x16x16xf32>
    %7 = vector.shape_cast %6 : vector<1x1x16x16xf32> to vector<16x16xf32>
    %8 = arith.addf %3, %7 : vector<16x16xf32>
    %9 = arith.maximumf %4, %7 : vector<16x16xf32>
    %c1_i32 = arith.constant 1 : i32
    %c0_8 = arith.constant 0 : index
    %10 = arith.index_cast %c1_i32 : i32 to index
    %c0_9 = arith.constant 0 : index
    %c0_10 = arith.constant 0 : index
    %11 = vector.load %arg3[%c0_8, %10, %c0_9, %c0_10] : memref<1x4x16x16xf32, #tpu.memory_space<vmem>>, vector<1x1x16x16xf32>
    %12 = vector.shape_cast %11 : vector<1x1x16x16xf32> to vector<16x16xf32>
    %13 = arith.addf %8, %12 : vector<16x16xf32>
    %14 = arith.maximumf %9, %12 : vector<16x16xf32>
    %c2_i32 = arith.constant 2 : i32
    %c0_11 = arith.constant 0 : index
    %15 = arith.index_cast %c2_i32 : i32 to index
    %c0_12 = arith.constant 0 : index
    %c0_13 = arith.constant 0 : index
    %16 = vector.load %arg3[%c0_11, %15, %c0_12, %c0_13] : memref<1x4x16x16xf32, #tpu.memory_space<vmem>>, vector<1x1x16x16xf32>
    %17 = vector.shape_cast %16 : vector<1x1x16x16xf32> to vector<16x16xf32>
    %18 = arith.addf %13, %17 : vector<16x16xf32>
    %19 = arith.maximumf %14, %17 : vector<16x16xf32>
    %c3_i32 = arith.constant 3 : i32
    %c0_14 = arith.constant 0 : index
    %20 = arith.index_cast %c3_i32 : i32 to index
    %c0_15 = arith.constant 0 : index
    %c0_16 = arith.constant 0 : index
    %21 = vector.load %arg3[%c0_14, %20, %c0_15, %c0_16] : memref<1x4x16x16xf32, #tpu.memory_space<vmem>>, vector<1x1x16x16xf32>
    %22 = vector.shape_cast %21 : vector<1x1x16x16xf32> to vector<16x16xf32>
    %23 = arith.addf %18, %22 : vector<16x16xf32>
    %24 = arith.maximumf %19, %22 : vector<16x16xf32>
    %c4_i32 = arith.constant 4 : i32
    %c0_17 = arith.constant 0 : index
    %c0_18 = arith.constant 0 : index
    %25 = vector.load %arg5[%c0_17, %c0_18] : memref<16x16xf32, #tpu.memory_space<vmem>>, vector<16x16xf32>
    tpu.vector_store %arg5[%c0_17, %c0_18], %23 {strides = array<i32>} : memref<16x16xf32, #tpu.memory_space<vmem>>, vector<16x16xf32>,
    %c0_19 = arith.constant 0 : index
    %c0_20 = arith.constant 0 : index
    %26 = vector.load %arg6[%c0_19, %c0_20] : memref<16x16xf32, #tpu.memory_space<vmem>>, vector<16x16xf32>
    tpu.vector_store %arg6[%c0_19, %c0_20], %24 {strides = array<i32>} : memref<16x16xf32, #tpu.memory_space<vmem>>, vector<16x16xf32>,
    %c0_i32_21 = arith.constant 0 : i32
    %27 = arith.cmpi eq, %arg1, %c0_i32_21 : i32
    %28 = arith.extui %27 : i1 to i32
    %c0_i32_22 = arith.constant 0 : i32
    %29 = arith.cmpi ne, %28, %c0_i32_22 : i32
    scf.if %29 {
      %c0_23 = arith.constant 0 : index
      %c0_24 = arith.constant 0 : index
      %30 = vector.load %arg5[%c0_23, %c0_24] : memref<16x16xf32, #tpu.memory_space<vmem>>, vector<16x16xf32>
      %cst = arith.constant 2.500000e-01 : f32
      %31 = vector.broadcast %cst : f32 to vector<16x16xf32>
      %32 = arith.mulf %30, %31 : vector<16x16xf32>
      %c3 = arith.constant 3 : index
      %c3_25 = arith.constant 3 : index
      %33 = vector.load %arg7[%c3, %c3_25] : memref<22x22xf32, #tpu.memory_space<vmem>>, vector<16x16xf32>
      tpu.vector_store %arg7[%c3, %c3_25], %32 {strides = array<i32>} : memref<22x22xf32, #tpu.memory_space<vmem>>, vector<16x16xf32>,
      %c0_26 = arith.constant 0 : index
      %c0_27 = arith.constant 0 : index
      %34 = vector.load %arg6[%c0_26, %c0_27] : memref<16x16xf32, #tpu.memory_space<vmem>>, vector<16x16xf32>
      %c3_28 = arith.constant 3 : index
      %c3_29 = arith.constant 3 : index
      %35 = vector.load %arg8[%c3_28, %c3_29] : memref<22x22xf32, #tpu.memory_space<vmem>>, vector<16x16xf32>
      tpu.vector_store %arg8[%c3_28, %c3_29], %34 {strides = array<i32>} : memref<22x22xf32, #tpu.memory_space<vmem>>, vector<16x16xf32>,
      %c0_30 = arith.constant 0 : index
      %c0_31 = arith.constant 0 : index
      %36 = vector.load %arg7[%c0_30, %c0_31] : memref<22x22xf32, #tpu.memory_space<vmem>>, vector<22x22xf32>
      %c0_32 = arith.constant 0 : index
      %c0_33 = arith.constant 0 : index
      %37 = vector.load %arg8[%c0_32, %c0_33] : memref<22x22xf32, #tpu.memory_space<vmem>>, vector<22x22xf32>
      %c0_34 = arith.constant 0 : index
      %38 = memref.load %arg2[%c0_34] : memref<98xf32, #tpu.memory_space<smem>>
      %c1 = arith.constant 1 : index
      %39 = memref.load %arg2[%c1] : memref<98xf32, #tpu.memory_space<smem>>
      %c2 = arith.constant 2 : index
      %40 = memref.load %arg2[%c2] : memref<98xf32, #tpu.memory_space<smem>>
      %c3_35 = arith.constant 3 : index
      %41 = memref.load %arg2[%c3_35] : memref<98xf32, #tpu.memory_space<smem>>
      %c4 = arith.constant 4 : index
      %42 = memref.load %arg2[%c4] : memref<98xf32, #tpu.memory_space<smem>>
      %c5 = arith.constant 5 : index
      %43 = memref.load %arg2[%c5] : memref<98xf32, #tpu.memory_space<smem>>
      %c6 = arith.constant 6 : index
      %44 = memref.load %arg2[%c6] : memref<98xf32, #tpu.memory_space<smem>>
      %c7 = arith.constant 7 : index
      %45 = memref.load %arg2[%c7] : memref<98xf32, #tpu.memory_space<smem>>
      %c8 = arith.constant 8 : index
      %46 = memref.load %arg2[%c8] : memref<98xf32, #tpu.memory_space<smem>>
      %c9 = arith.constant 9 : index
      %47 = memref.load %arg2[%c9] : memref<98xf32, #tpu.memory_space<smem>>
      %c10 = arith.constant 10 : index
      %48 = memref.load %arg2[%c10] : memref<98xf32, #tpu.memory_space<smem>>
      %c11 = arith.constant 11 : index
      %49 = memref.load %arg2[%c11] : memref<98xf32, #tpu.memory_space<smem>>
      %c12 = arith.constant 12 : index
      %50 = memref.load %arg2[%c12] : memref<98xf32, #tpu.memory_space<smem>>
      %c13 = arith.constant 13 : index
      %51 = memref.load %arg2[%c13] : memref<98xf32, #tpu.memory_space<smem>>
      %c14 = arith.constant 14 : index
      %52 = memref.load %arg2[%c14] : memref<98xf32, #tpu.memory_space<smem>>
      %c15 = arith.constant 15 : index
      %53 = memref.load %arg2[%c15] : memref<98xf32, #tpu.memory_space<smem>>
      %c16 = arith.constant 16 : index
      %54 = memref.load %arg2[%c16] : memref<98xf32, #tpu.memory_space<smem>>
      %c17 = arith.constant 17 : index
      %55 = memref.load %arg2[%c17] : memref<98xf32, #tpu.memory_space<smem>>
      %c18 = arith.constant 18 : index
      %56 = memref.load %arg2[%c18] : memref<98xf32, #tpu.memory_space<smem>>
      %c19 = arith.constant 19 : index
      %57 = memref.load %arg2[%c19] : memref<98xf32, #tpu.memory_space<smem>>
      %c20 = arith.constant 20 : index
      %58 = memref.load %arg2[%c20] : memref<98xf32, #tpu.memory_space<smem>>
      %c21 = arith.constant 21 : index
      %59 = memref.load %arg2[%c21] : memref<98xf32, #tpu.memory_space<smem>>
      %c22 = arith.constant 22 : index
      %60 = memref.load %arg2[%c22] : memref<98xf32, #tpu.memory_space<smem>>
      %c23 = arith.constant 23 : index
      %61 = memref.load %arg2[%c23] : memref<98xf32, #tpu.memory_space<smem>>
      %c24 = arith.constant 24 : index
      %62 = memref.load %arg2[%c24] : memref<98xf32, #tpu.memory_space<smem>>
      %c25 = arith.constant 25 : index
      %63 = memref.load %arg2[%c25] : memref<98xf32, #tpu.memory_space<smem>>
      %c26 = arith.constant 26 : index
      %64 = memref.load %arg2[%c26] : memref<98xf32, #tpu.memory_space<smem>>
      %c27 = arith.constant 27 : index
      %65 = memref.load %arg2[%c27] : memref<98xf32, #tpu.memory_space<smem>>
      %c28 = arith.constant 28 : index
      %66 = memref.load %arg2[%c28] : memref<98xf32, #tpu.memory_space<smem>>
      %c29 = arith.constant 29 : index
      %67 = memref.load %arg2[%c29] : memref<98xf32, #tpu.memory_space<smem>>
      %c30 = arith.constant 30 : index
      %68 = memref.load %arg2[%c30] : memref<98xf32, #tpu.memory_space<smem>>
      %c31 = arith.constant 31 : index
      %69 = memref.load %arg2[%c31] : memref<98xf32, #tpu.memory_space<smem>>
      %c32 = arith.constant 32 : index
      %70 = memref.load %arg2[%c32] : memref<98xf32, #tpu.memory_space<smem>>
      %c33 = arith.constant 33 : index
      %71 = memref.load %arg2[%c33] : memref<98xf32, #tpu.memory_space<smem>>
      %c34 = arith.constant 34 : index
      %72 = memref.load %arg2[%c34] : memref<98xf32, #tpu.memory_space<smem>>
      %c35 = arith.constant 35 : index
      %73 = memref.load %arg2[%c35] : memref<98xf32, #tpu.memory_space<smem>>
      %c36 = arith.constant 36 : index
      %74 = memref.load %arg2[%c36] : memref<98xf32, #tpu.memory_space<smem>>
      %c37 = arith.constant 37 : index
      %75 = memref.load %arg2[%c37] : memref<98xf32, #tpu.memory_space<smem>>
      %c38 = arith.constant 38 : index
      %76 = memref.load %arg2[%c38] : memref<98xf32, #tpu.memory_space<smem>>
      %c39 = arith.constant 39 : index
      %77 = memref.load %arg2[%c39] : memref<98xf32, #tpu.memory_space<smem>>
      %c40 = arith.constant 40 : index
      %78 = memref.load %arg2[%c40] : memref<98xf32, #tpu.memory_space<smem>>
      %c41 = arith.constant 41 : index
      %79 = memref.load %arg2[%c41] : memref<98xf32, #tpu.memory_space<smem>>
      %c42 = arith.constant 42 : index
      %80 = memref.load %arg2[%c42] : memref<98xf32, #tpu.memory_space<smem>>
      %c43 = arith.constant 43 : index
      %81 = memref.load %arg2[%c43] : memref<98xf32, #tpu.memory_space<smem>>
      %c44 = arith.constant 44 : index
      %82 = memref.load %arg2[%c44] : memref<98xf32, #tpu.memory_space<smem>>
      %c45 = arith.constant 45 : index
      %83 = memref.load %arg2[%c45] : memref<98xf32, #tpu.memory_space<smem>>
      %c46 = arith.constant 46 : index
      %84 = memref.load %arg2[%c46] : memref<98xf32, #tpu.memory_space<smem>>
      %c47 = arith.constant 47 : index
      %85 = memref.load %arg2[%c47] : memref<98xf32, #tpu.memory_space<smem>>
      %c48 = arith.constant 48 : index
      %86 = memref.load %arg2[%c48] : memref<98xf32, #tpu.memory_space<smem>>
      %c49 = arith.constant 49 : index
      %87 = memref.load %arg2[%c49] : memref<98xf32, #tpu.memory_space<smem>>
      %c50 = arith.constant 50 : index
      %88 = memref.load %arg2[%c50] : memref<98xf32, #tpu.memory_space<smem>>
      %c51 = arith.constant 51 : index
      %89 = memref.load %arg2[%c51] : memref<98xf32, #tpu.memory_space<smem>>
      %c52 = arith.constant 52 : index
      %90 = memref.load %arg2[%c52] : memref<98xf32, #tpu.memory_space<smem>>
      %c53 = arith.constant 53 : index
      %91 = memref.load %arg2[%c53] : memref<98xf32, #tpu.memory_space<smem>>
      %c54 = arith.constant 54 : index
      %92 = memref.load %arg2[%c54] : memref<98xf32, #tpu.memory_space<smem>>
      %c55 = arith.constant 55 : index
      %93 = memref.load %arg2[%c55] : memref<98xf32, #tpu.memory_space<smem>>
      %c56 = arith.constant 56 : index
      %94 = memref.load %arg2[%c56] : memref<98xf32, #tpu.memory_space<smem>>
      %c57 = arith.constant 57 : index
      %95 = memref.load %arg2[%c57] : memref<98xf32, #tpu.memory_space<smem>>
      %c58 = arith.constant 58 : index
      %96 = memref.load %arg2[%c58] : memref<98xf32, #tpu.memory_space<smem>>
      %c59 = arith.constant 59 : index
      %97 = memref.load %arg2[%c59] : memref<98xf32, #tpu.memory_space<smem>>
      %c60 = arith.constant 60 : index
      %98 = memref.load %arg2[%c60] : memref<98xf32, #tpu.memory_space<smem>>
      %c61 = arith.constant 61 : index
      %99 = memref.load %arg2[%c61] : memref<98xf32, #tpu.memory_space<smem>>
      %c62 = arith.constant 62 : index
      %100 = memref.load %arg2[%c62] : memref<98xf32, #tpu.memory_space<smem>>
      %c63 = arith.constant 63 : index
      %101 = memref.load %arg2[%c63] : memref<98xf32, #tpu.memory_space<smem>>
      %c64 = arith.constant 64 : index
      %102 = memref.load %arg2[%c64] : memref<98xf32, #tpu.memory_space<smem>>
      %c65 = arith.constant 65 : index
      %103 = memref.load %arg2[%c65] : memref<98xf32, #tpu.memory_space<smem>>
      %c66 = arith.constant 66 : index
      %104 = memref.load %arg2[%c66] : memref<98xf32, #tpu.memory_space<smem>>
      %c67 = arith.constant 67 : index
      %105 = memref.load %arg2[%c67] : memref<98xf32, #tpu.memory_space<smem>>
      %c68 = arith.constant 68 : index
      %106 = memref.load %arg2[%c68] : memref<98xf32, #tpu.memory_space<smem>>
      %c69 = arith.constant 69 : index
      %107 = memref.load %arg2[%c69] : memref<98xf32, #tpu.memory_space<smem>>
      %c70 = arith.constant 70 : index
      %108 = memref.load %arg2[%c70] : memref<98xf32, #tpu.memory_space<smem>>
      %c71 = arith.constant 71 : index
      %109 = memref.load %arg2[%c71] : memref<98xf32, #tpu.memory_space<smem>>
      %c72 = arith.constant 72 : index
      %110 = memref.load %arg2[%c72] : memref<98xf32, #tpu.memory_space<smem>>
      %c73 = arith.constant 73 : index
      %111 = memref.load %arg2[%c73] : memref<98xf32, #tpu.memory_space<smem>>
      %c74 = arith.constant 74 : index
      %112 = memref.load %arg2[%c74] : memref<98xf32, #tpu.memory_space<smem>>
      %c75 = arith.constant 75 : index
      %113 = memref.load %arg2[%c75] : memref<98xf32, #tpu.memory_space<smem>>
      %c76 = arith.constant 76 : index
      %114 = memref.load %arg2[%c76] : memref<98xf32, #tpu.memory_space<smem>>
      %c77 = arith.constant 77 : index
      %115 = memref.load %arg2[%c77] : memref<98xf32, #tpu.memory_space<smem>>
      %c78 = arith.constant 78 : index
      %116 = memref.load %arg2[%c78] : memref<98xf32, #tpu.memory_space<smem>>
      %c79 = arith.constant 79 : index
      %117 = memref.load %arg2[%c79] : memref<98xf32, #tpu.memory_space<smem>>
      %c80 = arith.constant 80 : index
      %118 = memref.load %arg2[%c80] : memref<98xf32, #tpu.memory_space<smem>>
      %c81 = arith.constant 81 : index
      %119 = memref.load %arg2[%c81] : memref<98xf32, #tpu.memory_space<smem>>
      %c82 = arith.constant 82 : index
      %120 = memref.load %arg2[%c82] : memref<98xf32, #tpu.memory_space<smem>>
      %c83 = arith.constant 83 : index
      %121 = memref.load %arg2[%c83] : memref<98xf32, #tpu.memory_space<smem>>
      %c84 = arith.constant 84 : index
      %122 = memref.load %arg2[%c84] : memref<98xf32, #tpu.memory_space<smem>>
      %c85 = arith.constant 85 : index
      %123 = memref.load %arg2[%c85] : memref<98xf32, #tpu.memory_space<smem>>
      %c86 = arith.constant 86 : index
      %124 = memref.load %arg2[%c86] : memref<98xf32, #tpu.memory_space<smem>>
      %c87 = arith.constant 87 : index
      %125 = memref.load %arg2[%c87] : memref<98xf32, #tpu.memory_space<smem>>
      %c88 = arith.constant 88 : index
      %126 = memref.load %arg2[%c88] : memref<98xf32, #tpu.memory_space<smem>>
      %c89 = arith.constant 89 : index
      %127 = memref.load %arg2[%c89] : memref<98xf32, #tpu.memory_space<smem>>
      %c90 = arith.constant 90 : index
      %128 = memref.load %arg2[%c90] : memref<98xf32, #tpu.memory_space<smem>>
      %c91 = arith.constant 91 : index
      %129 = memref.load %arg2[%c91] : memref<98xf32, #tpu.memory_space<smem>>
      %c92 = arith.constant 92 : index
      %130 = memref.load %arg2[%c92] : memref<98xf32, #tpu.memory_space<smem>>
      %c93 = arith.constant 93 : index
      %131 = memref.load %arg2[%c93] : memref<98xf32, #tpu.memory_space<smem>>
      %c94 = arith.constant 94 : index
      %132 = memref.load %arg2[%c94] : memref<98xf32, #tpu.memory_space<smem>>
      %c95 = arith.constant 95 : index
      %133 = memref.load %arg2[%c95] : memref<98xf32, #tpu.memory_space<smem>>
      %c96 = arith.constant 96 : index
      %134 = memref.load %arg2[%c96] : memref<98xf32, #tpu.memory_space<smem>>
      %c97 = arith.constant 97 : index
      %135 = memref.load %arg2[%c97] : memref<98xf32, #tpu.memory_space<smem>>
      %136 = vector.extract_strided_slice %36 {offsets = [0, 0], sizes = [22, 16], strides = [1, 1]} : vector<22x22xf32> to vector<22x16xf32>
      %137 = vector.extract_strided_slice %36 {offsets = [0, 1], sizes = [22, 16], strides = [1, 1]} : vector<22x22xf32> to vector<22x16xf32>
      %138 = vector.extract_strided_slice %36 {offsets = [0, 2], sizes = [22, 16], strides = [1, 1]} : vector<22x22xf32> to vector<22x16xf32>
      %139 = vector.extract_strided_slice %36 {offsets = [0, 3], sizes = [22, 16], strides = [1, 1]} : vector<22x22xf32> to vector<22x16xf32>
      %140 = vector.extract_strided_slice %36 {offsets = [0, 4], sizes = [22, 16], strides = [1, 1]} : vector<22x22xf32> to vector<22x16xf32>
      %141 = vector.extract_strided_slice %36 {offsets = [0, 5], sizes = [22, 16], strides = [1, 1]} : vector<22x22xf32> to vector<22x16xf32>
      %142 = vector.extract_strided_slice %36 {offsets = [0, 6], sizes = [22, 16], strides = [1, 1]} : vector<22x22xf32> to vector<22x16xf32>
      %143 = vector.extract_strided_slice %37 {offsets = [0, 0], sizes = [22, 16], strides = [1, 1]} : vector<22x22xf32> to vector<22x16xf32>
      %144 = vector.extract_strided_slice %37 {offsets = [0, 1], sizes = [22, 16], strides = [1, 1]} : vector<22x22xf32> to vector<22x16xf32>
      %145 = vector.extract_strided_slice %37 {offsets = [0, 2], sizes = [22, 16], strides = [1, 1]} : vector<22x22xf32> to vector<22x16xf32>
      %146 = vector.extract_strided_slice %37 {offsets = [0, 3], sizes = [22, 16], strides = [1, 1]} : vector<22x22xf32> to vector<22x16xf32>
      %147 = vector.extract_strided_slice %37 {offsets = [0, 4], sizes = [22, 16], strides = [1, 1]} : vector<22x22xf32> to vector<22x16xf32>
      %148 = vector.extract_strided_slice %37 {offsets = [0, 5], sizes = [22, 16], strides = [1, 1]} : vector<22x22xf32> to vector<22x16xf32>
      %149 = vector.extract_strided_slice %37 {offsets = [0, 6], sizes = [22, 16], strides = [1, 1]} : vector<22x22xf32> to vector<22x16xf32>
      %cst_36 = arith.constant 0.000000e+00 : f32
      %150 = vector.broadcast %cst_36 : f32 to vector<16x16xf32>
      %cst_37 = arith.constant 0.000000e+00 : f32
      %151 = vector.broadcast %cst_37 : f32 to vector<22x16xf32>
      %152 = vector.broadcast %38 : f32 to vector<22x16xf32>
      %153 = arith.mulf %152, %136 : vector<22x16xf32>
      %154 = arith.addf %151, %153 : vector<22x16xf32>
      %155 = vector.broadcast %87 : f32 to vector<22x16xf32>
      %156 = arith.mulf %155, %143 : vector<22x16xf32>
      %157 = arith.addf %154, %156 : vector<22x16xf32>
      %158 = vector.broadcast %39 : f32 to vector<22x16xf32>
      %159 = arith.mulf %158, %137 : vector<22x16xf32>
      %160 = arith.addf %157, %159 : vector<22x16xf32>
      %161 = vector.broadcast %88 : f32 to vector<22x16xf32>
      %162 = arith.mulf %161, %144 : vector<22x16xf32>
      %163 = arith.addf %160, %162 : vector<22x16xf32>
      %164 = vector.broadcast %40 : f32 to vector<22x16xf32>
      %165 = arith.mulf %164, %138 : vector<22x16xf32>
      %166 = arith.addf %163, %165 : vector<22x16xf32>
      %167 = vector.broadcast %89 : f32 to vector<22x16xf32>
      %168 = arith.mulf %167, %145 : vector<22x16xf32>
      %169 = arith.addf %166, %168 : vector<22x16xf32>
      %170 = vector.broadcast %41 : f32 to vector<22x16xf32>
      %171 = arith.mulf %170, %139 : vector<22x16xf32>
      %172 = arith.addf %169, %171 : vector<22x16xf32>
      %173 = vector.broadcast %90 : f32 to vector<22x16xf32>
      %174 = arith.mulf %173, %146 : vector<22x16xf32>
      %175 = arith.addf %172, %174 : vector<22x16xf32>
      %176 = vector.broadcast %42 : f32 to vector<22x16xf32>
      %177 = arith.mulf %176, %140 : vector<22x16xf32>
      %178 = arith.addf %175, %177 : vector<22x16xf32>
      %179 = vector.broadcast %91 : f32 to vector<22x16xf32>
      %180 = arith.mulf %179, %147 : vector<22x16xf32>
      %181 = arith.addf %178, %180 : vector<22x16xf32>
      %182 = vector.broadcast %43 : f32 to vector<22x16xf32>
      %183 = arith.mulf %182, %141 : vector<22x16xf32>
      %184 = arith.addf %181, %183 : vector<22x16xf32>
      %185 = vector.broadcast %92 : f32 to vector<22x16xf32>
      %186 = arith.mulf %185, %148 : vector<22x16xf32>
      %187 = arith.addf %184, %186 : vector<22x16xf32>
      %188 = vector.broadcast %44 : f32 to vector<22x16xf32>
      %189 = arith.mulf %188, %142 : vector<22x16xf32>
      %190 = arith.addf %187, %189 : vector<22x16xf32>
      %191 = vector.broadcast %93 : f32 to vector<22x16xf32>
      %192 = arith.mulf %191, %149 : vector<22x16xf32>
      %193 = arith.addf %190, %192 : vector<22x16xf32>
      %194 = vector.extract_strided_slice %193 {offsets = [0, 0], sizes = [16, 16], strides = [1, 1]} : vector<22x16xf32> to vector<16x16xf32>
      %195 = arith.addf %150, %194 : vector<16x16xf32>
      %cst_38 = arith.constant 0.000000e+00 : f32
      %196 = vector.broadcast %cst_38 : f32 to vector<22x16xf32>
      %197 = vector.broadcast %45 : f32 to vector<22x16xf32>
      %198 = arith.mulf %197, %136 : vector<22x16xf32>
      %199 = arith.addf %196, %198 : vector<22x16xf32>
      %200 = vector.broadcast %94 : f32 to vector<22x16xf32>
      %201 = arith.mulf %200, %143 : vector<22x16xf32>
      %202 = arith.addf %199, %201 : vector<22x16xf32>
      %203 = vector.broadcast %46 : f32 to vector<22x16xf32>
      %204 = arith.mulf %203, %137 : vector<22x16xf32>
      %205 = arith.addf %202, %204 : vector<22x16xf32>
      %206 = vector.broadcast %95 : f32 to vector<22x16xf32>
      %207 = arith.mulf %206, %144 : vector<22x16xf32>
      %208 = arith.addf %205, %207 : vector<22x16xf32>
      %209 = vector.broadcast %47 : f32 to vector<22x16xf32>
      %210 = arith.mulf %209, %138 : vector<22x16xf32>
      %211 = arith.addf %208, %210 : vector<22x16xf32>
      %212 = vector.broadcast %96 : f32 to vector<22x16xf32>
      %213 = arith.mulf %212, %145 : vector<22x16xf32>
      %214 = arith.addf %211, %213 : vector<22x16xf32>
      %215 = vector.broadcast %48 : f32 to vector<22x16xf32>
      %216 = arith.mulf %215, %139 : vector<22x16xf32>
      %217 = arith.addf %214, %216 : vector<22x16xf32>
      %218 = vector.broadcast %97 : f32 to vector<22x16xf32>
      %219 = arith.mulf %218, %146 : vector<22x16xf32>
      %220 = arith.addf %217, %219 : vector<22x16xf32>
      %221 = vector.broadcast %49 : f32 to vector<22x16xf32>
      %222 = arith.mulf %221, %140 : vector<22x16xf32>
      %223 = arith.addf %220, %222 : vector<22x16xf32>
      %224 = vector.broadcast %98 : f32 to vector<22x16xf32>
      %225 = arith.mulf %224, %147 : vector<22x16xf32>
      %226 = arith.addf %223, %225 : vector<22x16xf32>
      %227 = vector.broadcast %50 : f32 to vector<22x16xf32>
      %228 = arith.mulf %227, %141 : vector<22x16xf32>
      %229 = arith.addf %226, %228 : vector<22x16xf32>
      %230 = vector.broadcast %99 : f32 to vector<22x16xf32>
      %231 = arith.mulf %230, %148 : vector<22x16xf32>
      %232 = arith.addf %229, %231 : vector<22x16xf32>
      %233 = vector.broadcast %51 : f32 to vector<22x16xf32>
      %234 = arith.mulf %233, %142 : vector<22x16xf32>
      %235 = arith.addf %232, %234 : vector<22x16xf32>
      %236 = vector.broadcast %100 : f32 to vector<22x16xf32>
      %237 = arith.mulf %236, %149 : vector<22x16xf32>
      %238 = arith.addf %235, %237 : vector<22x16xf32>
      %239 = vector.extract_strided_slice %238 {offsets = [1, 0], sizes = [16, 16], strides = [1, 1]} : vector<22x16xf32> to vector<16x16xf32>
      %240 = arith.addf %195, %239 : vector<16x16xf32>
      %cst_39 = arith.constant 0.000000e+00 : f32
      %241 = vector.broadcast %cst_39 : f32 to vector<22x16xf32>
      %242 = vector.broadcast %52 : f32 to vector<22x16xf32>
      %243 = arith.mulf %242, %136 : vector<22x16xf32>
      %244 = arith.addf %241, %243 : vector<22x16xf32>
      %245 = vector.broadcast %101 : f32 to vector<22x16xf32>
      %246 = arith.mulf %245, %143 : vector<22x16xf32>
      %247 = arith.addf %244, %246 : vector<22x16xf32>
      %248 = vector.broadcast %53 : f32 to vector<22x16xf32>
      %249 = arith.mulf %248, %137 : vector<22x16xf32>
      %250 = arith.addf %247, %249 : vector<22x16xf32>
      %251 = vector.broadcast %102 : f32 to vector<22x16xf32>
      %252 = arith.mulf %251, %144 : vector<22x16xf32>
      %253 = arith.addf %250, %252 : vector<22x16xf32>
      %254 = vector.broadcast %54 : f32 to vector<22x16xf32>
      %255 = arith.mulf %254, %138 : vector<22x16xf32>
      %256 = arith.addf %253, %255 : vector<22x16xf32>
      %257 = vector.broadcast %103 : f32 to vector<22x16xf32>
      %258 = arith.mulf %257, %145 : vector<22x16xf32>
      %259 = arith.addf %256, %258 : vector<22x16xf32>
      %260 = vector.broadcast %55 : f32 to vector<22x16xf32>
      %261 = arith.mulf %260, %139 : vector<22x16xf32>
      %262 = arith.addf %259, %261 : vector<22x16xf32>
      %263 = vector.broadcast %104 : f32 to vector<22x16xf32>
      %264 = arith.mulf %263, %146 : vector<22x16xf32>
      %265 = arith.addf %262, %264 : vector<22x16xf32>
      %266 = vector.broadcast %56 : f32 to vector<22x16xf32>
      %267 = arith.mulf %266, %140 : vector<22x16xf32>
      %268 = arith.addf %265, %267 : vector<22x16xf32>
      %269 = vector.broadcast %105 : f32 to vector<22x16xf32>
      %270 = arith.mulf %269, %147 : vector<22x16xf32>
      %271 = arith.addf %268, %270 : vector<22x16xf32>
      %272 = vector.broadcast %57 : f32 to vector<22x16xf32>
      %273 = arith.mulf %272, %141 : vector<22x16xf32>
      %274 = arith.addf %271, %273 : vector<22x16xf32>
      %275 = vector.broadcast %106 : f32 to vector<22x16xf32>
      %276 = arith.mulf %275, %148 : vector<22x16xf32>
      %277 = arith.addf %274, %276 : vector<22x16xf32>
      %278 = vector.broadcast %58 : f32 to vector<22x16xf32>
      %279 = arith.mulf %278, %142 : vector<22x16xf32>
      %280 = arith.addf %277, %279 : vector<22x16xf32>
      %281 = vector.broadcast %107 : f32 to vector<22x16xf32>
      %282 = arith.mulf %281, %149 : vector<22x16xf32>
      %283 = arith.addf %280, %282 : vector<22x16xf32>
      %284 = vector.extract_strided_slice %283 {offsets = [2, 0], sizes = [16, 16], strides = [1, 1]} : vector<22x16xf32> to vector<16x16xf32>
      %285 = arith.addf %240, %284 : vector<16x16xf32>
      %cst_40 = arith.constant 0.000000e+00 : f32
      %286 = vector.broadcast %cst_40 : f32 to vector<22x16xf32>
      %287 = vector.broadcast %59 : f32 to vector<22x16xf32>
      %288 = arith.mulf %287, %136 : vector<22x16xf32>
      %289 = arith.addf %286, %288 : vector<22x16xf32>
      %290 = vector.broadcast %108 : f32 to vector<22x16xf32>
      %291 = arith.mulf %290, %143 : vector<22x16xf32>
      %292 = arith.addf %289, %291 : vector<22x16xf32>
      %293 = vector.broadcast %60 : f32 to vector<22x16xf32>
      %294 = arith.mulf %293, %137 : vector<22x16xf32>
      %295 = arith.addf %292, %294 : vector<22x16xf32>
      %296 = vector.broadcast %109 : f32 to vector<22x16xf32>
      %297 = arith.mulf %296, %144 : vector<22x16xf32>
      %298 = arith.addf %295, %297 : vector<22x16xf32>
      %299 = vector.broadcast %61 : f32 to vector<22x16xf32>
      %300 = arith.mulf %299, %138 : vector<22x16xf32>
      %301 = arith.addf %298, %300 : vector<22x16xf32>
      %302 = vector.broadcast %110 : f32 to vector<22x16xf32>
      %303 = arith.mulf %302, %145 : vector<22x16xf32>
      %304 = arith.addf %301, %303 : vector<22x16xf32>
      %305 = vector.broadcast %62 : f32 to vector<22x16xf32>
      %306 = arith.mulf %305, %139 : vector<22x16xf32>
      %307 = arith.addf %304, %306 : vector<22x16xf32>
      %308 = vector.broadcast %111 : f32 to vector<22x16xf32>
      %309 = arith.mulf %308, %146 : vector<22x16xf32>
      %310 = arith.addf %307, %309 : vector<22x16xf32>
      %311 = vector.broadcast %63 : f32 to vector<22x16xf32>
      %312 = arith.mulf %311, %140 : vector<22x16xf32>
      %313 = arith.addf %310, %312 : vector<22x16xf32>
      %314 = vector.broadcast %112 : f32 to vector<22x16xf32>
      %315 = arith.mulf %314, %147 : vector<22x16xf32>
      %316 = arith.addf %313, %315 : vector<22x16xf32>
      %317 = vector.broadcast %64 : f32 to vector<22x16xf32>
      %318 = arith.mulf %317, %141 : vector<22x16xf32>
      %319 = arith.addf %316, %318 : vector<22x16xf32>
      %320 = vector.broadcast %113 : f32 to vector<22x16xf32>
      %321 = arith.mulf %320, %148 : vector<22x16xf32>
      %322 = arith.addf %319, %321 : vector<22x16xf32>
      %323 = vector.broadcast %65 : f32 to vector<22x16xf32>
      %324 = arith.mulf %323, %142 : vector<22x16xf32>
      %325 = arith.addf %322, %324 : vector<22x16xf32>
      %326 = vector.broadcast %114 : f32 to vector<22x16xf32>
      %327 = arith.mulf %326, %149 : vector<22x16xf32>
      %328 = arith.addf %325, %327 : vector<22x16xf32>
      %329 = vector.extract_strided_slice %328 {offsets = [3, 0], sizes = [16, 16], strides = [1, 1]} : vector<22x16xf32> to vector<16x16xf32>
      %330 = arith.addf %285, %329 : vector<16x16xf32>
      %cst_41 = arith.constant 0.000000e+00 : f32
      %331 = vector.broadcast %cst_41 : f32 to vector<22x16xf32>
      %332 = vector.broadcast %66 : f32 to vector<22x16xf32>
      %333 = arith.mulf %332, %136 : vector<22x16xf32>
      %334 = arith.addf %331, %333 : vector<22x16xf32>
      %335 = vector.broadcast %115 : f32 to vector<22x16xf32>
      %336 = arith.mulf %335, %143 : vector<22x16xf32>
      %337 = arith.addf %334, %336 : vector<22x16xf32>
      %338 = vector.broadcast %67 : f32 to vector<22x16xf32>
      %339 = arith.mulf %338, %137 : vector<22x16xf32>
      %340 = arith.addf %337, %339 : vector<22x16xf32>
      %341 = vector.broadcast %116 : f32 to vector<22x16xf32>
      %342 = arith.mulf %341, %144 : vector<22x16xf32>
      %343 = arith.addf %340, %342 : vector<22x16xf32>
      %344 = vector.broadcast %68 : f32 to vector<22x16xf32>
      %345 = arith.mulf %344, %138 : vector<22x16xf32>
      %346 = arith.addf %343, %345 : vector<22x16xf32>
      %347 = vector.broadcast %117 : f32 to vector<22x16xf32>
      %348 = arith.mulf %347, %145 : vector<22x16xf32>
      %349 = arith.addf %346, %348 : vector<22x16xf32>
      %350 = vector.broadcast %69 : f32 to vector<22x16xf32>
      %351 = arith.mulf %350, %139 : vector<22x16xf32>
      %352 = arith.addf %349, %351 : vector<22x16xf32>
      %353 = vector.broadcast %118 : f32 to vector<22x16xf32>
      %354 = arith.mulf %353, %146 : vector<22x16xf32>
      %355 = arith.addf %352, %354 : vector<22x16xf32>
      %356 = vector.broadcast %70 : f32 to vector<22x16xf32>
      %357 = arith.mulf %356, %140 : vector<22x16xf32>
      %358 = arith.addf %355, %357 : vector<22x16xf32>
      %359 = vector.broadcast %119 : f32 to vector<22x16xf32>
      %360 = arith.mulf %359, %147 : vector<22x16xf32>
      %361 = arith.addf %358, %360 : vector<22x16xf32>
      %362 = vector.broadcast %71 : f32 to vector<22x16xf32>
      %363 = arith.mulf %362, %141 : vector<22x16xf32>
      %364 = arith.addf %361, %363 : vector<22x16xf32>
      %365 = vector.broadcast %120 : f32 to vector<22x16xf32>
      %366 = arith.mulf %365, %148 : vector<22x16xf32>
      %367 = arith.addf %364, %366 : vector<22x16xf32>
      %368 = vector.broadcast %72 : f32 to vector<22x16xf32>
      %369 = arith.mulf %368, %142 : vector<22x16xf32>
      %370 = arith.addf %367, %369 : vector<22x16xf32>
      %371 = vector.broadcast %121 : f32 to vector<22x16xf32>
      %372 = arith.mulf %371, %149 : vector<22x16xf32>
      %373 = arith.addf %370, %372 : vector<22x16xf32>
      %374 = vector.extract_strided_slice %373 {offsets = [4, 0], sizes = [16, 16], strides = [1, 1]} : vector<22x16xf32> to vector<16x16xf32>
      %375 = arith.addf %330, %374 : vector<16x16xf32>
      %cst_42 = arith.constant 0.000000e+00 : f32
      %376 = vector.broadcast %cst_42 : f32 to vector<22x16xf32>
      %377 = vector.broadcast %73 : f32 to vector<22x16xf32>
      %378 = arith.mulf %377, %136 : vector<22x16xf32>
      %379 = arith.addf %376, %378 : vector<22x16xf32>
      %380 = vector.broadcast %122 : f32 to vector<22x16xf32>
      %381 = arith.mulf %380, %143 : vector<22x16xf32>
      %382 = arith.addf %379, %381 : vector<22x16xf32>
      %383 = vector.broadcast %74 : f32 to vector<22x16xf32>
      %384 = arith.mulf %383, %137 : vector<22x16xf32>
      %385 = arith.addf %382, %384 : vector<22x16xf32>
      %386 = vector.broadcast %123 : f32 to vector<22x16xf32>
      %387 = arith.mulf %386, %144 : vector<22x16xf32>
      %388 = arith.addf %385, %387 : vector<22x16xf32>
      %389 = vector.broadcast %75 : f32 to vector<22x16xf32>
      %390 = arith.mulf %389, %138 : vector<22x16xf32>
      %391 = arith.addf %388, %390 : vector<22x16xf32>
      %392 = vector.broadcast %124 : f32 to vector<22x16xf32>
      %393 = arith.mulf %392, %145 : vector<22x16xf32>
      %394 = arith.addf %391, %393 : vector<22x16xf32>
      %395 = vector.broadcast %76 : f32 to vector<22x16xf32>
      %396 = arith.mulf %395, %139 : vector<22x16xf32>
      %397 = arith.addf %394, %396 : vector<22x16xf32>
      %398 = vector.broadcast %125 : f32 to vector<22x16xf32>
      %399 = arith.mulf %398, %146 : vector<22x16xf32>
      %400 = arith.addf %397, %399 : vector<22x16xf32>
      %401 = vector.broadcast %77 : f32 to vector<22x16xf32>
      %402 = arith.mulf %401, %140 : vector<22x16xf32>
      %403 = arith.addf %400, %402 : vector<22x16xf32>
      %404 = vector.broadcast %126 : f32 to vector<22x16xf32>
      %405 = arith.mulf %404, %147 : vector<22x16xf32>
      %406 = arith.addf %403, %405 : vector<22x16xf32>
      %407 = vector.broadcast %78 : f32 to vector<22x16xf32>
      %408 = arith.mulf %407, %141 : vector<22x16xf32>
      %409 = arith.addf %406, %408 : vector<22x16xf32>
      %410 = vector.broadcast %127 : f32 to vector<22x16xf32>
      %411 = arith.mulf %410, %148 : vector<22x16xf32>
      %412 = arith.addf %409, %411 : vector<22x16xf32>
      %413 = vector.broadcast %79 : f32 to vector<22x16xf32>
      %414 = arith.mulf %413, %142 : vector<22x16xf32>
      %415 = arith.addf %412, %414 : vector<22x16xf32>
      %416 = vector.broadcast %128 : f32 to vector<22x16xf32>
      %417 = arith.mulf %416, %149 : vector<22x16xf32>
      %418 = arith.addf %415, %417 : vector<22x16xf32>
      %419 = vector.extract_strided_slice %418 {offsets = [5, 0], sizes = [16, 16], strides = [1, 1]} : vector<22x16xf32> to vector<16x16xf32>
      %420 = arith.addf %375, %419 : vector<16x16xf32>
      %cst_43 = arith.constant 0.000000e+00 : f32
      %421 = vector.broadcast %cst_43 : f32 to vector<22x16xf32>
      %422 = vector.broadcast %80 : f32 to vector<22x16xf32>
      %423 = arith.mulf %422, %136 : vector<22x16xf32>
      %424 = arith.addf %421, %423 : vector<22x16xf32>
      %425 = vector.broadcast %129 : f32 to vector<22x16xf32>
      %426 = arith.mulf %425, %143 : vector<22x16xf32>
      %427 = arith.addf %424, %426 : vector<22x16xf32>
      %428 = vector.broadcast %81 : f32 to vector<22x16xf32>
      %429 = arith.mulf %428, %137 : vector<22x16xf32>
      %430 = arith.addf %427, %429 : vector<22x16xf32>
      %431 = vector.broadcast %130 : f32 to vector<22x16xf32>
      %432 = arith.mulf %431, %144 : vector<22x16xf32>
      %433 = arith.addf %430, %432 : vector<22x16xf32>
      %434 = vector.broadcast %82 : f32 to vector<22x16xf32>
      %435 = arith.mulf %434, %138 : vector<22x16xf32>
      %436 = arith.addf %433, %435 : vector<22x16xf32>
      %437 = vector.broadcast %131 : f32 to vector<22x16xf32>
      %438 = arith.mulf %437, %145 : vector<22x16xf32>
      %439 = arith.addf %436, %438 : vector<22x16xf32>
      %440 = vector.broadcast %83 : f32 to vector<22x16xf32>
      %441 = arith.mulf %440, %139 : vector<22x16xf32>
      %442 = arith.addf %439, %441 : vector<22x16xf32>
      %443 = vector.broadcast %132 : f32 to vector<22x16xf32>
      %444 = arith.mulf %443, %146 : vector<22x16xf32>
      %445 = arith.addf %442, %444 : vector<22x16xf32>
      %446 = vector.broadcast %84 : f32 to vector<22x16xf32>
      %447 = arith.mulf %446, %140 : vector<22x16xf32>
      %448 = arith.addf %445, %447 : vector<22x16xf32>
      %449 = vector.broadcast %133 : f32 to vector<22x16xf32>
      %450 = arith.mulf %449, %147 : vector<22x16xf32>
      %451 = arith.addf %448, %450 : vector<22x16xf32>
      %452 = vector.broadcast %85 : f32 to vector<22x16xf32>
      %453 = arith.mulf %452, %141 : vector<22x16xf32>
      %454 = arith.addf %451, %453 : vector<22x16xf32>
      %455 = vector.broadcast %134 : f32 to vector<22x16xf32>
      %456 = arith.mulf %455, %148 : vector<22x16xf32>
      %457 = arith.addf %454, %456 : vector<22x16xf32>
      %458 = vector.broadcast %86 : f32 to vector<22x16xf32>
      %459 = arith.mulf %458, %142 : vector<22x16xf32>
      %460 = arith.addf %457, %459 : vector<22x16xf32>
      %461 = vector.broadcast %135 : f32 to vector<22x16xf32>
      %462 = arith.mulf %461, %149 : vector<22x16xf32>
      %463 = arith.addf %460, %462 : vector<22x16xf32>
      %464 = vector.extract_strided_slice %463 {offsets = [6, 0], sizes = [16, 16], strides = [1, 1]} : vector<22x16xf32> to vector<16x16xf32>
      %465 = arith.addf %420, %464 : vector<16x16xf32>
      %466 = arith.negf %465 : vector<16x16xf32>
      %467 = math.exp %466 : vector<16x16xf32>
      %cst_44 = arith.constant 1.000000e+00 : f32
      %468 = vector.broadcast %cst_44 : f32 to vector<16x16xf32>
      %469 = arith.addf %468, %467 : vector<16x16xf32>
      %470 = arith.divf %468, %469 : vector<16x16xf32>
      %471 = vector.shape_cast %470 : vector<16x16xf32> to vector<1x1x16x16xf32>
      %c0_45 = arith.constant 0 : index
      %c0_46 = arith.constant 0 : index
      %c0_47 = arith.constant 0 : index
      %c0_48 = arith.constant 0 : index
      %472 = vector.load %arg4[%c0_45, %c0_46, %c0_47, %c0_48] : memref<1x1x16x16xf32, #tpu.memory_space<vmem>>, vector<1x1x16x16xf32>
      tpu.vector_store %arg4[%c0_45, %c0_46, %c0_47, %c0_48], %471 {strides = array<i32>} : memref<1x1x16x16xf32, #tpu.memory_space<vmem>>, vector<1x1x16x16xf32>,
    } else {
    }
    return
  }
  func.func @transform_0(%arg0: i32, %arg1: i32) -> i32 {
    %c0_i32 = arith.constant 0 : i32
    %c0_i32_0 = arith.constant 0 : i32
    return %c0_i32 : i32
  }
  func.func @transform_1(%arg0: i32, %arg1: i32) -> (i32, i32, i32, i32) {
    %c0_i32 = arith.constant 0 : i32
    %c0_i32_0 = arith.constant 0 : i32
    %c0_i32_1 = arith.constant 0 : i32
    return %arg0, %arg1, %c0_i32, %c0_i32_0 : i32, i32, i32, i32
  }
  func.func @transform_2(%arg0: i32, %arg1: i32) -> (i32, i32, i32, i32) {
    %c0_i32 = arith.constant 0 : i32
    %c0_i32_0 = arith.constant 0 : i32
    %c0_i32_1 = arith.constant 0 : i32
    %c0_i32_2 = arith.constant 0 : i32
    return %arg0, %c0_i32, %c0_i32_0, %c0_i32_1 : i32, i32, i32, i32
  }
}

</mosaic_0001>

<bundles_post_ra>
// kernel: spatial_attention.1
= control target key start
LH: loop header
LB: loop body
LE: loop exit
PB: predicated region body
PF: predicated region fallthrough
CT: control target
= control target key end

     0   :  { %7 = vsyncpa [#allocation9], 0  ;;  %s3903_s0 = inlined_call_operand.vmem [shape: f32[98], index: 0, kind: input, shape index: {}]   ;;  %s3904_s1 = inlined_call_operand.hbm [shape: f32[2,4,16,16], index: 1, kind: input, shape index: {}]   ;;  %s3905_s2 = inlined_call_operand.hbm [shape: f32[2,1,16,16], index: 2, kind: output, shape index: {}]  }
   0x1   :  { %8 = vsyncpa [#allocation7], 0 }
   0x2   :  { %10 = vsyncpa [#allocation7 + $0x1], 0 }
   0x3   :  { %11 = vsyncpa [#allocation8], 0 }
   0x4   :  { %13 = vsyncpa [#allocation8 + $0x1], 0  ;;  %s2593_s9 = smov 0   ;;  %s2595_s10 = smov 0  }
   0x5   :  { %s2597_s11 = smov 0   ;;  %s2599_s12 = smov 0  }
   0x6   :  { %s2601_s13 = smov 0   ;;  %s2603_s14 = smov 0  }
   0x7 LB: > { %s2203_s15 = sadd.s32 4294967295, %s2560_s14   ;;  %s2204_s16 = sadd.s32 4294967294, %s2560_s14   ;;  %s2560_s14 = sphi %s2603_s14, %s19_s14   ;;  %s2556_s13 = sphi %s2601_s13, %s4140_s13   ;;  %s2552_s12 = sphi %s2599_s12, %s4139_s12   ;;  %s2548_s11 = sphi %s2597_s11, %s4138_s11   ;;  %s2544_s10 = sphi %s2595_s10, %s4137_s10   ;;  %s2540_s9 = sphi %s2593_s9, %s4136_s9  }
   0x8   : > { %s61_s17 = sadd.s32 1, %s2548_s11  ;;  %p68_p0 = scmp.ne.s32.totalorder %s2548_s11, %s2544_s10 }
   0x9   : > { %p69_p1 = scmp.eq.s32.totalorder %s2560_s14, 0  ;;  %p74_p2 = scmp.ne.s32.totalorder %s2544_s10, %s2540_s9 }
   0xa   : > { %p2631_p3 = scmp.eq.s32.totalorder %s2203_s15, 0  ;;  %p98_p4 = scmp.eq.s32.totalorder %s2203_s15, 1 }
   0xb   : > { %p2635_p5 = por %p69_p1, %p68_p0  ;;  %p104_p6 = scmp.eq.s32.totalorder %s2204_s16, 1 }
   0xc   : > { %s3910_s18 = scalar_select %p2631_p3, 1, 0 }
   0xd   : > { %p2641_p7 = por %p2631_p3, %p74_p2  ;;  %p2645_p8 = por %p98_p4, %p68_p0 }
   0xe   : > { %p2649_p9 = por %p104_p6, %p74_p2  ;;  %p2205_p10 = scmp.ge.s32.totalorder %s2560_s14, 1 }
   0xf   : > { %s3912_s20 = scalar_select %p2641_p7, 1, 0 }
  0x10   : > { %s3913_s21 = scalar_select %p2645_p8, 1, 0 }
  0x11   : > { %s3914_s22 = scalar_select %p2649_p9, 1, 0 }
  0x12   : > { %p111_p11 = scmp.lt.s32.totalorder %s2560_s14, 3  ;;  %s124_s25 = sshll.u32 %s3903_s0, 4  ;;  %s125_s25 = int_to_ptr.vmem [resolvable:$true] %s124_s25 }
  0x13   : > { %p2348_p0 = scmp.lt.s32.totalorder %s2560_s14, 2  ;;  %s31_s29 = sadd.s32 1, %s2556_s13 }
  0x14   : > { %p2658_p12 = pnand %p2205_p10, %p111_p11  ;;  %p2679_p6 = scmp.ge.s32.totalorder %s31_s29, 2 }
  0x15   : > { %p2668_p2 = pnand %p2348_p0, %p2635_p5  ;;  %s135_s3 = sand.u32 1, %s2548_s11  }
  0x16   : > { %p2335_p1 = pneg %p2658_p12  ;;  %s2429_s4 = scalar_lea.vmem %s125_s25, 16 }
  0x17   : > { %p2430_p10 = scmp.ne.s32.totalorder %s125_s25, %s2429_s4  ;;  %p2437_p13 = scmp.lt.s32.totalorder %s125_s25, %s125_s25 }
  0x18   : > { %p2674_p4 = pnand %p2335_p1, %p2631_p3  ;;  %p2438_p9 = scmp.lt.s32.totalorder %s2429_s4, %s2429_s4 }
  0x1a   : > { %p2431_p11 = pneg %p2674_p4  ;;  %p2439_p8 = por %p2438_p9, %p2437_p13 }
  0x1c   : > { %p2432_p5 = pnand %p2431_p11, %p2430_p10 }
  0x1e   : > { %p2433_p0 = pneg %p2432_p5 }
  0x20   : > { %p2440_p1 = pnand %p2439_p8, %p2433_p0 }
  0x22   : > { %2443 = shalt.err (!%p2440_p1)
}
  0x23   : > { %s2562_s5 = smov [#allocation6]   ;;  %s4142_s29 = smov (%p2679_p6, %s31_s29), 0 }
  0x24   : > { %2338 = dma.vmem_to_smem (!%p2674_p4), %s125_s25, 16, %s2562_s5, [#allocation9]  }
  0x25   : > { %s2208_s6 = sshll.u32 %s135_s3, 6  ;;  %s56_s7 = ssub.s32 %s2556_s13, %s4142_s29 }
  0x26   : > { %p59_p9 = scmp.eq.s32.totalorder %s56_s7, 0  ;;  %s2325_s8 = sshll.u32 %s2556_s13, 10 }
  0x27   : > { %s2698_s19 = scalar_lea.hbm %s3904_s1, %s2325_s8  ;;  %s139_s23 = scalar_lea.vmem [#allocation10], %s2208_s6 }
  0x28   : > { %s149_s24 = sshll.u32 %s139_s23, 4  ;;  %s2707_s28 = scalar_lea.sflag [#allocation7], %s135_s3  ;;  %s2705_s24 = int_to_ptr.vmem [resolvable:$true] %s149_s24 }
  0x29   : > { %s2703_s25 = scalar_select %p59_p9, %s2548_s11, %s61_s17  }
  0x2a   : > { %s2444_s30 = scalar_lea.hbm %s2698_s19, 1024  ;;  %p2446_p13 = pneg %p2668_p2 }
  0x2b   : > { %p2445_p8 = scmp.ne.s32.totalorder %s2698_s19, %s2444_s30  ;;  %s2449_s6 = scalar_lea.hbm %s3904_s1, 2048 }
  0x2c   : > { %p2450_p10 = scmp.lt.u32.totalorder %s2698_s19, %s3904_s1  ;;  %p2451_p11 = scmp.lt.u32.totalorder %s2449_s6, %s2444_s30 }
  0x2d   : > { %p2447_p4 = pnand %p2446_p13, %p2445_p8  ;;  %p2453_p0 = scmp.lt.u32.totalorder %s2444_s30, %s2698_s19 }
  0x2e   : > { %p2452_p5 = por %p2451_p11, %p2450_p10 }
  0x2f   : > { %p2448_p6 = pneg %p2447_p4 }
  0x30   : > { %p2454_p1 = por %p2453_p0, %p2452_p5 }
  0x32   : > { %p2455_p9 = pnand %p2454_p1, %p2448_p6 }
  0x34   : > { %2458 = shalt.err (!%p2455_p9)
}
  0x35   : > { %s2459_s17 = scalar_lea.vmem %s2705_s24, 1024  ;;  %s2563_s3 = smov [#allocation10]  }
  0x36   : > { %p2460_p8 = scmp.ne.s32.totalorder %s2705_s24, %s2459_s17  ;;  %s2464_s15 = sshll.u32 %s2563_s3, 4  ;;  %s2465_s15 = int_to_ptr.vmem [resolvable:$false] %s2464_s15 }
  0x37   : > { %s2466_s16 = scalar_lea.vmem %s2465_s15, 2048  ;;  %p2467_p3 = scmp.lt.s32.totalorder %s2705_s24, %s2465_s15 }
  0x38   : > { %p2462_p4 = pnand %p2460_p8, %p2446_p13  ;;  %p2468_p10 = scmp.lt.s32.totalorder %s2466_s16, %s2459_s17 }
  0x3a   : > { %p2463_p7 = pneg %p2462_p4  ;;  %p2469_p11 = por %p2468_p10, %p2467_p3 }
  0x3c   : > { %p2470_p5 = pnand %p2469_p11, %p2463_p7 }
  0x3e   : > { %2473 = shalt.err (!%p2470_p5)
}
  0x3f   : > { %s2564_s23 = smov 128   ;;  %s2565_s30 = smov 8  }
  0x40   : > { %2342 = dma.hbm_to_vmem [thread:$0]  (!%p2668_p2), %s2698_s19, 1024, %s2705_s24, %s2707_s28, %s2564_s23, %s2564_s23, %s2565_s30  }
  0x41   : > { %161 = sbr.rel (%p2658_p12) target bundleno = 874 (0x36a), region = 28 }
  0x48   : > { %p3919_p13 = scmp.ne.s32.totalorder %s3910_s18, 0 }
  0x4a   : > { %2527 = dma.done.wait (%p3919_p13), [#allocation9], 16  }
  0x4b   : > { %2529 = vsyncadd (%p3919_p13), [#allocation9], 4294967280  ;;  %s2742_s4 = sand.u32 1, %s2544_s10   ;;  %p3920_p3 = scmp.ne.s32.totalorder %s3912_s20, 0 }
  0x4c   : > { %s2213_s5 = sshll.u32 %s2742_s4, 6  ;;  %s168_s6 = scalar_lea.sflag [#allocation7], %s2742_s4 }
  0x4d   : > { %s2746_s7 = scalar_lea.vmem [#allocation10], %s2213_s5 }
  0x4e   : > { %2531 = dma.done.wait (%p3920_p3), %s168_s6, 1024  }
  0x4f   : > { %2533 = vsyncadd (%p3920_p3), %s168_s6, 4294966272 }
  0x50   : > { %176 = sfence }
  0x51   : > { %vm198_vm0 = vcmask 130048   ;;  %v2566_v0 = vmov -inf   ;;  %vm203_vm1 = vcmask 179200   ;;  %v2567_v1 = vmov 0.0   ;;  %v215_v2 = vld [vmem:[%s2746_s7] sm:$0xff]  ;;  %v216_v3 = vld [vmem:[%s2746_s7 + $0x8] sm:$0xff] }
  0x52   : > { %201 = vst.msk [vmem:[#allocation3] sm:$0xff] %vm198_vm0, %v2566_v0  ;;  %202 = vst.msk [vmem:[#allocation3 + $0x8] sm:$0xff] %vm198_vm0, %v2566_v0  ;;  %v2215_v4 = vld [vmem:[%s2746_s7 + $0x10] sm:$0xff]  ;;  %v2216_v7 = vld [vmem:[%s2746_s7 + $0x18] sm:$0xff]  ;;  %vm206_vm2 = vcmask 177152   ;;  %s2568_s18 = smov 3  }
  0x53   : > { %199 = vst.msk [vmem:[#allocation2] sm:$0xff] %vm198_vm0, %v2567_v1  ;;  %200 = vst.msk [vmem:[#allocation2 + $0x8] sm:$0xff] %vm198_vm0, %v2567_v1  ;;  %v2217_v12 = vld [vmem:[%s2746_s7 + $0x20] sm:$0xff]  ;;  %v2218_v14 = vld [vmem:[%s2746_s7 + $0x28] sm:$0xff]  ;;  %vm262_vm3 = vcmask 154648   ;;  %s2270_s20 = sld [smem:[#allocation6 + $0x32]] }
  0x54   : > { %208 = vst.msk [vmem:[#allocation5] sm:$0xff] %vm203_vm1, %v2567_v1  ;;  %209 = vst.msk [vmem:[#allocation5 + $0x8] sm:$0xff] %vm203_vm1, %v2567_v1  ;;  %v2219_v18 = vld [vmem:[%s2746_s7 + $0x30] sm:$0xff]  ;;  %v2220_v20 = vld [vmem:[%s2746_s7 + $0x38] sm:$0xff]  ;;  %s2271_s26 = sld [smem:[#allocation6 + $0x33]]  ;;  %s2272_s27 = sld [smem:[#allocation6 + $0x34]] }
  0x55   : > { %204 = vst.msk [vmem:[#allocation4] sm:$0xff] %vm203_vm1, %v2567_v1  ;;  %205 = vst.msk [vmem:[#allocation4 + $0x8] sm:$0xff] %vm203_vm1, %v2567_v1  ;;  %s2273_s19 = sld [smem:[#allocation6 + $0x35]]  ;;  %s2569_s24 = smov 127   ;;  %vm1559_vm4 = vcmask 1043456   ;;  %vm794_vm5 = vcmask 1046528  }
  0x56   : > { %210 = vst.msk [vmem:[#allocation5 + $0x10] sm:$0x3f] %vm206_vm2, %v2567_v1  ;;  %207 = vst.msk [vmem:[#allocation4 + $0x10] sm:$0x3f] %vm206_vm2, %v2567_v1  ;;  %s2274_s28 = sld [smem:[#allocation6 + $0x36]]  ;;  %s2570_s8 = smov 126  }
  0x57   : > { %s2275_s17 = sld [smem:[#allocation6 + $0x37]]  ;;  %s2571_s3 = smov 125   ;;  %vm1049_vm6 = vcmask 1045504   ;;  %vm1304_vm7 = vcmask 1044480   ;;  %vm1814_vm8 = vcmask 1042432   ;;  %vm2069_vm9 = vcmask 1041408  }
  0x58   : > { %s2572_s15 = smov 124   ;;  %s2277_s16 = sld [smem:[#allocation6 + $0x39]] }
  0x59   : > { %v213_v5 = vld [vmem:[#allocation3] sm:$0xff]  ;;  %v214_v6 = vld [vmem:[#allocation3 + $0x8] sm:$0xff]  ;;  %v404_v39 = vstv %s2270_s20  ;;  %s2573_s23 = smov 123   ;;  %s2278_s30 = sld [smem:[#allocation6 + $0x3a]] }
  0x5a   : > { %v219_v8 = vmax.f32 %v213_v5, %v215_v2  ;;  %v211_v9 = vld [vmem:[#allocation2] sm:$0xff]  ;;  %v220_v10 = vmax.f32 %v214_v6, %v216_v3  ;;  %v212_v11 = vld [vmem:[#allocation2 + $0x8] sm:$0xff]  ;;  %v430_v43 = vstv %s2271_s26  ;;  %v456_v47 = vstv %s2272_s27  ;;  %s2574_s5 = smov 122   ;;  %s2279_s6 = sld [smem:[#allocation6 + $0x3b]] }
  0x5b   : > { %v217_v13 = vadd.f32 %v215_v2, %v211_v9  ;;  %v218_v15 = vadd.f32 %v216_v3, %v212_v11  ;;  %v482_v50 = vstv %s2273_s19  ;;  %s2280_s7 = sld [smem:[#allocation6 + $0x3c]]  ;;  %s2282_s20 = sld [smem:[#allocation6 + $0x3e]] }
  0x5c   : > { %v226_v16 = vmax.f32 %v219_v8, %v2215_v4  ;;  %v227_v17 = vmax.f32 %v220_v10, %v2216_v7  ;;  %v508_v53 = vstv %s2274_s28  ;;  %s2284_s26 = sld [smem:[#allocation6 + $0x40]]  ;;  %s2285_s27 = sld [smem:[#allocation6 + $0x41]] }
  0x5d   : > { %v224_v19 = vadd.f32 %v2215_v4, %v217_v13  ;;  %v225_v21 = vadd.f32 %v2216_v7, %v218_v15  ;;  %v534_v56 = vstv %s2275_s17  ;;  %s2816_s19 = sld [smem:[#allocation6 + $0x1]]  ;;  %s2822_s28 = sld [smem:[#allocation6 + $0x2]] }
  0x5e   : > { %v233_v22 = vmax.f32 %v226_v16, %v2217_v12  ;;  %v234_v23 = vmax.f32 %v227_v17, %v2218_v14  ;;  %v582_v59 = vstv %s2277_s16  ;;  %s2833_s17 = sld [smem:[#allocation6 + $0x3]]  ;;  %s2840_s16 = sld [smem:[#allocation6 + $0x4]] }
  0x5f   : > { %v231_v24 = vadd.f32 %v2217_v12, %v224_v19  ;;  %v232_v25 = vadd.f32 %v2218_v14, %v225_v21  ;;  %v620_v62 = vstv %s2278_s30  ;;  %s2847_s30 = sld [smem:[#allocation6 + $0x5]]  ;;  %p4133_p12 = scmp.ne.s32.totalorder %s3913_s21, 0 }
  0x60   : > { %v240_v26 = vmax.f32 %v233_v22, %v2219_v18  ;;  %v241_v27 = vmax.f32 %v234_v23, %v2220_v20  ;;  %v658_v2 = vstv %s2279_s6  ;;  %s2854_s6 = sld [smem:[#allocation6 + $0x6]] }
  0x61   : > { %v238_v28 = vadd.f32 %v2219_v18, %v231_v24  ;;  %v239_v29 = vadd.f32 %v2220_v20, %v232_v25  ;;  %v696_v5 = vstv %s2280_s7  ;;  %v772_v11 = vstv %s2282_s20  ;;  %s2228_s7 = sld [smem:[#allocation6 + $0x8]]  ;;  %s2230_s20 = sld [smem:[#allocation6 + $0xa]] }
  0x62   : > { %245 = vst.msk [vmem:[#allocation3] sm:$0xff] %vm198_vm0, %v240_v26  ;;  %246 = vst.msk [vmem:[#allocation3 + $0x8] sm:$0xff] %vm198_vm0, %v241_v27  ;;  %v837_v14 = vstv %s2284_s26  ;;  %v875_v17 = vstv %s2285_s27  ;;  %s2231_s26 = sld [smem:[#allocation6 + $0xb]]  ;;  %s2232_s27 = sld [smem:[#allocation6 + $0xc]] }
  0x63   : > { %243 = vst.msk [vmem:[#allocation2] sm:$0xff] %vm198_vm0, %v238_v28  ;;  %244 = vst.msk [vmem:[#allocation2 + $0x8] sm:$0xff] %vm198_vm0, %v239_v29  ;;  %v391_v18 = vstv %s2816_s19  ;;  %v417_v23 = vstv %s2822_s28  ;;  %s2233_s19 = sld [smem:[#allocation6 + $0xd]]  ;;  %s2235_s28 = sld [smem:[#allocation6 + $0xf]] }
  0x64   : > { %v443_v27 = vstv %s2833_s17  ;;  %s2236_s17 = sld [smem:[#allocation6 + $0x10]] }
  0x69   : > { %v265_v30 = vld [vmem:[#allocation3] sm:$0xff]  ;;  %v266_v34 = vld [vmem:[#allocation3 + $0x8] sm:$0xff] }
  0x6a   : > { %269 = vrot.lane.b32.xlu1 %v265_v30, %s2568_s18  ;;  %v250_v31 = vld [vmem:[#allocation2] sm:$0xff]  ;;  %v251_v32 = vld [vmem:[#allocation2 + $0x8] sm:$0xff]  ;;  %v469_v30 = vstv %s2840_s16  ;;  %s2237_s16 = sld [smem:[#allocation6 + $0x11]] }
  0x6b   : > { %v252_v33 = vmul.f32 0.25, %v250_v31  ;;  %v253_v35 = vmul.f32 0.25, %v251_v32 }
  0x6d   : > { %256 = vrot.lane.b32.xlu0 %v252_v33, %s2568_s18  ;;  %v495_v33 = vstv %s2847_s30  ;;  %s2286_s30 = sld [smem:[#allocation6 + $0x42]] }
  0x6e   : > { %271 = vrot.lane.b32.xlu1 %v266_v34, %s2568_s18 }
  0x71   : > { %258 = vrot.lane.b32.xlu0 %v253_v35, %s2568_s18  ;;  %s2281_s18 = sld [smem:[#allocation6 + $0x3d]] }
  0x77   : > { %v734_v8 = vstv %s2281_s18  ;;  %s2229_s18 = sld [smem:[#allocation6 + $0x9]] }
  0xdc   : > { %v270_v36 = vpop.permute.xlu1 %269 }
  0xdd   : > { %275 = vst.msk [vmem:[#allocation5 + $0x3] sm:$0xff] %vm262_vm3, %v270_v36  ;;  %v521_v36 = vstv %s2854_s6  ;;  %s2238_s6 = sld [smem:[#allocation6 + $0x12]] }
  0xdf   : > { %v257_v37 = vpop.permute.xlu0 %256 }
  0xe0   : > { %263 = vst.msk [vmem:[#allocation4 + $0x3] sm:$0xff] %vm262_vm3, %v257_v37  ;;  %v272_v38 = vpop.permute.xlu1 %271 }
  0xe1   : > { %276 = vst.msk [vmem:[#allocation5 + $0xb] sm:$0xff] %vm262_vm3, %v272_v38 }
  0xe3   : > { %v259_v40 = vpop.permute.xlu0 %258 }
  0xe4   : > { %v2768_v41 = vld [vmem:[#allocation5] sm:$0xff]  ;;  %264 = vst.msk [vmem:[#allocation4 + $0xb] sm:$0xff] %vm262_vm3, %v259_v40 }
  0xe5   : > { %v405_v42 = vmul.f32 %v404_v39, %v2768_v41  ;;  %v431_v46 = vmul.f32 %v430_v43, %v2768_v41  ;;  %v457_v49 = vmul.f32 %v456_v47, %v2768_v41  ;;  %v483_v52 = vmul.f32 %v482_v50, %v2768_v41 }
  0xe6   : > { %v509_v55 = vmul.f32 %v508_v53, %v2768_v41  ;;  %v535_v58 = vmul.f32 %v534_v56, %v2768_v41  ;;  %v583_v63 = vmul.f32 %v582_v59, %v2768_v41  ;;  %v621_v6 = vmul.f32 %v620_v62, %v2768_v41 }
  0xe7   : > { %409 = vrot.lane.b32.xlu0 %v405_v42, %s2569_s24  ;;  %v659_v12 = vmul.f32 %v658_v2, %v2768_v41  ;;  %v697_v19 = vmul.f32 %v696_v5, %v2768_v41  ;;  %v2831_v21 = vld [vmem:[#allocation4] sm:$0xff]  ;;  %v735_v26 = vmul.f32 %v734_v8, %v2768_v41  ;;  %v773_v31 = vmul.f32 %v772_v11, %v2768_v41 }
  0xe8   : > { %v2772_v44 = vld [vmem:[#allocation5 + $0x8] sm:$0xff]  ;;  %v2800_v1 = vld [vmem:[#allocation5 + $0x10] sm:$0x3f]  ;;  %v392_v22 = vmul.f32 %v391_v18, %v2831_v21  ;;  %v418_v25 = vmul.f32 %v417_v23, %v2831_v21  ;;  %v444_v29 = vmul.f32 %v443_v27, %v2831_v21  ;;  %v470_v32 = vmul.f32 %v469_v30, %v2831_v21 }
  0xe9   : > { %v406_v45 = vmul.f32 %v404_v39, %v2772_v44  ;;  %v432_v48 = vmul.f32 %v430_v43, %v2772_v44  ;;  %v458_v51 = vmul.f32 %v456_v47, %v2772_v44  ;;  %v484_v54 = vmul.f32 %v482_v50, %v2772_v44 }
  0xea   : > { %v510_v57 = vmul.f32 %v508_v53, %v2772_v44  ;;  %v536_v60 = vmul.f32 %v534_v56, %v2772_v44  ;;  %v584_v61 = vmul.f32 %v582_v59, %v2772_v44  ;;  %v622_v0 = vmul.f32 %v620_v62, %v2772_v44 }
  0xeb   : > { %411 = vrot.lane.b32.xlu1 %v406_v45, %s2569_s24  ;;  %435 = vrot.lane.b32.xlu0 %v431_v46, %s2570_s8  ;;  %v585_v3 = vmul.f32 %v582_v59, %v2800_v1  ;;  %v660_v4 = vmul.f32 %v658_v2, %v2772_v44  ;;  %v698_v7 = vmul.f32 %v696_v5, %v2772_v44  ;;  %v563_v39 = vstv %s2228_s7  ;;  %v2874_v43 = vld [vmem:[#allocation4 + $0x10] sm:$0x3f]  ;;  %v2886_v50 = vld [vmem:[#allocation4 + $0x8] sm:$0xff]  ;;  %s2287_s7 = sld [smem:[#allocation6 + $0x43]] }
  0xec   : > { %v623_v9 = vmul.f32 %v620_v62, %v2800_v1  ;;  %v736_v10 = vmul.f32 %v734_v8, %v2772_v44  ;;  %v774_v13 = vmul.f32 %v772_v11, %v2772_v44  ;;  %v661_v15 = vmul.f32 %v658_v2, %v2800_v1 }
  0xed   : > { %v839_v16 = vmul.f32 %v837_v14, %v2772_v44  ;;  %v877_v20 = vmul.f32 %v875_v17, %v2772_v44  ;;  %v699_v24 = vmul.f32 %v696_v5, %v2800_v1  ;;  %v737_v28 = vmul.f32 %v734_v8, %v2800_v1 }
  0xee   : > { %v775_v34 = vmul.f32 %v772_v11, %v2800_v1  ;;  %v496_v35 = vmul.f32 %v495_v33, %v2831_v21  ;;  %v838_v37 = vmul.f32 %v837_v14, %v2768_v41  ;;  %v522_v38 = vmul.f32 %v521_v36, %v2831_v21 }
  0xef   : > { %437 = vrot.lane.b32.xlu1 %v432_v48, %s2570_s8  ;;  %461 = vrot.lane.b32.xlu0 %v457_v49, %s2571_s3  ;;  %v840_v40 = vmul.f32 %v837_v14, %v2800_v1  ;;  %v564_v42 = vmul.f32 %v563_v39, %v2831_v21  ;;  %v566_v45 = vmul.f32 %v563_v39, %v2874_v43  ;;  %v601_v47 = vstv %s2229_s18  ;;  %s2239_s18 = sld [smem:[#allocation6 + $0x13]] }
  0xf0   : > { %v876_v46 = vmul.f32 %v875_v17, %v2768_v41  ;;  %v878_v48 = vmul.f32 %v875_v17, %v2800_v1  ;;  %v602_v49 = vmul.f32 %v601_v47, %v2831_v21  ;;  %v639_v53 = vstv %s2230_s20  ;;  %s2288_s20 = sld [smem:[#allocation6 + $0x44]] }
  0xf1   : > { %v642_v56 = vmul.f32 %v639_v53, %v2874_v43  ;;  %v497_v62 = vmul.f32 %v495_v33, %v2886_v50  ;;  %v523_v2 = vmul.f32 %v521_v36, %v2886_v50  ;;  %v565_v5 = vmul.f32 %v563_v39, %v2886_v50 }
  0xf2   : > { %v641_v14 = vmul.f32 %v639_v53, %v2886_v50 }
  0xf3   : > { %463 = vrot.lane.b32.xlu1 %v458_v51, %s2571_s3  ;;  %487 = vrot.lane.b32.xlu0 %v483_v52, %s2572_s15  ;;  %v604_v51 = vmul.f32 %v601_v47, %v2874_v43  ;;  %v393_v52 = vmul.f32 %v391_v18, %v2886_v50 }
  0xf7   : > { %489 = vrot.lane.b32.xlu1 %v484_v54, %s2572_s15  ;;  %513 = vrot.lane.b32.xlu0 %v509_v55, %s2573_s23  ;;  %v640_v54 = vmul.f32 %v639_v53, %v2831_v21  ;;  %v419_v55 = vmul.f32 %v417_v23, %v2886_v50 }
  0xfb   : > { %515 = vrot.lane.b32.xlu1 %v510_v57, %s2573_s23  ;;  %539 = vrot.lane.b32.xlu0 %v535_v58, %s2574_s5  ;;  %v445_v57 = vmul.f32 %v443_v27, %v2886_v50  ;;  %v677_v58 = vstv %s2231_s26  ;;  %s2240_s26 = sld [smem:[#allocation6 + $0x14]] }
  0xfc   : > { %v678_v59 = vmul.f32 %v677_v58, %v2831_v21 }
  0xff   : > { %541 = vrot.lane.b32.xlu1 %v536_v60, %s2574_s5  ;;  %591 = vrot.lane.b32.xlu0 %v584_v61, %s2569_s24  ;;  %v471_v60 = vmul.f32 %v469_v30, %v2886_v50  ;;  %v680_v61 = vmul.f32 %v677_v58, %v2874_v43 }
 0x103   : > { %589 = vrot.lane.b32.xlu1 %v583_v63, %s2569_s24  ;;  %629 = vrot.lane.b32.xlu0 %v622_v0, %s2570_s8  ;;  %v715_v63 = vstv %s2232_s27  ;;  %s2289_s27 = sld [smem:[#allocation6 + $0x45]] }
 0x104   : > { %v716_v0 = vmul.f32 %v715_v63, %v2831_v21 }
 0x107   : > { %593 = vrot.lane.b32.xlu1 %v585_v3, %s2569_s24  ;;  %667 = vrot.lane.b32.xlu0 %v660_v4, %s2571_s3  ;;  %v718_v4 = vmul.f32 %v715_v63, %v2874_v43 }
 0x10b   : > { %627 = vrot.lane.b32.xlu1 %v621_v6, %s2570_s8  ;;  %705 = vrot.lane.b32.xlu0 %v698_v7, %s2572_s15  ;;  %v753_v6 = vstv %s2233_s19  ;;  %s2242_s19 = sld [smem:[#allocation6 + $0x16]] }
 0x10f   : > { %631 = vrot.lane.b32.xlu1 %v623_v9, %s2570_s8  ;;  %743 = vrot.lane.b32.xlu0 %v736_v10, %s2573_s23  ;;  %v754_v9 = vmul.f32 %v753_v6, %v2831_v21  ;;  %v603_v10 = vmul.f32 %v601_v47, %v2886_v50 }
 0x113   : > { %665 = vrot.lane.b32.xlu1 %v659_v12, %s2571_s3  ;;  %781 = vrot.lane.b32.xlu0 %v774_v13, %s2574_s5  ;;  %v756_v13 = vmul.f32 %v753_v6, %v2874_v43 }
 0x117   : > { %669 = vrot.lane.b32.xlu1 %v661_v15, %s2571_s3  ;;  %846 = vrot.lane.b32.xlu0 %v839_v16, %s2569_s24  ;;  %v818_v15 = vstv %s2235_s28  ;;  %s2291_s28 = sld [smem:[#allocation6 + $0x47]] }
 0x118   : > { %v819_v18 = vmul.f32 %v818_v15, %v2831_v21  ;;  %v821_v23 = vmul.f32 %v818_v15, %v2874_v43  ;;  %v820_v33 = vmul.f32 %v818_v15, %v2886_v50 }
 0x11b   : > { %703 = vrot.lane.b32.xlu1 %v697_v19, %s2572_s15  ;;  %884 = vrot.lane.b32.xlu0 %v877_v20, %s2570_s8  ;;  %v679_v19 = vmul.f32 %v677_v58, %v2886_v50 }
 0x11f   : > { %707 = vrot.lane.b32.xlu1 %v699_v24, %s2572_s15  ;;  %396 = vrot.lane.b32.xlu0 %v392_v22, %s2569_s24  ;;  %v717_v24 = vmul.f32 %v715_v63, %v2886_v50 }
 0x123   : > { %741 = vrot.lane.b32.xlu1 %v735_v26, %s2573_s23  ;;  %422 = vrot.lane.b32.xlu0 %v418_v25, %s2570_s8  ;;  %v856_v25 = vstv %s2236_s17  ;;  %s2243_s17 = sld [smem:[#allocation6 + $0x17]] }
 0x127   : > { %745 = vrot.lane.b32.xlu1 %v737_v28, %s2573_s23  ;;  %448 = vrot.lane.b32.xlu0 %v444_v29, %s2571_s3  ;;  %v857_v28 = vmul.f32 %v856_v25, %v2831_v21  ;;  %v755_v29 = vmul.f32 %v753_v6, %v2886_v50 }
 0x12b   : > { %779 = vrot.lane.b32.xlu1 %v773_v31, %s2574_s5  ;;  %474 = vrot.lane.b32.xlu0 %v470_v32, %s2572_s15  ;;  %v859_v32 = vmul.f32 %v856_v25, %v2874_v43 }
 0x12f   : > { %783 = vrot.lane.b32.xlu1 %v775_v34, %s2574_s5  ;;  %500 = vrot.lane.b32.xlu0 %v496_v35, %s2573_s23  ;;  %v894_v34 = vstv %s2237_s16  ;;  %s2292_s16 = sld [smem:[#allocation6 + $0x48]] }
 0x133   : > { %844 = vrot.lane.b32.xlu1 %v838_v37, %s2569_s24  ;;  %526 = vrot.lane.b32.xlu0 %v522_v38, %s2574_s5  ;;  %v895_v37 = vmul.f32 %v894_v34, %v2831_v21  ;;  %v858_v38 = vmul.f32 %v856_v25, %v2886_v50 }
 0x137   : > { %848 = vrot.lane.b32.xlu1 %v840_v40, %s2569_s24  ;;  %570 = vrot.lane.b32.xlu0 %v564_v42, %s2569_s24  ;;  %v897_v42 = vmul.f32 %v894_v34, %v2874_v43 }
 0x13b   : > { %882 = vrot.lane.b32.xlu1 %v876_v46, %s2570_s8  ;;  %574 = vrot.lane.b32.xlu0 %v566_v45, %s2569_s24  ;;  %v896_v45 = vmul.f32 %v894_v34, %v2886_v50  ;;  %v913_v46 = vstv %s2286_s30  ;;  %s2244_s30 = sld [smem:[#allocation6 + $0x18]] }
 0x13f   : > { %886 = vrot.lane.b32.xlu1 %v878_v48, %s2570_s8  ;;  %608 = vrot.lane.b32.xlu0 %v602_v49, %s2570_s8  ;;  %v915_v49 = vmul.f32 %v913_v46, %v2772_v44 }
 0x143   : > { %612 = vrot.lane.b32.xlu0 %v604_v51, %s2570_s8  ;;  %398 = vrot.lane.b32.xlu1 %v393_v52, %s2569_s24  ;;  %v914_v51 = vmul.f32 %v913_v46, %v2768_v41  ;;  %v932_v52 = vstv %s2238_s6  ;;  %s2293_s6 = sld [smem:[#allocation6 + $0x49]] }
 0x147   : > { %646 = vrot.lane.b32.xlu0 %v640_v54, %s2571_s3  ;;  %424 = vrot.lane.b32.xlu1 %v419_v55, %s2570_s8  ;;  %v933_v55 = vmul.f32 %v932_v52, %v2831_v21 }
 0x14b   : > { %650 = vrot.lane.b32.xlu0 %v642_v56, %s2571_s3  ;;  %450 = vrot.lane.b32.xlu1 %v445_v57, %s2571_s3  ;;  %v916_v56 = vmul.f32 %v913_v46, %v2800_v1 }
 0x14f   : > { %684 = vrot.lane.b32.xlu0 %v678_v59, %s2572_s15  ;;  %476 = vrot.lane.b32.xlu1 %v471_v60, %s2572_s15  ;;  %v935_v59 = vmul.f32 %v932_v52, %v2874_v43  ;;  %v934_v60 = vmul.f32 %v932_v52, %v2886_v50 }
 0x153   : > { %688 = vrot.lane.b32.xlu0 %v680_v61, %s2572_s15  ;;  %502 = vrot.lane.b32.xlu1 %v497_v62, %s2573_s23  ;;  %v951_v61 = vstv %s2287_s7  ;;  %s2245_s7 = sld [smem:[#allocation6 + $0x19]] }
 0x157   : > { %722 = vrot.lane.b32.xlu0 %v716_v0, %s2573_s23  ;;  %528 = vrot.lane.b32.xlu1 %v523_v2, %s2574_s5  ;;  %v953_v0 = vmul.f32 %v951_v61, %v2772_v44  ;;  %v952_v2 = vmul.f32 %v951_v61, %v2768_v41 }
 0x159   : > { %v2912_v3 = vpop.permute.xlu0 %409 }
 0x15b   : > { %726 = vrot.lane.b32.xlu0 %v718_v4, %s2573_s23  ;;  %572 = vrot.lane.b32.xlu1 %v565_v5, %s2569_s24  ;;  %v970_v4 = vstv %s2239_s18  ;;  %s2294_s18 = sld [smem:[#allocation6 + $0x4a]] }
 0x15c   : > { %v973_v15 = vmul.f32 %v970_v4, %v2874_v43 }
 0x15d   : > { %v2918_v7 = vpop.permute.xlu1 %411  ;;  %v2920_v8 = vpop.permute.xlu0 %435 }
 0x15f   : > { %760 = vrot.lane.b32.xlu0 %v754_v9, %s2574_s5  ;;  %610 = vrot.lane.b32.xlu1 %v603_v10, %s2570_s8  ;;  %v971_v9 = vmul.f32 %v970_v4, %v2831_v21  ;;  %v954_v10 = vmul.f32 %v951_v61, %v2800_v1 }
 0x161   : > { %v2926_v11 = vpop.permute.xlu1 %437  ;;  %v2928_v12 = vpop.permute.xlu0 %461 }
 0x163   : > { %764 = vrot.lane.b32.xlu0 %v756_v13, %s2574_s5  ;;  %648 = vrot.lane.b32.xlu1 %v641_v14, %s2571_s3 }
 0x165   : > { %v2934_v16 = vpop.permute.xlu1 %463  ;;  %v2936_v17 = vpop.permute.xlu0 %487 }
 0x166   : > { %3921 = vst [vmem:[#allocation15_spill] sm:$0xff] %v2934_v16  ;;  %3922 = vst [vmem:[#allocation16_spill] sm:$0xff] %v2936_v17 }
 0x167   : > { %825 = vrot.lane.b32.xlu0 %v819_v18, %s2569_s24  ;;  %686 = vrot.lane.b32.xlu1 %v679_v19, %s2572_s15  ;;  %v972_v18 = vmul.f32 %v970_v4, %v2886_v50  ;;  %v989_v19 = vstv %s2288_s20  ;;  %s2246_s20 = sld [smem:[#allocation6 + $0x1a]] }
 0x168   : > { %v991_v25 = vmul.f32 %v989_v19, %v2772_v44 }
 0x169   : > { %v2942_v20 = vpop.permute.xlu1 %489  ;;  %v2944_v22 = vpop.permute.xlu0 %513 }
 0x16a   : > { %3923 = vst [vmem:[#allocation17_spill] sm:$0xff] %v2942_v20  ;;  %3924 = vst [vmem:[#allocation18_spill] sm:$0xff] %v2944_v22 }
 0x16b   : > { %829 = vrot.lane.b32.xlu0 %v821_v23, %s2569_s24  ;;  %724 = vrot.lane.b32.xlu1 %v717_v24, %s2573_s23 }
 0x16d   : > { %v2950_v26 = vpop.permute.xlu1 %515  ;;  %v2952_v27 = vpop.permute.xlu0 %539 }
 0x16e   : > { %3925 = vst [vmem:[#allocation19_spill] sm:$0xff] %v2950_v26  ;;  %3926 = vst [vmem:[#allocation20_spill] sm:$0xff] %v2952_v27  ;;  %v1168_v27 = vstv %s2293_s6  ;;  %s2251_s6 = sld [smem:[#allocation6 + $0x1f]] }
 0x16f   : > { %863 = vrot.lane.b32.xlu0 %v857_v28, %s2570_s8  ;;  %762 = vrot.lane.b32.xlu1 %v755_v29, %s2574_s5  ;;  %v990_v28 = vmul.f32 %v989_v19, %v2768_v41  ;;  %v1008_v29 = vstv %s2240_s26  ;;  %s2295_s26 = sld [smem:[#allocation6 + $0x4b]] }
 0x170   : > { %v1009_v34 = vmul.f32 %v1008_v29, %v2831_v21  ;;  %v1010_v46 = vmul.f32 %v1008_v29, %v2886_v50 }
 0x171   : > { %v2958_v30 = vpop.permute.xlu1 %541  ;;  %v2960_v31 = vpop.permute.xlu0 %591 }
 0x172   : > { %3927 = vst [vmem:[#allocation21_spill] sm:$0xff] %v2958_v30 }
 0x173   : > { %867 = vrot.lane.b32.xlu0 %v859_v32, %s2570_s8  ;;  %827 = vrot.lane.b32.xlu1 %v820_v33, %s2569_s24 }
 0x175   : > { %v2966_v35 = vpop.permute.xlu1 %589  ;;  %v2968_v36 = vpop.permute.xlu0 %629 }
 0x177   : > { %901 = vrot.lane.b32.xlu0 %v895_v37, %s2571_s3  ;;  %865 = vrot.lane.b32.xlu1 %v858_v38, %s2570_s8  ;;  %v992_v37 = vmul.f32 %v989_v19, %v2800_v1 }
 0x179   : > { %v2974_v39 = vpop.permute.xlu1 %593  ;;  %v2976_v40 = vpop.permute.xlu0 %667 }
 0x17a   : > { %3928 = vst [vmem:[#allocation22_spill] sm:$0xff] %v2976_v40 }
 0x17b   : > { %905 = vrot.lane.b32.xlu0 %v897_v42, %s2571_s3  ;;  %903 = vrot.lane.b32.xlu1 %v896_v45, %s2571_s3  ;;  %v1011_v45 = vmul.f32 %v1008_v29, %v2874_v43 }
 0x17d   : > { %v2982_v47 = vpop.permute.xlu1 %627  ;;  %v2984_v48 = vpop.permute.xlu0 %705 }
 0x17e   : > { %3929 = vst [vmem:[#allocation23_spill] sm:$0xff] %v2984_v48 }
 0x17f   : > { %922 = vrot.lane.b32.xlu0 %v915_v49, %s2571_s3  ;;  %920 = vrot.lane.b32.xlu1 %v914_v51, %s2571_s3  ;;  %v1027_v49 = vstv %s2289_s27  ;;  %s2247_s27 = sld [smem:[#allocation6 + $0x1b]] }
 0x181   : > { %v2990_v53 = vpop.permute.xlu1 %631  ;;  %v2992_v54 = vpop.permute.xlu0 %743 }
 0x182   : > { %3930 = vst [vmem:[#allocation24_spill] sm:$0xff] %v2992_v54  ;;  %v1225_v54 = vstv %s2246_s20  ;;  %s2301_s20 = sld [smem:[#allocation6 + $0x51]] }
 0x183   : > { %939 = vrot.lane.b32.xlu0 %v933_v55, %s2572_s15  ;;  %924 = vrot.lane.b32.xlu1 %v916_v56, %s2571_s3  ;;  %v1029_v55 = vmul.f32 %v1027_v49, %v2772_v44  ;;  %v1028_v56 = vmul.f32 %v1027_v49, %v2768_v41 }
 0x185   : > { %v2998_v57 = vpop.permute.xlu1 %665  ;;  %v3000_v58 = vpop.permute.xlu0 %781 }
 0x186   : > { %3931 = vst [vmem:[#allocation25_spill] sm:$0xff] %v2998_v57  ;;  %3932 = vst [vmem:[#allocation26_spill] sm:$0xff] %v3000_v58  ;;  %v1187_v58 = vstv %s2245_s7  ;;  %s2300_s7 = sld [smem:[#allocation6 + $0x50]] }
 0x187   : > { %943 = vrot.lane.b32.xlu0 %v935_v59, %s2572_s15  ;;  %941 = vrot.lane.b32.xlu1 %v934_v60, %s2572_s15  ;;  %v1073_v59 = vstv %s2242_s19  ;;  %s2296_s19 = sld [smem:[#allocation6 + $0x4c]] }
 0x189   : > { %v3006_v62 = vpop.permute.xlu1 %669  ;;  %v3008_v63 = vpop.permute.xlu0 %846 }
 0x18a   : > { %3933 = vst [vmem:[#allocation27_spill] sm:$0xff] %v3006_v62  ;;  %3934 = vst [vmem:[#allocation28_spill] sm:$0xff] %v3008_v63 }
 0x18b   : > { %960 = vrot.lane.b32.xlu0 %v953_v0, %s2572_s15  ;;  %958 = vrot.lane.b32.xlu1 %v952_v2, %s2572_s15  ;;  %v1074_v0 = vmul.f32 %v1073_v59, %v2831_v21  ;;  %v1030_v2 = vmul.f32 %v1027_v49, %v2800_v1 }
 0x18d   : > { %v3014_v5 = vpop.permute.xlu1 %703  ;;  %v3016_v6 = vpop.permute.xlu0 %884 }
 0x18e   : > { %3935 = vst [vmem:[#allocation29_spill] sm:$0xff] %v3014_v5  ;;  %3936 = vst [vmem:[#allocation30_spill] sm:$0xff] %v3016_v6 }
 0x18f   : > { %977 = vrot.lane.b32.xlu0 %v971_v9, %s2573_s23  ;;  %962 = vrot.lane.b32.xlu1 %v954_v10, %s2572_s15  ;;  %v1075_v10 = vmul.f32 %v1073_v59, %v2886_v50 }
 0x191   : > { %v3022_v13 = vpop.permute.xlu1 %707  ;;  %v3024_v14 = vpop.permute.xlu0 %396 }
 0x192   : > { %3937 = vst [vmem:[#allocation31_spill] sm:$0xff] %v3022_v13 }
 0x193   : > { %981 = vrot.lane.b32.xlu0 %v973_v15, %s2573_s23  ;;  %979 = vrot.lane.b32.xlu1 %v972_v18, %s2573_s23  ;;  %v1076_v15 = vmul.f32 %v1073_v59, %v2874_v43  ;;  %v1092_v18 = vstv %s2291_s28  ;;  %s2249_s28 = sld [smem:[#allocation6 + $0x1d]] }
 0x194   : > { %v1094_v29 = vmul.f32 %v1092_v18, %v2772_v44 }
 0x195   : > { %v3030_v23 = vpop.permute.xlu1 %741  ;;  %v3032_v24 = vpop.permute.xlu0 %422 }
 0x196   : > { %3938 = vst [vmem:[#allocation32_spill] sm:$0xff] %v3030_v23 }
 0x197   : > { %998 = vrot.lane.b32.xlu0 %v991_v25, %s2573_s23  ;;  %996 = vrot.lane.b32.xlu1 %v990_v28, %s2573_s23  ;;  %v1093_v28 = vmul.f32 %v1092_v18, %v2768_v41 }
 0x199   : > { %v3038_v32 = vpop.permute.xlu1 %745  ;;  %v3040_v33 = vpop.permute.xlu0 %448  ;;  %v1328_v5 = vstv %s2249_s28  ;;  %s2303_s28 = sld [smem:[#allocation6 + $0x53]] }
 0x19a   : > { %3939 = vst [vmem:[#allocation33_spill] sm:$0xff] %v3038_v32 }
 0x19b   : > { %1015 = vrot.lane.b32.xlu0 %v1009_v34, %s2574_s5  ;;  %1000 = vrot.lane.b32.xlu1 %v992_v37, %s2573_s23  ;;  %v1111_v34 = vstv %s2243_s17  ;;  %s2298_s17 = sld [smem:[#allocation6 + $0x4e]] }
 0x19c   : > { %v1112_v49 = vmul.f32 %v1111_v34, %v2831_v21  ;;  %v1113_v59 = vmul.f32 %v1111_v34, %v2886_v50 }
 0x19d   : > { %v3046_v38 = vpop.permute.xlu1 %779  ;;  %v3048_v42 = vpop.permute.xlu0 %474 }
 0x19e   : > { %3940 = vst [vmem:[#allocation34_spill] sm:$0xff] %v3046_v38 }
 0x19f   : > { %1019 = vrot.lane.b32.xlu0 %v1011_v45, %s2574_s5  ;;  %1017 = vrot.lane.b32.xlu1 %v1010_v46, %s2574_s5  ;;  %v1095_v46 = vmul.f32 %v1092_v18, %v2800_v1 }
 0x1a1   : > { %v3054_v51 = vpop.permute.xlu1 %783  ;;  %v3056_v52 = vpop.permute.xlu0 %500 }
 0x1a2   : > { %3941 = vst [vmem:[#allocation35_spill] sm:$0xff] %v3054_v51  ;;  %3942 = vst [vmem:[#allocation36_spill] sm:$0xff] %v3056_v52 }
 0x1a3   : > { %1036 = vrot.lane.b32.xlu0 %v1029_v55, %s2574_s5  ;;  %1034 = vrot.lane.b32.xlu1 %v1028_v56, %s2574_s5 }
 0x1a5   : > { %v3062_v60 = vpop.permute.xlu1 %844  ;;  %v3064_v61 = vpop.permute.xlu0 %526 }
 0x1a6   : > { %3943 = vst [vmem:[#allocation37_spill] sm:$0xff] %v3062_v60  ;;  %3944 = vst [vmem:[#allocation38_spill] sm:$0xff] %v3064_v61 }
 0x1a7   : > { %1080 = vrot.lane.b32.xlu0 %v1074_v0, %s2569_s24  ;;  %1038 = vrot.lane.b32.xlu1 %v1030_v2, %s2574_s5  ;;  %v1114_v0 = vmul.f32 %v1111_v34, %v2874_v43  ;;  %v1130_v2 = vstv %s2292_s16  ;;  %s2250_s16 = sld [smem:[#allocation6 + $0x1e]] }
 0x1a8   : > { %v1131_v18 = vmul.f32 %v1130_v2, %v2768_v41 }
 0x1a9   : > { %v3070_v4 = vpop.permute.xlu1 %848  ;;  %v3072_v9 = vpop.permute.xlu0 %570 }
 0x1aa   : > { %3945 = vst [vmem:[#allocation39_spill] sm:$0xff] %v3070_v4 }
 0x1ab   : > { %1082 = vrot.lane.b32.xlu1 %v1075_v10, %s2569_s24  ;;  %1084 = vrot.lane.b32.xlu0 %v1076_v15, %s2569_s24 }
 0x1ad   : > { %v3078_v19 = vpop.permute.xlu1 %882  ;;  %v3080_v25 = vpop.permute.xlu0 %574 }
 0x1ae   : > { %3946 = vst [vmem:[#allocation40_spill] sm:$0xff] %v3078_v19 }
 0x1af   : > { %1099 = vrot.lane.b32.xlu1 %v1093_v28, %s2569_s24  ;;  %1101 = vrot.lane.b32.xlu0 %v1094_v29, %s2569_s24  ;;  %v1132_v28 = vmul.f32 %v1130_v2, %v2772_v44  ;;  %v1149_v29 = vstv %s2244_s30  ;;  %s2299_s30 = sld [smem:[#allocation6 + $0x4f]] }
 0x1b1   : > { %v3086_v37 = vpop.permute.xlu1 %886  ;;  %v3088_v45 = vpop.permute.xlu0 %608 }
 0x1b2   : > { %3947 = vst [vmem:[#allocation41_spill] sm:$0xff] %v3086_v37  ;;  %v1263_v37 = vstv %s2247_s27  ;;  %s2302_s27 = sld [smem:[#allocation6 + $0x52]] }
 0x1b3   : > { %1103 = vrot.lane.b32.xlu1 %v1095_v46, %s2569_s24  ;;  %1118 = vrot.lane.b32.xlu0 %v1112_v49, %s2570_s8  ;;  %v1133_v49 = vmul.f32 %v1130_v2, %v2800_v1 }
 0x1b5   : > { %v3094_v55 = vpop.permute.xlu1 %398  ;;  %v3096_v56 = vpop.permute.xlu0 %612 }
 0x1b7   : > { %1120 = vrot.lane.b32.xlu1 %v1113_v59, %s2570_s8  ;;  %1122 = vrot.lane.b32.xlu0 %v1114_v0, %s2570_s8  ;;  %v1150_v59 = vmul.f32 %v1149_v29, %v2831_v21 }
 0x1b8   : > { %v1499_v6 = vstv %s2302_s27  ;;  %s2313_s27 = sld [smem:[#allocation6 + $0x5d]] }
 0x1b9   : > { %v3102_v10 = vpop.permute.xlu1 %424  ;;  %v3104_v15 = vpop.permute.xlu0 %646 }
 0x1bb   : > { %1137 = vrot.lane.b32.xlu1 %v1131_v18, %s2570_s8  ;;  %1139 = vrot.lane.b32.xlu0 %v1132_v28, %s2570_s8  ;;  %v1151_v18 = vmul.f32 %v1149_v29, %v2886_v50  ;;  %v1152_v28 = vmul.f32 %v1149_v29, %v2874_v43 }
 0x1bd   : > { %v3110_v34 = vpop.permute.xlu1 %450  ;;  %v3112_v46 = vpop.permute.xlu0 %650 }
 0x1be   : > { %3948 = vst [vmem:[#allocation42_spill] sm:$0xff] %v3112_v46 }
 0x1bf   : > { %1141 = vrot.lane.b32.xlu1 %v1133_v49, %s2570_s8  ;;  %1156 = vrot.lane.b32.xlu0 %v1150_v59, %s2571_s3  ;;  %v1169_v49 = vmul.f32 %v1168_v27, %v2768_v41  ;;  %v1170_v59 = vmul.f32 %v1168_v27, %v2772_v44 }
 0x1c1   : > { %v3118_v0 = vpop.permute.xlu1 %476  ;;  %v3120_v30 = vpop.permute.xlu0 %684 }
 0x1c2   : > { %3949 = vst [vmem:[#allocation43_spill] sm:$0xff] %v3118_v0  ;;  %3950 = vst [vmem:[#allocation44_spill] sm:$0xff] %v3120_v30 }
 0x1c3   : > { %1158 = vrot.lane.b32.xlu1 %v1151_v18, %s2571_s3  ;;  %1160 = vrot.lane.b32.xlu0 %v1152_v28, %s2571_s3  ;;  %v1171_v18 = vmul.f32 %v1168_v27, %v2800_v1  ;;  %v1188_v28 = vmul.f32 %v1187_v58, %v2831_v21 }
 0x1c5   : > { %v3126_v2 = vpop.permute.xlu1 %502  ;;  %v3128_v61 = vpop.permute.xlu0 %688 }
 0x1c6   : > { %3951 = vst [vmem:[#allocation45_spill] sm:$0xff] %v3126_v2  ;;  %3952 = vst [vmem:[#allocation46_spill] sm:$0xff] %v3128_v61  ;;  %v1244_v2 = vstv %s2295_s26  ;;  %s2253_s26 = sld [smem:[#allocation6 + $0x21]] }
 0x1c7   : > { %1175 = vrot.lane.b32.xlu1 %v1169_v49, %s2571_s3  ;;  %1177 = vrot.lane.b32.xlu0 %v1170_v59, %s2571_s3  ;;  %v1189_v49 = vmul.f32 %v1187_v58, %v2886_v50  ;;  %v1190_v59 = vmul.f32 %v1187_v58, %v2874_v43 }
 0x1c9   : > { %v3134_v29 = vpop.permute.xlu1 %528  ;;  %v3136_v51 = vpop.permute.xlu0 %722 }
 0x1ca   : > { %3953 = vst [vmem:[#allocation47_spill] sm:$0xff] %v3134_v29  ;;  %3954 = vst [vmem:[#allocation48_spill] sm:$0xff] %v3136_v51  ;;  %v1206_v29 = vstv %s2294_s18  ;;  %s2252_s18 = sld [smem:[#allocation6 + $0x20]] }
 0x1cb   : > { %1179 = vrot.lane.b32.xlu1 %v1171_v18, %s2571_s3  ;;  %1194 = vrot.lane.b32.xlu0 %v1188_v28, %s2572_s15  ;;  %v1207_v18 = vmul.f32 %v1206_v29, %v2768_v41  ;;  %v1208_v28 = vmul.f32 %v1206_v29, %v2772_v44 }
 0x1cd   : > { %v3142_v38 = vpop.permute.xlu1 %572  ;;  %v3144_v26 = vpop.permute.xlu0 %726 }
 0x1ce   : > { %3955 = vst [vmem:[#allocation49_spill] sm:$0xff] %v3144_v26 }
 0x1cf   : > { %1196 = vrot.lane.b32.xlu1 %v1189_v49, %s2572_s15  ;;  %1198 = vrot.lane.b32.xlu0 %v1190_v59, %s2572_s15  ;;  %v1209_v49 = vmul.f32 %v1206_v29, %v2800_v1  ;;  %v1226_v59 = vmul.f32 %v1225_v54, %v2831_v21 }
 0x1d1   : > { %v3150_v27 = vpop.permute.xlu1 %610  ;;  %v3152_v32 = vpop.permute.xlu0 %760 }
 0x1d2   : > { %3956 = vst [vmem:[#allocation50_spill] sm:$0xff] %v3152_v32 }
 0x1d3   : > { %1213 = vrot.lane.b32.xlu1 %v1207_v18, %s2572_s15  ;;  %1215 = vrot.lane.b32.xlu0 %v1208_v28, %s2572_s15  ;;  %v1227_v18 = vmul.f32 %v1225_v54, %v2886_v50  ;;  %v1228_v28 = vmul.f32 %v1225_v54, %v2874_v43 }
 0x1d5   : > { %v3158_v58 = vpop.permute.xlu1 %648  ;;  %v3160_v23 = vpop.permute.xlu0 %764 }
 0x1d6   : > { %3957 = vst [vmem:[#allocation51_spill] sm:$0xff] %v3160_v23 }
 0x1d7   : > { %1217 = vrot.lane.b32.xlu1 %v1209_v49, %s2572_s15  ;;  %1232 = vrot.lane.b32.xlu0 %v1226_v59, %s2573_s23  ;;  %v1245_v49 = vmul.f32 %v1244_v2, %v2768_v41  ;;  %v1246_v59 = vmul.f32 %v1244_v2, %v2772_v44 }
 0x1d9   : > { %v3166_v32 = vpop.permute.xlu1 %686  ;;  %v3168_v26 = vpop.permute.xlu0 %825 }
 0x1da   : > { %3958 = vst [vmem:[#allocation52_spill] sm:$0xff] %v3166_v32  ;;  %3959 = vst [vmem:[#allocation53_spill] sm:$0xff] %v3168_v26 }
 0x1db   : > { %1234 = vrot.lane.b32.xlu1 %v1227_v18, %s2573_s23  ;;  %1236 = vrot.lane.b32.xlu0 %v1228_v28, %s2573_s23  ;;  %v1247_v18 = vmul.f32 %v1244_v2, %v2800_v1  ;;  %v1264_v28 = vmul.f32 %v1263_v37, %v2831_v21 }
 0x1dd   : > { %v3174_v29 = vpop.permute.xlu1 %724  ;;  %v3176_v23 = vpop.permute.xlu0 %829 }
 0x1de   : > { %3960 = vst [vmem:[#allocation54_spill] sm:$0xff] %v3174_v29  ;;  %3961 = vst [vmem:[#allocation55_spill] sm:$0xff] %v3176_v23 }
 0x1df   : > { %1251 = vrot.lane.b32.xlu1 %v1245_v49, %s2573_s23  ;;  %1253 = vrot.lane.b32.xlu0 %v1246_v59, %s2573_s23  ;;  %v1265_v49 = vmul.f32 %v1263_v37, %v2886_v50  ;;  %v1266_v59 = vmul.f32 %v1263_v37, %v2874_v43 }
 0x1e1   : > { %v3182_v54 = vpop.permute.xlu1 %762  ;;  %v3184_v51 = vpop.permute.xlu0 %863 }
 0x1e2   : > { %3962 = vst [vmem:[#allocation56_spill] sm:$0xff] %v3182_v54  ;;  %3963 = vst [vmem:[#allocation57_spill] sm:$0xff] %v3184_v51  ;;  %v1282_v54 = vstv %s2296_s19  ;;  %s2254_s19 = sld [smem:[#allocation6 + $0x22]] }
 0x1e3   : > { %1255 = vrot.lane.b32.xlu1 %v1247_v18, %s2573_s23  ;;  %1270 = vrot.lane.b32.xlu0 %v1264_v28, %s2574_s5  ;;  %v1283_v18 = vmul.f32 %v1282_v54, %v2768_v41  ;;  %v1284_v28 = vmul.f32 %v1282_v54, %v2772_v44 }
 0x1e5   : > { %v3190_v29 = vpop.permute.xlu1 %827  ;;  %v3192_v13 = vpop.permute.xlu0 %867 }
 0x1e6   : > { %3964 = vst [vmem:[#allocation58_spill] sm:$0xff] %v3192_v13 }
 0x1e7   : > { %1272 = vrot.lane.b32.xlu1 %v1265_v49, %s2574_s5  ;;  %1274 = vrot.lane.b32.xlu0 %v1266_v59, %s2574_s5  ;;  %v1285_v49 = vmul.f32 %v1282_v54, %v2800_v1  ;;  %v1329_v59 = vmul.f32 %v1328_v5, %v2831_v21 }
 0x1e8   : > { %v1518_v48 = vstv %s2254_s19  ;;  %s2307_s19 = sld [smem:[#allocation6 + $0x57]] }
 0x1e9   : > { %v3198_v2 = vpop.permute.xlu1 %865  ;;  %v3200_v19 = vpop.permute.xlu0 %901 }
 0x1ea   : > { %3965 = vst [vmem:[#allocation59_spill] sm:$0xff] %v3198_v2  ;;  %3966 = vst [vmem:[#allocation60_spill] sm:$0xff] %v3200_v19 }
 0x1eb   : > { %1289 = vrot.lane.b32.xlu1 %v1283_v18, %s2574_s5  ;;  %1291 = vrot.lane.b32.xlu0 %v1284_v28, %s2574_s5  ;;  %v1330_v18 = vmul.f32 %v1328_v5, %v2886_v50  ;;  %v1331_v28 = vmul.f32 %v1328_v5, %v2874_v43 }
 0x1ed   : > { %v3206_v37 = vpop.permute.xlu1 %903  ;;  %v3208_v20 = vpop.permute.xlu0 %905 }
 0x1ee   : > { %3967 = vst [vmem:[#allocation61_spill] sm:$0xff] %v3206_v37  ;;  %3968 = vst [vmem:[#allocation62_spill] sm:$0xff] %v3208_v20  ;;  %v1347_v37 = vstv %s2298_s17  ;;  %s2256_s17 = sld [smem:[#allocation6 + $0x24]] }
 0x1ef   : > { %1293 = vrot.lane.b32.xlu1 %v1285_v49, %s2574_s5  ;;  %1335 = vrot.lane.b32.xlu0 %v1329_v59, %s2569_s24  ;;  %v1348_v49 = vmul.f32 %v1347_v37, %v2768_v41  ;;  %v1349_v59 = vmul.f32 %v1347_v37, %v2772_v44 }
 0x1f1   : > { %v3214_v19 = vpop.permute.xlu1 %920  ;;  %v3216_v22 = vpop.permute.xlu0 %922 }
 0x1f2   : > { %3969 = vst [vmem:[#allocation63_spill] sm:$0xff] %v3214_v19  ;;  %3970 = vst [vmem:[#allocation64_spill] sm:$0xff] %v3216_v22  ;;  %v1366_v19 = vstv %s2250_s16  ;;  %s2305_s16 = sld [smem:[#allocation6 + $0x55]] }
 0x1f3   : > { %1337 = vrot.lane.b32.xlu1 %v1330_v18, %s2569_s24  ;;  %1339 = vrot.lane.b32.xlu0 %v1331_v28, %s2569_s24  ;;  %v1350_v18 = vmul.f32 %v1347_v37, %v2800_v1  ;;  %v1367_v28 = vmul.f32 %v1366_v19, %v2831_v21 }
 0x1f5   : > { %v3222_v54 = vpop.permute.xlu1 %924  ;;  %v3224_v20 = vpop.permute.xlu0 %939 }
 0x1f6   : > { %3971 = vst [vmem:[#allocation65_spill] sm:$0xff] %v3222_v54  ;;  %3972 = vst [vmem:[#allocation66_spill] sm:$0xff] %v3224_v20 }
 0x1f7   : > { %1354 = vrot.lane.b32.xlu1 %v1348_v49, %s2569_s24  ;;  %1356 = vrot.lane.b32.xlu0 %v1349_v59, %s2569_s24  ;;  %v1368_v49 = vmul.f32 %v1366_v19, %v2886_v50  ;;  %v1369_v59 = vmul.f32 %v1366_v19, %v2874_v43 }
 0x1f9   : > { %v3230_v5 = vpop.permute.xlu1 %941  ;;  %v3232_v22 = vpop.permute.xlu0 %943 }
 0x1fa   : > { %3973 = vst [vmem:[#allocation67_spill] sm:$0xff] %v3230_v5  ;;  %3974 = vst [vmem:[#allocation68_spill] sm:$0xff] %v3232_v22  ;;  %v1385_v5 = vstv %s2299_s30  ;;  %s2257_s30 = sld [smem:[#allocation6 + $0x25]] }
 0x1fb   : > { %1358 = vrot.lane.b32.xlu1 %v1350_v18, %s2569_s24  ;;  %1373 = vrot.lane.b32.xlu0 %v1367_v28, %s2570_s8  ;;  %v1386_v18 = vmul.f32 %v1385_v5, %v2768_v41  ;;  %v1387_v28 = vmul.f32 %v1385_v5, %v2772_v44 }
 0x1fd   : > { %v3238_v54 = vpop.permute.xlu1 %958  ;;  %v3240_v20 = vpop.permute.xlu0 %960 }
 0x1fe   : > { %3975 = vst [vmem:[#allocation69_spill] sm:$0xff] %v3238_v54  ;;  %3976 = vst [vmem:[#allocation70_spill] sm:$0xff] %v3240_v20  ;;  %v1404_v54 = vstv %s2251_s6  ;;  %s2306_s6 = sld [smem:[#allocation6 + $0x56]] }
 0x1ff   : > { %1375 = vrot.lane.b32.xlu1 %v1368_v49, %s2570_s8  ;;  %1377 = vrot.lane.b32.xlu0 %v1369_v59, %s2570_s8  ;;  %v1388_v49 = vmul.f32 %v1385_v5, %v2800_v1  ;;  %v1405_v59 = vmul.f32 %v1404_v54, %v2831_v21 }
 0x201   : > { %v3246_v37 = vpop.permute.xlu1 %962  ;;  %v3248_v22 = vpop.permute.xlu0 %977 }
 0x202   : > { %3977 = vst [vmem:[#allocation71_spill] sm:$0xff] %v3246_v37  ;;  %3978 = vst [vmem:[#allocation72_spill] sm:$0xff] %v3248_v22 }
 0x203   : > { %1392 = vrot.lane.b32.xlu1 %v1386_v18, %s2570_s8  ;;  %1394 = vrot.lane.b32.xlu0 %v1387_v28, %s2570_s8  ;;  %v1406_v18 = vmul.f32 %v1404_v54, %v2886_v50  ;;  %v1407_v28 = vmul.f32 %v1404_v54, %v2874_v43 }
 0x205   : > { %v3254_v19 = vpop.permute.xlu1 %979  ;;  %v3256_v20 = vpop.permute.xlu0 %981 }
 0x206   : > { %3979 = vst [vmem:[#allocation73_spill] sm:$0xff] %v3254_v19  ;;  %3980 = vst [vmem:[#allocation74_spill] sm:$0xff] %v3256_v20  ;;  %v1423_v19 = vstv %s2300_s7  ;;  %s2258_s7 = sld [smem:[#allocation6 + $0x26]] }
 0x207   : > { %1396 = vrot.lane.b32.xlu1 %v1388_v49, %s2570_s8  ;;  %1411 = vrot.lane.b32.xlu0 %v1405_v59, %s2571_s3  ;;  %v1424_v49 = vmul.f32 %v1423_v19, %v2768_v41  ;;  %v1425_v59 = vmul.f32 %v1423_v19, %v2772_v44 }
 0x209   : > { %v3262_v37 = vpop.permute.xlu1 %996  ;;  %v3264_v22 = vpop.permute.xlu0 %998 }
 0x20a   : > { %3981 = vst [vmem:[#allocation75_spill] sm:$0xff] %v3262_v37  ;;  %3982 = vst [vmem:[#allocation76_spill] sm:$0xff] %v3264_v22  ;;  %v1442_v37 = vstv %s2252_s18  ;;  %s2263_s18 = sld [smem:[#allocation6 + $0x2b]] }
 0x20b   : > { %1413 = vrot.lane.b32.xlu1 %v1406_v18, %s2571_s3  ;;  %1415 = vrot.lane.b32.xlu0 %v1407_v28, %s2571_s3  ;;  %v1426_v18 = vmul.f32 %v1423_v19, %v2800_v1  ;;  %v1443_v28 = vmul.f32 %v1442_v37, %v2831_v21 }
 0x20d   : > { %v3270_v5 = vpop.permute.xlu1 %1000  ;;  %v3272_v20 = vpop.permute.xlu0 %1015 }
 0x20e   : > { %3983 = vst [vmem:[#allocation77_spill] sm:$0xff] %v3270_v5  ;;  %3984 = vst [vmem:[#allocation78_spill] sm:$0xff] %v3272_v20  ;;  %v1461_v5 = vstv %s2301_s20  ;;  %s2312_s20 = sld [smem:[#allocation6 + $0x5c]] }
 0x20f   : > { %1430 = vrot.lane.b32.xlu1 %v1424_v49, %s2571_s3  ;;  %1432 = vrot.lane.b32.xlu0 %v1425_v59, %s2571_s3  ;;  %v1444_v49 = vmul.f32 %v1442_v37, %v2886_v50  ;;  %v1445_v59 = vmul.f32 %v1442_v37, %v2874_v43 }
 0x211   : > { %v3278_v54 = vpop.permute.xlu1 %1017  ;;  %v3280_v22 = vpop.permute.xlu0 %1019 }
 0x212   : > { %3985 = vst [vmem:[#allocation79_spill] sm:$0xff] %v3278_v54  ;;  %3986 = vst [vmem:[#allocation80_spill] sm:$0xff] %v3280_v22  ;;  %v1480_v54 = vstv %s2253_s26  ;;  %s2264_s26 = sld [smem:[#allocation6 + $0x2c]] }
 0x213   : > { %1434 = vrot.lane.b32.xlu1 %v1426_v18, %s2571_s3  ;;  %1449 = vrot.lane.b32.xlu0 %v1443_v28, %s2572_s15  ;;  %v3298_v18 = vld [vmem:[#allocation5] sm:$0xff] }
 0x214   : > { %v1462_v28 = vmul.f32 %v3298_v18, %v1461_v5 }
 0x215   : > { %v3286_v41 = vpop.permute.xlu1 %1034  ;;  %v3288_v44 = vpop.permute.xlu0 %1036 }
 0x216   : > { %3987 = vst [vmem:[#allocation81_spill] sm:$0xff] %v3286_v41  ;;  %3988 = vst [vmem:[#allocation82_spill] sm:$0xff] %v3288_v44  ;;  %v3301_v41 = vld [vmem:[#allocation5 + $0x8] sm:$0xff] }
 0x217   : > { %1451 = vrot.lane.b32.xlu1 %v1444_v49, %s2572_s15  ;;  %1453 = vrot.lane.b32.xlu0 %v1445_v59, %s2572_s15  ;;  %v1463_v44 = vmul.f32 %v3301_v41, %v1461_v5  ;;  %v1464_v59 = vmul.f32 %v1461_v5, %v2800_v1 }
 0x219   : > { %v3294_v19 = vpop.permute.xlu1 %1038  ;;  %v3296_v22 = vpop.permute.xlu0 %1080 }
 0x21a   : > { %3989 = vst [vmem:[#allocation83_spill] sm:$0xff] %v3294_v19  ;;  %3990 = vst [vmem:[#allocation84_spill] sm:$0xff] %v3296_v22  ;;  %v1481_v19 = vmul.f32 %v1480_v54, %v2831_v21 }
 0x21b   : > { %1468 = vrot.lane.b32.xlu1 %v1462_v28, %s2572_s15  ;;  %1470 = vrot.lane.b32.xlu0 %v1463_v44, %s2572_s15  ;;  %v1482_v28 = vmul.f32 %v1480_v54, %v2886_v50  ;;  %v1483_v44 = vmul.f32 %v1480_v54, %v2874_v43 }
 0x21d   : > { %v3306_v37 = vpop.permute.xlu1 %1082  ;;  %v3308_v49 = vpop.permute.xlu0 %1084 }
 0x21e   : > { %3991 = vst [vmem:[#allocation85_spill] sm:$0xff] %v3306_v37  ;;  %3992 = vst [vmem:[#allocation86_spill] sm:$0xff] %v3308_v49 }
 0x21f   : > { %1472 = vrot.lane.b32.xlu1 %v1464_v59, %s2572_s15  ;;  %1487 = vrot.lane.b32.xlu0 %v1481_v19, %s2573_s23  ;;  %v1500_v59 = vmul.f32 %v3298_v18, %v1499_v6  ;;  %v1501_v19 = vmul.f32 %v3301_v41, %v1499_v6 }
 0x221   : > { %v3314_v20 = vpop.permute.xlu1 %1099  ;;  %v3316_v13 = vpop.permute.xlu0 %1101 }
 0x222   : > { %3993 = vst [vmem:[#allocation87_spill] sm:$0xff] %v3314_v20  ;;  %3994 = vst [vmem:[#allocation88_spill] sm:$0xff] %v3316_v13 }
 0x223   : > { %1489 = vrot.lane.b32.xlu1 %v1482_v28, %s2573_s23  ;;  %1491 = vrot.lane.b32.xlu0 %v1483_v44, %s2573_s23  ;;  %v1502_v28 = vmul.f32 %v1499_v6, %v2800_v1  ;;  %v1519_v44 = vmul.f32 %v1518_v48, %v2831_v21 }
 0x225   : > { %v3322_v5 = vpop.permute.xlu1 %1103  ;;  %v3324_v49 = vpop.permute.xlu0 %1118 }
 0x226   : > { %3995 = vst [vmem:[#allocation89_spill] sm:$0xff] %v3322_v5  ;;  %3996 = vst [vmem:[#allocation90_spill] sm:$0xff] %v3324_v49 }
 0x227   : > { %1506 = vrot.lane.b32.xlu1 %v1500_v59, %s2573_s23  ;;  %1508 = vrot.lane.b32.xlu0 %v1501_v19, %s2573_s23  ;;  %v1520_v59 = vmul.f32 %v1518_v48, %v2886_v50  ;;  %v1521_v19 = vmul.f32 %v1518_v48, %v2874_v43 }
 0x229   : > { %v3330_v54 = vpop.permute.xlu1 %1120  ;;  %v3332_v13 = vpop.permute.xlu0 %1122 }
 0x22a   : > { %3997 = vst [vmem:[#allocation91_spill] sm:$0xff] %v3330_v54  ;;  %3998 = vst [vmem:[#allocation92_spill] sm:$0xff] %v3332_v13  ;;  %v1537_v54 = vstv %s2303_s28  ;;  %v1583_v13 = vstv %s2256_s17  ;;  %s2248_s28 = sld [smem:[#allocation6 + $0x1c]]  ;;  %s2297_s17 = sld [smem:[#allocation6 + $0x4d]] }
 0x22b   : > { %1510 = vrot.lane.b32.xlu1 %v1502_v28, %s2573_s23  ;;  %1525 = vrot.lane.b32.xlu0 %v1519_v44, %s2574_s5  ;;  %v1538_v28 = vmul.f32 %v3298_v18, %v1537_v54  ;;  %v1539_v44 = vmul.f32 %v3301_v41, %v1537_v54 }
 0x22d   : > { %v3338_v5 = vpop.permute.xlu1 %1137  ;;  %v3340_v49 = vpop.permute.xlu0 %1139 }
 0x22e   : > { %3999 = vst [vmem:[#allocation93_spill] sm:$0xff] %v3338_v5  ;;  %4000 = vst [vmem:[#allocation94_spill] sm:$0xff] %v3340_v49 }
 0x22f   : > { %1527 = vrot.lane.b32.xlu1 %v1520_v59, %s2574_s5  ;;  %1529 = vrot.lane.b32.xlu0 %v1521_v19, %s2574_s5  ;;  %v3358_v59 = vld [vmem:[#allocation5 + $0x10] sm:$0x3f] }
 0x230   : > { %v1540_v19 = vmul.f32 %v3358_v59, %v1537_v54 }
 0x231   : > { %v3346_v1 = vpop.permute.xlu1 %1141  ;;  %v3348_v6 = vpop.permute.xlu0 %1156 }
 0x232   : > { %4001 = vst [vmem:[#allocation95_spill] sm:$0xff] %v3346_v1  ;;  %4002 = vst [vmem:[#allocation96_spill] sm:$0xff] %v3348_v6  ;;  %v1584_v1 = vmul.f32 %v1583_v13, %v2831_v21 }
 0x233   : > { %1544 = vrot.lane.b32.xlu1 %v1538_v28, %s2574_s5  ;;  %1546 = vrot.lane.b32.xlu0 %v1539_v44, %s2574_s5  ;;  %v1585_v44 = vmul.f32 %v1583_v13, %v2886_v50 }
 0x235   : > { %v3354_v48 = vpop.permute.xlu1 %1158  ;;  %v3356_v49 = vpop.permute.xlu0 %1160 }
 0x236   : > { %4003 = vst [vmem:[#allocation97_spill] sm:$0xff] %v3354_v48  ;;  %4004 = vst [vmem:[#allocation98_spill] sm:$0xff] %v3356_v49  ;;  %v1586_v48 = vmul.f32 %v1583_v13, %v2874_v43  ;;  %v1602_v49 = vstv %s2305_s16  ;;  %s2259_s16 = sld [smem:[#allocation6 + $0x27]] }
 0x237   : > { %1548 = vrot.lane.b32.xlu1 %v1540_v19, %s2574_s5  ;;  %1590 = vrot.lane.b32.xlu0 %v1584_v1, %s2569_s24  ;;  %v1603_v19 = vmul.f32 %v3298_v18, %v1602_v49  ;;  %v1604_v1 = vmul.f32 %v3301_v41, %v1602_v49 }
 0x239   : > { %v3364_v6 = vpop.permute.xlu1 %1175  ;;  %v3366_v28 = vpop.permute.xlu0 %1177 }
 0x23a   : > { %4005 = vst [vmem:[#allocation99_spill] sm:$0xff] %v3364_v6  ;;  %4006 = vst [vmem:[#allocation100_spill] sm:$0xff] %v3366_v28  ;;  %v1621_v6 = vstv %s2257_s30  ;;  %s2308_s30 = sld [smem:[#allocation6 + $0x58]] }
 0x23b   : > { %1592 = vrot.lane.b32.xlu1 %v1585_v44, %s2569_s24  ;;  %1594 = vrot.lane.b32.xlu0 %v1586_v48, %s2569_s24  ;;  %v1605_v48 = vmul.f32 %v3358_v59, %v1602_v49  ;;  %v1622_v44 = vmul.f32 %v1621_v6, %v2831_v21 }
 0x23c   : > { %v1697_v63 = vstv %s2259_s16  ;;  %s2311_s16 = sld [smem:[#allocation6 + $0x5b]] }
 0x23d   : > { %v3372_v54 = vpop.permute.xlu1 %1179  ;;  %v3374_v5 = vpop.permute.xlu0 %1194 }
 0x23e   : > { %4007 = vst [vmem:[#allocation101_spill] sm:$0xff] %v3372_v54  ;;  %4008 = vst [vmem:[#allocation102_spill] sm:$0xff] %v3374_v5 }
 0x23f   : > { %1609 = vrot.lane.b32.xlu1 %v1603_v19, %s2569_s24  ;;  %1611 = vrot.lane.b32.xlu0 %v1604_v1, %s2569_s24  ;;  %v1623_v19 = vmul.f32 %v1621_v6, %v2886_v50  ;;  %v1624_v1 = vmul.f32 %v1621_v6, %v2874_v43 }
 0x241   : > { %v3380_v13 = vpop.permute.xlu1 %1196  ;;  %v3382_v28 = vpop.permute.xlu0 %1198 }
 0x242   : > { %4009 = vst [vmem:[#allocation103_spill] sm:$0xff] %v3380_v13  ;;  %4010 = vst [vmem:[#allocation104_spill] sm:$0xff] %v3382_v28  ;;  %v1640_v13 = vstv %s2306_s6  ;;  %v1659_v28 = vstv %s2258_s7  ;;  %s2266_s6 = sld [smem:[#allocation6 + $0x2e]]  ;;  %s2260_s7 = sld [smem:[#allocation6 + $0x28]] }
 0x243   : > { %1613 = vrot.lane.b32.xlu1 %v1605_v48, %s2569_s24  ;;  %1628 = vrot.lane.b32.xlu0 %v1622_v44, %s2570_s8  ;;  %v1641_v48 = vmul.f32 %v3298_v18, %v1640_v13  ;;  %v1642_v44 = vmul.f32 %v3301_v41, %v1640_v13 }
 0x245   : > { %v3388_v54 = vpop.permute.xlu1 %1213  ;;  %v3390_v5 = vpop.permute.xlu0 %1215 }
 0x246   : > { %4011 = vst [vmem:[#allocation105_spill] sm:$0xff] %v3388_v54  ;;  %4012 = vst [vmem:[#allocation106_spill] sm:$0xff] %v3390_v5 }
 0x247   : > { %1630 = vrot.lane.b32.xlu1 %v1623_v19, %s2570_s8  ;;  %1632 = vrot.lane.b32.xlu0 %v1624_v1, %s2570_s8  ;;  %v1643_v19 = vmul.f32 %v3358_v59, %v1640_v13  ;;  %v3409_v1 = vld [vmem:[#allocation4] sm:$0xff] }
 0x249   : > { %v3396_v49 = vpop.permute.xlu1 %1217  ;;  %v3398_v21 = vpop.permute.xlu0 %1232 }
 0x24a   : > { %4013 = vst [vmem:[#allocation107_spill] sm:$0xff] %v3396_v49  ;;  %4014 = vst [vmem:[#allocation108_spill] sm:$0xff] %v3398_v21  ;;  %v1660_v49 = vmul.f32 %v3409_v1, %v1659_v28 }
 0x24b   : > { %1647 = vrot.lane.b32.xlu1 %v1641_v48, %s2570_s8  ;;  %1649 = vrot.lane.b32.xlu0 %v1642_v44, %s2570_s8  ;;  %v1661_v44 = vmul.f32 %v1659_v28, %v2886_v50 }
 0x24d   : > { %v3404_v6 = vpop.permute.xlu1 %1234  ;;  %v3406_v5 = vpop.permute.xlu0 %1236 }
 0x24e   : > { %4015 = vst [vmem:[#allocation109_spill] sm:$0xff] %v3404_v6  ;;  %4016 = vst [vmem:[#allocation110_spill] sm:$0xff] %v3406_v5  ;;  %v1662_v6 = vmul.f32 %v1659_v28, %v2874_v43  ;;  %v1838_v5 = vstv %s2263_s18  ;;  %s2309_s18 = sld [smem:[#allocation6 + $0x59]] }
 0x24f   : > { %1651 = vrot.lane.b32.xlu1 %v1643_v19, %s2570_s8  ;;  %1666 = vrot.lane.b32.xlu0 %v1660_v49, %s2571_s3  ;;  %v1839_v19 = vmul.f32 %v3409_v1, %v1838_v5  ;;  %v1840_v49 = vmul.f32 %v1838_v5, %v2886_v50 }
 0x251   : > { %v3414_v21 = vpop.permute.xlu1 %1251  ;;  %v3416_v48 = vpop.permute.xlu0 %1253 }
 0x252   : > { %4017 = vst [vmem:[#allocation111_spill] sm:$0xff] %v3414_v21  ;;  %4018 = vst [vmem:[#allocation112_spill] sm:$0xff] %v3416_v48  ;;  %v1857_v21 = vstv %s2312_s20  ;;  %v3451_v48 = vld [vmem:[#allocation4 + $0x8] sm:$0xff]  ;;  %s2267_s20 = sld [smem:[#allocation6 + $0x2f]] }
 0x253   : > { %1668 = vrot.lane.b32.xlu1 %v1661_v44, %s2571_s3  ;;  %1670 = vrot.lane.b32.xlu0 %v1662_v6, %s2571_s3  ;;  %v3434_v44 = vld [vmem:[#allocation4 + $0x10] sm:$0x3f] }
 0x254   : > { %v1841_v6 = vmul.f32 %v3434_v44, %v1838_v5 }
 0x255   : > { %v3422_v13 = vpop.permute.xlu1 %1255  ;;  %v3424_v54 = vpop.permute.xlu0 %1270 }
 0x256   : > { %4019 = vst [vmem:[#allocation113_spill] sm:$0xff] %v3422_v13  ;;  %4020 = vst [vmem:[#allocation114_spill] sm:$0xff] %v3424_v54  ;;  %v1858_v13 = vmul.f32 %v3298_v18, %v1857_v21 }
 0x257   : > { %1845 = vrot.lane.b32.xlu1 %v1839_v19, %s2569_s24  ;;  %1847 = vrot.lane.b32.xlu0 %v1840_v49, %s2569_s24  ;;  %v1859_v49 = vmul.f32 %v3301_v41, %v1857_v21 }
 0x259   : > { %v3430_v43 = vpop.permute.xlu1 %1272  ;;  %v3432_v28 = vpop.permute.xlu0 %1274 }
 0x25a   : > { %4021 = vst [vmem:[#allocation115_spill] sm:$0xff] %v3430_v43  ;;  %4022 = vst [vmem:[#allocation116_spill] sm:$0xff] %v3432_v28  ;;  %v1860_v43 = vmul.f32 %v3358_v59, %v1857_v21  ;;  %v1876_v28 = vstv %s2264_s26  ;;  %s2261_s26 = sld [smem:[#allocation6 + $0x29]] }
 0x25b   : > { %1849 = vrot.lane.b32.xlu1 %v1841_v6, %s2569_s24  ;;  %1864 = vrot.lane.b32.xlu0 %v1858_v13, %s2569_s24  ;;  %v1877_v6 = vmul.f32 %v3409_v1, %v1876_v28  ;;  %v1878_v13 = vmul.f32 %v3451_v48, %v1876_v28 }
 0x25d   : > { %v3440_v50 = vpop.permute.xlu1 %1289  ;;  %v3442_v19 = vpop.permute.xlu0 %1291 }
 0x25e   : > { %4023 = vst [vmem:[#allocation117_spill] sm:$0xff] %v3440_v50  ;;  %4024 = vst [vmem:[#allocation118_spill] sm:$0xff] %v3442_v19  ;;  %v1895_v50 = vstv %s2313_s27  ;;  %s2255_s27 = sld [smem:[#allocation6 + $0x23]] }
 0x25f   : > { %1866 = vrot.lane.b32.xlu1 %v1859_v49, %s2569_s24  ;;  %1868 = vrot.lane.b32.xlu0 %v1860_v43, %s2569_s24  ;;  %v1879_v49 = vmul.f32 %v3434_v44, %v1876_v28  ;;  %v1896_v43 = vmul.f32 %v3298_v18, %v1895_v50  ;;  %s2265_s24 = sld [smem:[#allocation6 + $0x2d]]  ;;  %v1897_v4 = vmul.f32 %v3301_v41, %v1895_v50 }
 0x261   : > { %v3448_v5 = vpop.permute.xlu1 %1293  ;;  %v1336_v54 = vpop.permute.xlu0 %1335 }
 0x262   : > { %4025 = vst [vmem:[#allocation119_spill] sm:$0xff] %v3448_v5 }
 0x263   : > { %1883 = vrot.lane.b32.xlu1 %v1877_v6, %s2570_s8  ;;  %1885 = vrot.lane.b32.xlu0 %v1878_v13, %s2570_s8  ;;  %v1898_v6 = vmul.f32 %v3358_v59, %v1895_v50  ;;  %v1678_v13 = vstv %s2307_s19  ;;  %s2316_s19 = sld [smem:[#allocation6 + $0x60]] }
 0x264   : > { %v1679_v51 = vmul.f32 %v3298_v18, %v1678_v13  ;;  %v1681_v37 = vmul.f32 %v3358_v59, %v1678_v13 }
 0x265   : > { %v1338_v21 = vpop.permute.xlu1 %1337  ;;  %v1340_v19 = vpop.permute.xlu0 %1339  ;;  %v1914_v30 = vstv %s2265_s24  ;;  %s2310_s24 = sld [smem:[#allocation6 + $0x5a]] }
 0x266   : > { %v1915_v22 = vmul.f32 %v3409_v1, %v1914_v30  ;;  %v1917_v16 = vmul.f32 %v3434_v44, %v1914_v30 }
 0x267   : > { %1887 = vrot.lane.b32.xlu1 %v1879_v49, %s2570_s8  ;;  %1902 = vrot.lane.b32.xlu0 %v1896_v43, %s2570_s8  ;;  %v1680_v49 = vmul.f32 %v3301_v41, %v1678_v13  ;;  %v1314_v43 = vstv %s2248_s28  ;;  %v1916_v13 = vmul.f32 %v3451_v48, %v1914_v30  ;;  %s2268_s28 = sld [smem:[#allocation6 + $0x30]] }
 0x268   : > { %v1316_v50 = vmul.f32 %v3451_v48, %v1314_v43  ;;  %v1317_v0 = vmul.f32 %v3434_v44, %v1314_v43  ;;  %v1315_v62 = vmul.f32 %v3409_v1, %v1314_v43 }
 0x269   : > { %v1355_v5 = vpop.permute.xlu1 %1354  ;;  %v1357_v20 = vpop.permute.xlu0 %1356 }
 0x26b   : > { %1904 = vrot.lane.b32.xlu1 %v1897_v4, %s2570_s8  ;;  %1906 = vrot.lane.b32.xlu0 %v1898_v6, %s2570_s8  ;;  %v1321_v4 = vstv %s2297_s17  ;;  %s2314_s8 = sld [smem:[#allocation6 + $0x5e]]  ;;  %s2317_s17 = sld [smem:[#allocation6 + $0x61]] }
 0x26c   : > { %v1323_v2 = vmul.f32 %v3301_v41, %v1321_v4  ;;  %v1324_v60 = vmul.f32 %v3358_v59, %v1321_v4 }
 0x26d   : > { %v1359_v28 = vpop.permute.xlu1 %1358  ;;  %v1374_v61 = vpop.permute.xlu0 %1373 }
 0x26e   : > { %v1327_v32 = vadd.f32 %v1324_v60, %v1317_v0  ;;  %v1698_v60 = vmul.f32 %v3409_v1, %v1697_v63  ;;  %v1699_v0 = vmul.f32 %v3451_v48, %v1697_v63 }
 0x26f   : > { %1685 = vrot.lane.b32.xlu1 %v1679_v51, %s2571_s3  ;;  %1687 = vrot.lane.b32.xlu0 %v1680_v49, %s2571_s3  ;;  %v1322_v51 = vmul.f32 %v3298_v18, %v1321_v4  ;;  %v1326_v49 = vadd.f32 %v1323_v2, %v1316_v50 }
 0x270   : > { %v1346_v46 = vadd.f32 %v1340_v19, %v1327_v32 }
 0x271   : > { %v1376_v52 = vpop.permute.xlu1 %1375  ;;  %v1378_v6 = vpop.permute.xlu0 %1377  ;;  %v1325_v43 = vadd.f32 %v1322_v51, %v1315_v62  ;;  %v1345_v17 = vadd.f32 %v1338_v21, %v1326_v49  ;;  %v1933_v62 = vstv %s2314_s8  ;;  %s3580_s8 = sld [smem:[#allocation6 + $0x31]] }
 0x272   : > { %v1365_v26 = vadd.f32 %v1359_v28, %v1346_v46  ;;  %v1700_v46 = vmul.f32 %v3434_v44, %v1697_v63  ;;  %v1934_v19 = vmul.f32 %v3298_v18, %v1933_v62  ;;  %v1716_v63 = vstv %s2308_s30  ;;  %s2227_s30 = sld [smem:[#allocation6 + $0x7]] }
 0x273   : > { %1689 = vrot.lane.b32.xlu1 %v1681_v37, %s2571_s3  ;;  %1921 = vrot.lane.b32.xlu0 %v1915_v22, %s2571_s3  ;;  %v1344_v37 = vadd.f32 %v1336_v54, %v1325_v43  ;;  %v1364_v22 = vadd.f32 %v1357_v20, %v1345_v17  ;;  %v1718_v43 = vmul.f32 %v3301_v41, %v1716_v63 }
 0x274   : > { %v1384_v30 = vadd.f32 %v1378_v6, %v1365_v26 }
 0x275   : > { %v1393_v57 = vpop.permute.xlu1 %1392  ;;  %v1395_v23 = vpop.permute.xlu0 %1394  ;;  %v1363_v50 = vadd.f32 %v1355_v5, %v1344_v37  ;;  %v1383_v40 = vadd.f32 %v1376_v52, %v1364_v22 }
 0x277   : > { %1923 = vrot.lane.b32.xlu1 %v1916_v13, %s2571_s3  ;;  %1925 = vrot.lane.b32.xlu0 %v1917_v16, %s2571_s3  ;;  %v1382_v32 = vadd.f32 %v1374_v61, %v1363_v50  ;;  %v1402_v16 = vadd.f32 %v1395_v23, %v1383_v40  ;;  %v1935_v40 = vmul.f32 %v3301_v41, %v1933_v62 }
 0x278   : > { %v1936_v23 = vmul.f32 %v3358_v59, %v1933_v62  ;;  %v1717_v13 = vmul.f32 %v3298_v18, %v1716_v63 }
 0x279   : > { %v1397_v4 = vpop.permute.xlu1 %1396  ;;  %v1412_v2 = vpop.permute.xlu0 %1411  ;;  %v1401_v21 = vadd.f32 %v1393_v57, %v1382_v32 }
 0x27a   : > { %v1403_v54 = vadd.f32 %v1397_v4, %v1384_v30  ;;  %v1952_v4 = vstv %s2266_s6  ;;  %s2276_s6 = sld [smem:[#allocation6 + $0x38]] }
 0x27b   : > { %1704 = vrot.lane.b32.xlu1 %v1698_v60, %s2572_s15  ;;  %1706 = vrot.lane.b32.xlu0 %v1699_v0, %s2572_s15  ;;  %v1420_v26 = vadd.f32 %v1412_v2, %v1401_v21  ;;  %v1719_v0 = vmul.f32 %v3358_v59, %v1716_v63  ;;  %v1953_v50 = vmul.f32 %v3409_v1, %v1952_v4 }
 0x27d   : > { %v1414_v17 = vpop.permute.xlu1 %1413  ;;  %v1416_v20 = vpop.permute.xlu0 %1415 }
 0x27e   : > { %v1421_v28 = vadd.f32 %v1414_v17, %v1402_v16  ;;  %v1422_v5 = vadd.f32 %v1416_v20, %v1403_v54  ;;  %v1954_v54 = vmul.f32 %v3451_v48, %v1952_v4  ;;  %v1955_v17 = vmul.f32 %v3434_v44, %v1952_v4 }
 0x27f   : > { %1708 = vrot.lane.b32.xlu1 %v1700_v46, %s2572_s15  ;;  %1940 = vrot.lane.b32.xlu0 %v1934_v19, %s2571_s3  ;;  %v1735_v19 = vstv %s2260_s7  ;;  %s2234_s7 = sld [smem:[#allocation6 + $0xe]] }
 0x281   : > { %v1431_v52 = vpop.permute.xlu1 %1430  ;;  %v1433_v6 = vpop.permute.xlu0 %1432 }
 0x282   : > { %v1439_v61 = vadd.f32 %v1431_v52, %v1420_v26  ;;  %v1440_v51 = vadd.f32 %v1433_v6, %v1421_v28  ;;  %v1737_v26 = vmul.f32 %v3451_v48, %v1735_v19 }
 0x283   : > { %1942 = vrot.lane.b32.xlu1 %v1935_v40, %s2571_s3  ;;  %1944 = vrot.lane.b32.xlu0 %v1936_v23, %s2571_s3  ;;  %s2315_s3 = sld [smem:[#allocation6 + $0x5f]] }
 0x285   : > { %v1435_v57 = vpop.permute.xlu1 %1434  ;;  %v1450_v49 = vpop.permute.xlu0 %1449 }
 0x286   : > { %v1441_v37 = vadd.f32 %v1435_v57, %v1422_v5  ;;  %v1458_v22 = vadd.f32 %v1450_v49, %v1439_v61  ;;  %v1736_v5 = vmul.f32 %v3409_v1, %v1735_v19 }
 0x287   : > { %1723 = vrot.lane.b32.xlu1 %v1717_v13, %s2572_s15  ;;  %1725 = vrot.lane.b32.xlu0 %v1718_v43, %s2572_s15 }
 0x289   : > { %v1452_v2 = vpop.permute.xlu1 %1451  ;;  %v1454_v60 = vpop.permute.xlu0 %1453  ;;  %v1971_v40 = vstv %s2315_s3  ;;  %s2283_s3 = sld [smem:[#allocation6 + $0x3f]] }
 0x28a   : > { %v1459_v30 = vadd.f32 %v1452_v2, %v1440_v51  ;;  %v1460_v62 = vadd.f32 %v1454_v60, %v1441_v37  ;;  %v1738_v51 = vmul.f32 %v3434_v44, %v1735_v19  ;;  %v1972_v63 = vmul.f32 %v3298_v18, %v1971_v40 }
 0x28b   : > { %1727 = vrot.lane.b32.xlu1 %v1719_v0, %s2572_s15  ;;  %1959 = vrot.lane.b32.xlu0 %v1953_v50, %s2572_s15  ;;  %v1973_v37 = vmul.f32 %v3301_v41, %v1971_v40  ;;  %v1754_v60 = vstv %s2309_s18  ;;  %s2241_s18 = sld [smem:[#allocation6 + $0x15]] }
 0x28d   : > { %v1469_v32 = vpop.permute.xlu1 %1468  ;;  %v1471_v16 = vpop.permute.xlu0 %1470 }
 0x28e   : > { %v1477_v20 = vadd.f32 %v1469_v32, %v1458_v22  ;;  %v1478_v46 = vadd.f32 %v1471_v16, %v1459_v30  ;;  %v1974_v22 = vmul.f32 %v3358_v59, %v1971_v40  ;;  %v1755_v30 = vmul.f32 %v3298_v18, %v1754_v60 }
 0x28f   : > { %1961 = vrot.lane.b32.xlu1 %v1954_v54, %s2572_s15  ;;  %1963 = vrot.lane.b32.xlu0 %v1955_v17, %s2572_s15  ;;  %v1990_v54 = vstv %s2267_s20  ;;  %s2290_s20 = sld [smem:[#allocation6 + $0x46]] }
 0x290   : > { %v1991_v19 = vmul.f32 %v3409_v1, %v1990_v54 }
 0x291   : > { %v1473_v21 = vpop.permute.xlu1 %1472  ;;  %v1488_v28 = vpop.permute.xlu0 %1487 }
 0x292   : > { %v1479_v52 = vadd.f32 %v1473_v21, %v1460_v62  ;;  %v1496_v6 = vadd.f32 %v1488_v28, %v1477_v20  ;;  %v1756_v62 = vmul.f32 %v3301_v41, %v1754_v60 }
 0x293   : > { %1742 = vrot.lane.b32.xlu1 %v1736_v5, %s2573_s23  ;;  %1744 = vrot.lane.b32.xlu0 %v1737_v26, %s2573_s23 }
 0x295   : > { %v1490_v23 = vpop.permute.xlu1 %1489  ;;  %v1492_v61 = vpop.permute.xlu0 %1491 }
 0x296   : > { %v1497_v57 = vadd.f32 %v1490_v23, %v1478_v46  ;;  %v1498_v49 = vadd.f32 %v1492_v61, %v1479_v52  ;;  %v1757_v46 = vmul.f32 %v3358_v59, %v1754_v60  ;;  %v1992_v52 = vmul.f32 %v3451_v48, %v1990_v54 }
 0x297   : > { %1746 = vrot.lane.b32.xlu1 %v1738_v51, %s2573_s23  ;;  %1978 = vrot.lane.b32.xlu0 %v1972_v63, %s2572_s15  ;;  %v1773_v61 = vstv %s2261_s26  ;;  %v1569_v51 = vstv %s2255_s27  ;;  %s2214_s26 = sshll.u32 %s2742_s4, 4  ;;  %s2326_s27 = sshll.u32 %s2552_s12, 8 }
 0x299   : > { %v1507_v13 = vpop.permute.xlu1 %1506  ;;  %v1509_v43 = vpop.permute.xlu0 %1508 }
 0x29a   : > { %v1515_v4 = vadd.f32 %v1507_v13, %v1496_v6  ;;  %v1516_v2 = vadd.f32 %v1509_v43, %v1497_v57  ;;  %v1993_v6 = vmul.f32 %v3434_v44, %v1990_v54 }
 0x29b   : > { %1980 = vrot.lane.b32.xlu1 %v1973_v37, %s2572_s15  ;;  %1982 = vrot.lane.b32.xlu0 %v1974_v22, %s2572_s15  ;;  %s2304_s15 = sld [smem:[#allocation6 + $0x54]]  ;;  %v1774_v37 = vmul.f32 %v3409_v1, %v1773_v61  ;;  %v1775_v22 = vmul.f32 %v3451_v48, %v1773_v61 }
 0x29d   : > { %v1511_v0 = vpop.permute.xlu1 %1510  ;;  %v1526_v50 = vpop.permute.xlu0 %1525 }
 0x29e   : > { %v1517_v32 = vadd.f32 %v1511_v0, %v1498_v49  ;;  %v1534_v16 = vadd.f32 %v1526_v50, %v1515_v4  ;;  %v2009_v4 = vstv %s2316_s19  ;;  %v1570_v0 = vmul.f32 %v3409_v1, %v1569_v51 }
 0x29f   : > { %1761 = vrot.lane.b32.xlu1 %v1755_v30, %s2573_s23  ;;  %1763 = vrot.lane.b32.xlu0 %v1756_v62, %s2573_s23  ;;  %v1571_v50 = vmul.f32 %v3451_v48, %v1569_v51 }
 0x2a1   : > { %v1528_v17 = vpop.permute.xlu1 %1527  ;;  %v1530_v20 = vpop.permute.xlu0 %1529  ;;  %v1576_v13 = vstv %s2304_s15  ;;  %s192_s15 = scalar_lea.vmem [#allocation11], %s2214_s26 }
 0x2a2   : > { %v1535_v21 = vadd.f32 %v1528_v17, %v1516_v2  ;;  %v1536_v28 = vadd.f32 %v1530_v20, %v1517_v32  ;;  %v1577_v62 = vmul.f32 %v3298_v18, %v1576_v13  ;;  %v1578_v32 = vmul.f32 %v3301_v41, %v1576_v13  ;;  %s2107_s19 = sshll.u32 %s192_s15, 4  ;;  %s3853_s19 = int_to_ptr.vmem [resolvable:$true] %s2107_s19 }
 0x2a3   : > { %1765 = vrot.lane.b32.xlu1 %v1757_v46, %s2573_s23  ;;  %1997 = vrot.lane.b32.xlu0 %v1991_v19, %s2573_s23  ;;  %v1776_v17 = vmul.f32 %v3434_v44, %v1773_v61  ;;  %v2010_v20 = vmul.f32 %v3298_v18, %v2009_v4  ;;  %v2012_v61 = vmul.f32 %v3358_v59, %v2009_v4  ;;  %s2474_s12 = scalar_lea.vmem %s3853_s19, 256 }
 0x2a4   : > { %v1580_v19 = vadd.f32 %v1577_v62, %v1570_v0  ;;  %p2475_p7 = scmp.ne.s32.totalorder %s3853_s19, %s2474_s12 }
 0x2a5   : > { %v1545_v5 = vpop.permute.xlu1 %1544  ;;  %v1547_v26 = vpop.permute.xlu0 %1546 }
 0x2a6   : > { %v1553_v40 = vadd.f32 %v1545_v5, %v1534_v16  ;;  %v1554_v23 = vadd.f32 %v1547_v26, %v1535_v21  ;;  %v1581_v21 = vadd.f32 %v1578_v32, %v1571_v50  ;;  %p2476_p2 = pnand %p2475_p7, %p4133_p12 }
 0x2a7   : > { %1999 = vrot.lane.b32.xlu1 %v1992_v52, %s2573_s23  ;;  %2001 = vrot.lane.b32.xlu0 %v1993_v6, %s2573_s23  ;;  %v1579_v52 = vmul.f32 %v3358_v59, %v1576_v13 }
 0x2a8   : > { %v1560_v63 = vrot.slane %v1553_v40, 4  ;;  %v1561_v57 = vrot.slane %v1554_v23, 4  ;;  %v2011_v23 = vmul.f32 %v3301_v41, %v2009_v4  ;;  %p2477_p6 = pneg %p2476_p2 }
 0x2a9   : > { %v1549_v49 = vpop.permute.xlu1 %1548  ;;  %v1591_v43 = vpop.permute.xlu0 %1590 }
 0x2aa   : > { %v3533_v2 = vsel %vm1559_vm4, %v1560_v63, %v1561_v57  ;;  %v1555_v60 = vadd.f32 %v1549_v49, %v1536_v28  ;;  %v1572_v28 = vmul.f32 %v3434_v44, %v1569_v51  ;;  %v1599_v5 = vadd.f32 %v1591_v43, %v1580_v19 }
 0x2ab   : > { %1780 = vrot.lane.b32.xlu1 %v1774_v37, %s2574_s5  ;;  %1782 = vrot.lane.b32.xlu0 %v1775_v22, %s2574_s5  ;;  %v1792_v37 = vstv %s2310_s24 }
 0x2ac   : > { %v1563_v30 = vrot.slane %v1555_v60, 4  ;;  %v1582_v63 = vadd.f32 %v1579_v52, %v1572_v28  ;;  %v1793_v60 = vmul.f32 %v3298_v18, %v1792_v37  ;;  %v1794_v13 = vmul.f32 %v3301_v41, %v1792_v37 }
 0x2ad   : > { %v1593_v16 = vpop.permute.xlu1 %1592  ;;  %v1595_v54 = vpop.permute.xlu0 %1594  ;;  %v1795_v32 = vmul.f32 %v3358_v59, %v1792_v37  ;;  %v2047_v52 = vstv %s2317_s17  ;;  %s3851_s17 = scalar_lea.hbm %s3905_s2, %s2326_s27 }
 0x2ae   : > { %v3544_v46 = vsel %vm1559_vm4, %v1561_v57, %v1563_v30  ;;  %v1600_v26 = vadd.f32 %v1593_v16, %v1581_v21  ;;  %v1601_v51 = vadd.f32 %v1595_v54, %v1582_v63  ;;  %v2028_v30 = vstv %s2268_s28 }
 0x2af   : > { %1784 = vrot.lane.b32.xlu1 %v1776_v17, %s2574_s5  ;;  %2016 = vrot.lane.b32.xlu0 %v2010_v20, %s2573_s23  ;;  %v2029_v16 = vmul.f32 %v3409_v1, %v2028_v30  ;;  %v2030_v21 = vmul.f32 %v3451_v48, %v2028_v30  ;;  %v2031_v28 = vmul.f32 %v3434_v44, %v2028_v30 }
 0x2b1   : > { %v1610_v6 = vpop.permute.xlu1 %1609  ;;  %v1612_v40 = vpop.permute.xlu0 %1611 }
 0x2b2   : > { %v1618_v57 = vadd.f32 %v1610_v6, %v1599_v5  ;;  %v1619_v49 = vadd.f32 %v1612_v40, %v1600_v26 }
 0x2b3   : > { %2018 = vrot.lane.b32.xlu1 %v2011_v23, %s2573_s23  ;;  %2020 = vrot.lane.b32.xlu0 %v2012_v61, %s2573_s23  ;;  %s2262_s23 = sld [smem:[#allocation6 + $0x2a]]  ;;  %v2048_v23 = vmul.f32 %v3298_v18, %v2047_v52  ;;  %v2049_v61 = vmul.f32 %v3301_v41, %v2047_v52 }
 0x2b5   : > { %v1614_v22 = vpop.permute.xlu1 %1613  ;;  %v1629_v43 = vpop.permute.xlu0 %1628 }
 0x2b6   : > { %v1620_v0 = vadd.f32 %v1614_v22, %v1601_v51  ;;  %v1637_v50 = vadd.f32 %v1629_v43, %v1618_v57  ;;  %v2050_v22 = vmul.f32 %v3358_v59, %v2047_v52  ;;  %v1831_v43 = vstv %s2311_s16  ;;  %s2575_s16 = smov [#allocation11]  }
 0x2b7   : > { %1799 = vrot.lane.b32.xlu1 %v1793_v60, %s2574_s5  ;;  %1801 = vrot.lane.b32.xlu0 %v1794_v13, %s2574_s5 }
 0x2b9   : > { %v1631_v4 = vpop.permute.xlu1 %1630  ;;  %v1633_v62 = vpop.permute.xlu0 %1632 }
 0x2ba   : > { %v1638_v54 = vadd.f32 %v1631_v4, %v1619_v49  ;;  %v1639_v17 = vadd.f32 %v1633_v62, %v1620_v0  ;;  %v1824_v49 = vstv %s2262_s23  ;;  %s2094_s23 = scalar_lea.sflag [#allocation8], %s2742_s4 }
 0x2bb   : > { %1803 = vrot.lane.b32.xlu1 %v1795_v32, %s2574_s5  ;;  %2035 = vrot.lane.b32.xlu0 %v2029_v16, %s2574_s5  ;;  %v1825_v0 = vmul.f32 %v3409_v1, %v1824_v49  ;;  %v1826_v32 = vmul.f32 %v3451_v48, %v1824_v49  ;;  %v1827_v16 = vmul.f32 %v3434_v44, %v1824_v49 }
 0x2bd   : > { %v1648_v20 = vpop.permute.xlu1 %1647  ;;  %v1650_v19 = vpop.permute.xlu0 %1649 }
 0x2be   : > { %v1656_v5 = vadd.f32 %v1648_v20, %v1637_v50  ;;  %v1657_v26 = vadd.f32 %v1650_v19, %v1638_v54  ;;  %v1832_v50 = vmul.f32 %v3298_v18, %v1831_v43  ;;  %v1834_v20 = vmul.f32 %v3358_v59, %v1831_v43 }
 0x2bf   : > { %2037 = vrot.lane.b32.xlu1 %v2030_v21, %s2574_s5  ;;  %2039 = vrot.lane.b32.xlu0 %v2031_v28, %s2574_s5 }
 0x2c0   : > { %v1835_v62 = vadd.f32 %v1832_v50, %v1825_v0 }
 0x2c1   : > { %v1652_v6 = vpop.permute.xlu1 %1651  ;;  %v1667_v40 = vpop.permute.xlu0 %1666 }
 0x2c2   : > { %v1658_v63 = vadd.f32 %v1652_v6, %v1639_v17  ;;  %v1675_v57 = vadd.f32 %v1667_v40, %v1656_v5  ;;  %v1833_v17 = vmul.f32 %v3301_v41, %v1831_v43  ;;  %v1837_v5 = vadd.f32 %v1834_v20, %v1827_v16 }
 0x2c3   : > { %2054 = vrot.lane.b32.xlu1 %v2048_v23, %s2574_s5  ;;  %2056 = vrot.lane.b32.xlu0 %v2049_v61, %s2574_s5 }
 0x2c4   : > { %v1836_v28 = vadd.f32 %v1833_v17, %v1826_v32 }
 0x2c5   : > { %v1669_v37 = vpop.permute.xlu1 %1668  ;;  %v1671_v51 = vpop.permute.xlu0 %1670 }
 0x2c6   : > { %v1676_v60 = vadd.f32 %v1669_v37, %v1657_v26  ;;  %v1677_v13 = vadd.f32 %v1671_v51, %v1658_v63 }
 0x2c7   : > { %2058 = vrot.lane.b32.xlu1 %v2050_v22, %s2574_s5  ;;  %s3578_s5 = sld [smem:[#allocation6]] }
 0x2c9   : > { %v1846_v30 = vpop.permute.xlu1 %1845  ;;  %v1848_v4 = vpop.permute.xlu0 %1847 }
 0x2ca   : > { %v1854_v54 = vadd.f32 %v1846_v30, %v1835_v62  ;;  %v1855_v52 = vadd.f32 %v1848_v4, %v1836_v28  ;;  %v386_v28 = vstv %s3580_s8 }
 0x2cd   : > { %v1850_v19 = vpop.permute.xlu1 %1849  ;;  %v1865_v21 = vpop.permute.xlu0 %1864 }
 0x2ce   : > { %v1873_v26 = vadd.f32 %v1865_v21, %v1854_v54  ;;  %v1856_v6 = vadd.f32 %v1850_v19, %v1837_v5  ;;  %v381_v54 = vstv %s3578_s5  ;;  %s2478_s5 = sshll.u32 %s2575_s16, 4  ;;  %s2479_s5 = int_to_ptr.vmem [resolvable:$false] %s2478_s5 }
 0x2cf   : > { %v382_v5 = vmul.f32 %v3409_v1, %v381_v54  ;;  %s2480_s8 = scalar_lea.vmem %s2479_s5, 512  ;;  %p2481_p0 = scmp.lt.s32.totalorder %s3853_s19, %s2479_s5 }
 0x2d0   : > { %p2482_p1 = scmp.lt.s32.totalorder %s2480_s8, %s2474_s12 }
 0x2d1   : > { %v1867_v40 = vpop.permute.xlu1 %1866  ;;  %v1869_v23 = vpop.permute.xlu0 %1868 }
 0x2d2   : > { %v1874_v61 = vadd.f32 %v1867_v40, %v1855_v52  ;;  %v1875_v63 = vadd.f32 %v1869_v23, %v1856_v6  ;;  %v387_v6 = vmul.f32 %v3298_v18, %v386_v28  ;;  %p2483_p9 = por %p2482_p1, %p2481_p0 }
 0x2d4   : > { %p2484_p8 = pnand %p2483_p9, %p2477_p6 }
 0x2d5   : > { %v1884_v37 = vpop.permute.xlu1 %1883  ;;  %v1886_v51 = vpop.permute.xlu0 %1885 }
 0x2d6   : > { %v1892_v22 = vadd.f32 %v1884_v37, %v1873_v26  ;;  %v1893_v49 = vadd.f32 %v1886_v51, %v1874_v61  ;;  %v389_v61 = vadd.f32 %v387_v6, %v382_v5 }
 0x2d9   : > { %v1888_v0 = vpop.permute.xlu1 %1887  ;;  %v1903_v43 = vpop.permute.xlu0 %1902 }
 0x2da   : > { %v1894_v50 = vadd.f32 %v1888_v0, %v1875_v63  ;;  %v1911_v30 = vadd.f32 %v1903_v43, %v1892_v22  ;;  %v549_v63 = vstv %s2227_s30  ;;  %v383_v0 = vmul.f32 %v3451_v48, %v381_v54 }
 0x2db   : > { %v551_v51 = vmul.f32 %v3451_v48, %v549_v63  ;;  %v550_v5 = vmul.f32 %v3409_v1, %v549_v63 }
 0x2dd   : > { %v1905_v4 = vpop.permute.xlu1 %1904  ;;  %v1907_v62 = vpop.permute.xlu0 %1906 }
 0x2de   : > { %v3582_v32 = vadd.f32 %v1905_v4, %v1893_v49  ;;  %v1913_v16 = vadd.f32 %v1907_v62, %v1894_v50  ;;  %v556_v49 = vstv %s2276_s6  ;;  %v388_v4 = vmul.f32 %v3301_v41, %v386_v28 }
 0x2df   : > { %v558_v43 = vmul.f32 %v3301_v41, %v556_v49 }
 0x2e1   : > { %v1686_v17 = vpop.permute.xlu1 %1685  ;;  %v1688_v20 = vpop.permute.xlu0 %1687  ;;  %v561_v62 = vadd.f32 %v558_v43, %v551_v51 }
 0x2e2   : > { %v3585_v19 = vadd.f32 %v1686_v17, %v1675_v57  ;;  %v3587_v21 = vadd.f32 %v1688_v20, %v1676_v60  ;;  %v402_v60 = vadd.f32 %v3024_v14, %v389_v61  ;;  %v390_v17 = vadd.f32 %v388_v4, %v383_v0 }
 0x2e3   : > { %v580_v14 = vadd.f32 %v3142_v38, %v561_v62  ;;  %v559_v38 = vmul.f32 %v3358_v59, %v556_v49  ;;  %v811_v4 = vstv %s2283_s3 }
 0x2e4   : > { %v813_v62 = vmul.f32 %v3301_v41, %v811_v4 }
 0x2e5   : > { %v1690_v26 = vpop.permute.xlu1 %1689  ;;  %v1922_v52 = vpop.permute.xlu0 %1921  ;;  %v599_v28 = vadd.f32 %v2960_v31, %v580_v14  ;;  %v804_v31 = vstv %s2234_s7 }
 0x2e6   : > { %v3592_v40 = vadd.f32 %v1690_v26, %v1677_v13  ;;  %v3594_v23 = vadd.f32 %v1922_v52, %v1911_v30  ;;  %v415_v30 = vadd.f32 %v2912_v3, %v402_v60  ;;  %v403_v26 = vadd.f32 %v3094_v55, %v390_v17 }
 0x2e7   : > { %v552_v52 = vmul.f32 %v3434_v44, %v549_v63  ;;  %v557_v3 = vmul.f32 %v3298_v18, %v556_v49  ;;  %v618_v63 = vadd.f32 %v3150_v27, %v599_v28  ;;  %v805_v17 = vmul.f32 %v3409_v1, %v804_v31 }
 0x2e8   : > { %v428_v54 = vadd.f32 %v3032_v24, %v415_v30  ;;  %v416_v60 = vadd.f32 %v2918_v7, %v403_v26  ;;  %v806_v7 = vmul.f32 %v3451_v48, %v804_v31  ;;  %v814_v28 = vmul.f32 %v3358_v59, %v811_v4 }
 0x2e9   : > { %v3596_v37 = vpop.permute.xlu1 %1923  ;;  %v1926_v57 = vpop.permute.xlu0 %1925  ;;  %v560_v24 = vadd.f32 %v557_v3, %v550_v5  ;;  %v562_v51 = vadd.f32 %v559_v38, %v552_v52  ;;  %v637_v27 = vadd.f32 %v2968_v36, %v618_v63  ;;  %v807_v36 = vmul.f32 %v3434_v44, %v804_v31 }
 0x2ea   : > { %v3600_v22 = vadd.f32 %v1926_v57, %v1913_v16  ;;  %v441_v57 = vadd.f32 %v2920_v8, %v428_v54  ;;  %v429_v8 = vadd.f32 %v3102_v10, %v416_v60  ;;  %v816_v26 = vadd.f32 %v813_v62, %v806_v7  ;;  %v2427_v7 = vld [vmem:[#allocation5] sm:$0xff]  ;;  %v4031_v62 = vld [vmem:[#allocation15_spill] sm:$0xff] }
 0x2eb   : > { %v579_v55 = vadd.f32 %v3072_v9, %v560_v24  ;;  %v581_v0 = vadd.f32 %v3080_v25, %v562_v51  ;;  %v656_v41 = vadd.f32 %v3158_v58, %v637_v27  ;;  %v1059_v3 = vstv %s2241_s18 }
 0x2ec   : > { %v454_v30 = vadd.f32 %v3040_v33, %v441_v57  ;;  %v442_v5 = vadd.f32 %v2926_v11, %v429_v8  ;;  %v835_v52 = vadd.f32 %v3190_v29, %v816_v26  ;;  %v1066_v38 = vstv %s2290_s20  ;;  %v4029_v8 = vld [vmem:[#allocation42_spill] sm:$0xff] }
 0x2ed   : > { %v3604_v13 = vpop.permute.xlu1 %1704  ;;  %v3606_v50 = vpop.permute.xlu0 %1706  ;;  %v598_v9 = vadd.f32 %v2966_v35, %v579_v55  ;;  %v600_v25 = vadd.f32 %v2974_v39, %v581_v0  ;;  %v812_v39 = vmul.f32 %v3298_v18, %v811_v4  ;;  %v817_v18 = vadd.f32 %v814_v28, %v807_v36  ;;  %v4026_v55 = vld [vmem:[#allocation22_spill] sm:$0xff]  ;;  %v4027_v0 = vld [vmem:[#allocation53_spill] sm:$0xff] }
 0x2ee   : > { %v467_v33 = vadd.f32 %v2928_v12, %v454_v30  ;;  %v455_v57 = vadd.f32 %v3110_v34, %v442_v5  ;;  %v1060_v29 = vmul.f32 %v3409_v1, %v1059_v3  ;;  %v1061_v60 = vmul.f32 %v3451_v48, %v1059_v3  ;;  %v4028_v30 = vld [vmem:[#allocation28_spill] sm:$0xff]  ;;  %v2428_v4 = vld [vmem:[#allocation5 + $0x8] sm:$0xff] }
 0x2ef   : > { %v617_v10 = vadd.f32 %v3088_v45, %v598_v9  ;;  %v619_v35 = vadd.f32 %v3096_v56, %v600_v25  ;;  %v815_v24 = vadd.f32 %v812_v39, %v805_v17  ;;  %v675_v63 = vadd.f32 %v4026_v55, %v656_v41  ;;  %v4030_v48 = vld [vmem:[#allocation16_spill] sm:$0xff]  ;;  %v4032_v17 = vld [vmem:[#allocation55_spill] sm:$0xff]  ;;  %v4039_v55 = vld [vmem:[#allocation85_spill] sm:$0xff] }
 0x2f0   : > { %v480_v11 = vadd.f32 %v3048_v42, %v467_v33  ;;  %v854_v42 = vadd.f32 %v4028_v30, %v835_v52  ;;  %v1067_v34 = vmul.f32 %v2427_v7, %v1066_v38  ;;  %v1068_v9 = vmul.f32 %v2428_v4, %v1066_v38  ;;  %v4034_v41 = vld [vmem:[#allocation52_spill] sm:$0xff]  ;;  %v4035_v52 = vld [vmem:[#allocation37_spill] sm:$0xff]  ;;  %v4046_v4 = vld [vmem:[#allocation87_spill] sm:$0xff] }
 0x2f1   : > { %v3611_v16 = vpop.permute.xlu1 %1708  ;;  %v3613_v20 = vpop.permute.xlu0 %1940  ;;  %v636_v56 = vadd.f32 %v2982_v47, %v617_v10  ;;  %v638_v58 = vadd.f32 %v2990_v53, %v619_v35  ;;  %v834_v31 = vadd.f32 %v4027_v0, %v815_v24  ;;  %v1062_v53 = vmul.f32 %v3434_v44, %v1059_v3  ;;  %v4033_v35 = vld [vmem:[#allocation25_spill] sm:$0xff]  ;;  %v4036_v3 = vld [vmem:[#allocation59_spill] sm:$0xff] }
 0x2f2   : > { %v468_v25 = vadd.f32 %v4031_v62, %v455_v57  ;;  %v836_v33 = vadd.f32 %v4032_v17, %v817_v18  ;;  %v1070_v10 = vadd.f32 %v1067_v34, %v1060_v29  ;;  %v1071_v5 = vadd.f32 %v1068_v9, %v1061_v60  ;;  %v4041_v60 = vld [vmem:[#allocation43_spill] sm:$0xff] }
 0x2f3   : > { %v655_v51 = vadd.f32 %v3104_v15, %v636_v56  ;;  %v657_v47 = vadd.f32 %v4029_v8, %v638_v58  ;;  %v493_v15 = vadd.f32 %v4030_v48, %v480_v11  ;;  %v1069_v26 = vmul.f32 %v3358_v59, %v1066_v38  ;;  %v4037_v56 = vld [vmem:[#allocation27_spill] sm:$0xff]  ;;  %v4038_v58 = vld [vmem:[#allocation84_spill] sm:$0xff] }
 0x2f4   : > { %v694_v39 = vadd.f32 %v4034_v41, %v675_v63  ;;  %v853_v44 = vadd.f32 %v4035_v52, %v834_v31  ;;  %v873_v28 = vadd.f32 %v4036_v3, %v854_v42  ;;  %v1089_v11 = vadd.f32 %v4038_v58, %v1070_v10  ;;  %v4040_v59 = vld [vmem:[#allocation36_spill] sm:$0xff]  ;;  %v4043_v31 = vld [vmem:[#allocation57_spill] sm:$0xff]  ;;  %v4044_v42 = vld [vmem:[#allocation46_spill] sm:$0xff] }
 0x2f5   : > { %v3622_v6 = vpop.permute.xlu1 %1942  ;;  %v3624_v61 = vpop.permute.xlu0 %1944  ;;  %v674_v36 = vadd.f32 %v4033_v35, %v655_v51  ;;  %v676_v24 = vadd.f32 %v4037_v56, %v657_v47  ;;  %v1090_v57 = vadd.f32 %v4039_v55, %v1071_v5  ;;  %v1072_v0 = vadd.f32 %v1069_v26, %v1062_v53  ;;  %v4042_v63 = vld [vmem:[#allocation44_spill] sm:$0xff]  ;;  %v4045_v47 = vld [vmem:[#allocation39_spill] sm:$0xff]  ;;  %v4049_v10 = vld [vmem:[#allocation30_spill] sm:$0xff] }
 0x2f6   : > { %v506_v38 = vadd.f32 %v4040_v59, %v493_v15  ;;  %v481_v51 = vadd.f32 %v4041_v60, %v468_v25  ;;  %v872_v8 = vadd.f32 %v4043_v31, %v853_v44  ;;  %v855_v34 = vadd.f32 %v4045_v47, %v836_v33  ;;  %v4047_v48 = vld [vmem:[#allocation88_spill] sm:$0xff]  ;;  %v4048_v62 = vld [vmem:[#allocation23_spill] sm:$0xff]  ;;  %v4050_v26 = vld [vmem:[#allocation58_spill] sm:$0xff] }
 0x2f7   : > { %v693_v30 = vadd.f32 %v4042_v63, %v674_v36  ;;  %v695_v7 = vadd.f32 %v4044_v42, %v676_v24  ;;  %v1108_v9 = vadd.f32 %v4046_v4, %v1089_v11  ;;  %v1109_v53 = vadd.f32 %v4047_v48, %v1090_v57  ;;  %v4051_v35 = vld [vmem:[#allocation86_spill] sm:$0xff]  ;;  %v4053_v52 = vld [vmem:[#allocation91_spill] sm:$0xff]  ;;  %v4055_v58 = vld [vmem:[#allocation17_spill] sm:$0xff] }
 0x2f8   : > { %v713_v17 = vadd.f32 %v4048_v62, %v694_v39  ;;  %v892_v5 = vadd.f32 %v4049_v10, %v873_v28  ;;  %v874_v15 = vadd.f32 %v4050_v26, %v855_v34  ;;  %v1091_v25 = vadd.f32 %v4051_v35, %v1072_v0  ;;  %v4052_v41 = vld [vmem:[#allocation90_spill] sm:$0xff]  ;;  %v4056_v39 = vld [vmem:[#allocation29_spill] sm:$0xff]  ;;  %v4057_v28 = vld [vmem:[#allocation40_spill] sm:$0xff] }
 0x2f9   : > { %v3631_v49 = vpop.permute.xlu1 %1723  ;;  %v3633_v43 = vpop.permute.xlu0 %1725  ;;  %v1127_v36 = vadd.f32 %v4052_v41, %v1108_v9  ;;  %v1128_v44 = vadd.f32 %v4053_v52, %v1109_v53  ;;  %v4054_v33 = vld [vmem:[#allocation18_spill] sm:$0xff]  ;;  %v494_v11 = vadd.f32 %v4055_v58, %v481_v51  ;;  %v712_v55 = vadd.f32 %v4056_v39, %v693_v30  ;;  %v4058_v59 = vld [vmem:[#allocation31_spill] sm:$0xff]  ;;  %v4059_v0 = vld [vmem:[#allocation89_spill] sm:$0xff] }
 0x2fa   : > { %v3710_v24 = vadd.f32 %v4054_v33, %v506_v38  ;;  %v891_v57 = vadd.f32 %v4057_v28, %v872_v8  ;;  %v714_v60 = vadd.f32 %v4058_v59, %v695_v7  ;;  %v1110_v63 = vadd.f32 %v4059_v0, %v1091_v25  ;;  %v4060_v31 = vld [vmem:[#allocation93_spill] sm:$0xff]  ;;  %v4061_v47 = vld [vmem:[#allocation94_spill] sm:$0xff]  ;;  %v4062_v4 = vld [vmem:[#allocation48_spill] sm:$0xff] }
 0x2fb   : > { %v1146_v42 = vadd.f32 %v4060_v31, %v1127_v36  ;;  %v1147_v34 = vadd.f32 %v4061_v47, %v1128_v44  ;;  %v731_v9 = vadd.f32 %v4062_v4, %v712_v55  ;;  %v4063_v48 = vld [vmem:[#allocation54_spill] sm:$0xff]  ;;  %v4064_v38 = vld [vmem:[#allocation60_spill] sm:$0xff]  ;;  %v4065_v10 = vld [vmem:[#allocation61_spill] sm:$0xff] }
 0x2fc   : > { %v732_v53 = vadd.f32 %v4063_v48, %v713_v17  ;;  %v910_v62 = vadd.f32 %v4064_v38, %v891_v57  ;;  %v911_v51 = vadd.f32 %v4065_v10, %v892_v5  ;;  %v4066_v26 = vld [vmem:[#allocation41_spill] sm:$0xff]  ;;  %v4067_v35 = vld [vmem:[#allocation92_spill] sm:$0xff]  ;;  %v4072_v55 = vld [vmem:[#allocation63_spill] sm:$0xff] }
 0x2fd   : > { %v3643_v14 = vpop.permute.xlu1 %1727  ;;  %v3645_v54 = vpop.permute.xlu0 %1959  ;;  %v893_v30 = vadd.f32 %v4066_v26, %v874_v15  ;;  %v1129_v8 = vadd.f32 %v4067_v35, %v1110_v63  ;;  %v4068_v41 = vld [vmem:[#allocation96_spill] sm:$0xff]  ;;  %v4069_v52 = vld [vmem:[#allocation97_spill] sm:$0xff]  ;;  %v4074_v59 = vld [vmem:[#allocation62_spill] sm:$0xff] }
 0x2fe   : > { %v1165_v7 = vadd.f32 %v4068_v41, %v1146_v42  ;;  %v1166_v25 = vadd.f32 %v4069_v52, %v1147_v34  ;;  %v4070_v44 = vld [vmem:[#allocation45_spill] sm:$0xff]  ;;  %v929_v28 = vadd.f32 %v4072_v55, %v910_v62  ;;  %v4073_v57 = vld [vmem:[#allocation64_spill] sm:$0xff]  ;;  %v4075_v0 = vld [vmem:[#allocation95_spill] sm:$0xff] }
 0x2ff   : > { %v507_v58 = vadd.f32 %v4070_v44, %v494_v11  ;;  %v4071_v39 = vld [vmem:[#allocation49_spill] sm:$0xff]  ;;  %v930_v5 = vadd.f32 %v4073_v57, %v911_v51  ;;  %v912_v15 = vadd.f32 %v4074_v59, %v893_v30  ;;  %v1148_v63 = vadd.f32 %v4075_v0, %v1129_v8  ;;  %v4076_v31 = vld [vmem:[#allocation99_spill] sm:$0xff]  ;;  %v4077_v47 = vld [vmem:[#allocation100_spill] sm:$0xff] }
 0x300   : > { %v733_v17 = vadd.f32 %v4071_v39, %v714_v60  ;;  %v1184_v42 = vadd.f32 %v4076_v31, %v1165_v7  ;;  %v1185_v34 = vadd.f32 %v4077_v47, %v1166_v25  ;;  %v4078_v4 = vld [vmem:[#allocation32_spill] sm:$0xff]  ;;  %v4080_v26 = vld [vmem:[#allocation66_spill] sm:$0xff]  ;;  %v4081_v35 = vld [vmem:[#allocation67_spill] sm:$0xff] }
 0x301   : > { %v3656_v12 = vpop.permute.xlu1 %1961  ;;  %v3658_v45 = vpop.permute.xlu0 %1963  ;;  %v750_v48 = vadd.f32 %v4078_v4, %v731_v9  ;;  %v4079_v38 = vld [vmem:[#allocation24_spill] sm:$0xff]  ;;  %v948_v11 = vadd.f32 %v4080_v26, %v929_v28  ;;  %v949_v60 = vadd.f32 %v4081_v35, %v930_v5  ;;  %v4082_v41 = vld [vmem:[#allocation65_spill] sm:$0xff]  ;;  %v4083_v52 = vld [vmem:[#allocation98_spill] sm:$0xff] }
 0x302   : > { %v751_v10 = vadd.f32 %v4079_v38, %v732_v53  ;;  %v931_v62 = vadd.f32 %v4082_v41, %v912_v15  ;;  %v1167_v51 = vadd.f32 %v4083_v52, %v1148_v63  ;;  %v4084_v44 = vld [vmem:[#allocation102_spill] sm:$0xff]  ;;  %v4085_v39 = vld [vmem:[#allocation103_spill] sm:$0xff]  ;;  %v4087_v57 = vld [vmem:[#allocation33_spill] sm:$0xff] }
 0x303   : > { %v1203_v30 = vadd.f32 %v4084_v44, %v1184_v42  ;;  %v1204_v8 = vadd.f32 %v4085_v39, %v1185_v34  ;;  %v4086_v25 = vld [vmem:[#allocation50_spill] sm:$0xff]  ;;  %v752_v53 = vadd.f32 %v4087_v57, %v733_v17  ;;  %v4088_v59 = vld [vmem:[#allocation69_spill] sm:$0xff]  ;;  %v4090_v31 = vld [vmem:[#allocation68_spill] sm:$0xff] }
 0x304   : > { %v769_v9 = vadd.f32 %v4086_v25, %v750_v48  ;;  %v967_v28 = vadd.f32 %v4088_v59, %v948_v11  ;;  %v4089_v0 = vld [vmem:[#allocation70_spill] sm:$0xff]  ;;  %v950_v15 = vadd.f32 %v4090_v31, %v931_v62  ;;  %v4091_v47 = vld [vmem:[#allocation101_spill] sm:$0xff]  ;;  %v4094_v26 = vld [vmem:[#allocation51_spill] sm:$0xff] }
 0x305   : > { %v3672_v27 = vpop.permute.xlu1 %1742  ;;  %v3674_v1 = vpop.permute.xlu0 %1744  ;;  %v968_v5 = vadd.f32 %v4089_v0, %v949_v60  ;;  %v1186_v63 = vadd.f32 %v4091_v47, %v1167_v51  ;;  %v4092_v4 = vld [vmem:[#allocation105_spill] sm:$0xff]  ;;  %v4093_v38 = vld [vmem:[#allocation106_spill] sm:$0xff]  ;;  %v771_v35 = vadd.f32 %v4094_v26, %v752_v53  ;;  %v4095_v41 = vld [vmem:[#allocation56_spill] sm:$0xff] }
 0x306   : > { %v1222_v42 = vadd.f32 %v4092_v4, %v1203_v30  ;;  %v1223_v34 = vadd.f32 %v4093_v38, %v1204_v8  ;;  %v770_v52 = vadd.f32 %v4095_v41, %v751_v10  ;;  %v4096_v44 = vld [vmem:[#allocation72_spill] sm:$0xff]  ;;  %v4097_v39 = vld [vmem:[#allocation73_spill] sm:$0xff]  ;;  %v4098_v11 = vld [vmem:[#allocation71_spill] sm:$0xff] }
 0x307   : > { %v986_v48 = vadd.f32 %v4096_v44, %v967_v28  ;;  %v987_v17 = vadd.f32 %v4097_v39, %v968_v5  ;;  %v969_v25 = vadd.f32 %v4098_v11, %v950_v15  ;;  %v4099_v60 = vld [vmem:[#allocation104_spill] sm:$0xff]  ;;  %v4101_v51 = vld [vmem:[#allocation109_spill] sm:$0xff]  ;;  %v4103_v53 = vld [vmem:[#allocation19_spill] sm:$0xff] }
 0x308   : > { %v1205_v57 = vadd.f32 %v4099_v60, %v1186_v63  ;;  %v4100_v62 = vld [vmem:[#allocation108_spill] sm:$0xff]  ;;  %v1242_v0 = vadd.f32 %v4101_v51, %v1223_v34  ;;  %v520_v31 = vadd.f32 %v4103_v53, %v507_v58  ;;  %v4104_v10 = vld [vmem:[#allocation34_spill] sm:$0xff]  ;;  %v4105_v28 = vld [vmem:[#allocation75_spill] sm:$0xff] }
 0x309   : > { %v3687_v18 = vpop.permute.xlu1 %1746  ;;  %v3689_v29 = vpop.permute.xlu0 %1978  ;;  %v1241_v59 = vadd.f32 %v4100_v62, %v1222_v42  ;;  %v788_v47 = vadd.f32 %v4104_v10, %v769_v9  ;;  %v1005_v4 = vadd.f32 %v4105_v28, %v986_v48  ;;  %v4106_v5 = vld [vmem:[#allocation76_spill] sm:$0xff]  ;;  %v4107_v26 = vld [vmem:[#allocation74_spill] sm:$0xff]  ;;  %v4108_v41 = vld [vmem:[#allocation107_spill] sm:$0xff] }
 0x30a   : > { %v1006_v38 = vadd.f32 %v4106_v5, %v987_v17  ;;  %v988_v15 = vadd.f32 %v4107_v26, %v969_v25  ;;  %v1224_v63 = vadd.f32 %v4108_v41, %v1205_v57  ;;  %v4109_v44 = vld [vmem:[#allocation111_spill] sm:$0xff]  ;;  %v4110_v39 = vld [vmem:[#allocation112_spill] sm:$0xff]  ;;  %v4112_v62 = vld [vmem:[#allocation26_spill] sm:$0xff] }
 0x30b   : > { %v1260_v42 = vadd.f32 %v4109_v44, %v1241_v59  ;;  %v1261_v34 = vadd.f32 %v4110_v39, %v1242_v0  ;;  %v4111_v11 = vld [vmem:[#allocation35_spill] sm:$0xff]  ;;  %v789_v51 = vadd.f32 %v4112_v62, %v770_v52  ;;  %v4115_v10 = vld [vmem:[#allocation77_spill] sm:$0xff]  ;;  %v4116_v28 = vld [vmem:[#allocation110_spill] sm:$0xff] }
 0x30c   : > { %v790_v60 = vadd.f32 %v4111_v11, %v771_v35  ;;  %v4114_v53 = vld [vmem:[#allocation79_spill] sm:$0xff]  ;;  %v1007_v48 = vadd.f32 %v4115_v10, %v988_v15  ;;  %v1243_v17 = vadd.f32 %v4116_v28, %v1224_v63  ;;  %v4117_v5 = vld [vmem:[#allocation114_spill] sm:$0xff]  ;;  %v4120_v35 = vld [vmem:[#allocation81_spill] sm:$0xff] }
 0x30d   : > { %v3705_v3 = vpop.permute.xlu1 %1980  ;;  %v3707_v56 = vpop.permute.xlu0 %1982  ;;  %v1025_v9 = vadd.f32 %v4114_v53, %v1006_v38  ;;  %v1279_v25 = vadd.f32 %v4117_v5, %v1260_v42  ;;  %v4118_v26 = vld [vmem:[#allocation115_spill] sm:$0xff]  ;;  %v4119_v0 = vld [vmem:[#allocation38_spill] sm:$0xff]  ;;  %v4123_v11 = vld [vmem:[#allocation113_spill] sm:$0xff]  ;;  %v796_v28 = vrot.slane %v789_v51, 1  ;;  %v1713_v5 = vadd.f32 %v3604_v13, %v3585_v19 }
 0x30e   : > { %v1280_v57 = vadd.f32 %v4118_v26, %v1261_v34  ;;  %v532_v44 = vadd.f32 %v4119_v0, %v3710_v24  ;;  %v4121_v52 = vld [vmem:[#allocation82_spill] sm:$0xff]  ;;  %v1262_v15 = vadd.f32 %v4123_v11, %v1243_v17  ;;  %v4124_v62 = vld [vmem:[#allocation117_spill] sm:$0xff]  ;;  %v4126_v10 = vld [vmem:[#allocation47_spill] sm:$0xff]  ;;  %v1714_v24 = vadd.f32 %v3606_v50, %v3587_v21 }
 0x30f   : > { %v1298_v63 = vadd.f32 %v4124_v62, %v1279_v25  ;;  %v4125_v53 = vld [vmem:[#allocation118_spill] sm:$0xff]  ;;  %v533_v34 = vadd.f32 %v4126_v10, %v520_v31  ;;  %v798_v26 = vrot.slane %v790_v60, 1  ;;  %v1732_v31 = vadd.f32 %v3631_v49, %v1713_v5  ;;  %v4129_v13 = vld [vmem:[#allocation119_spill] sm:$0xff] }
 0x310   : > { %v1299_v42 = vadd.f32 %v4125_v53, %v1280_v57  ;;  %v1733_v51 = vadd.f32 %v3633_v43, %v1714_v24 }
 0x311   : > { %v3727_v33 = vpop.permute.xlu1 %1761  ;;  %v3729_v36 = vpop.permute.xlu0 %1763  ;;  %v1751_v60 = vadd.f32 %v3672_v27, %v1732_v31  ;;  %v799_v49 = vsel %vm794_vm5, %v796_v28, %v798_v26 }
 0x312   : > { %v1306_v19 = vrot.slane %v1299_v42, 3 }
 0x313   : > { %v1770_v53 = vadd.f32 %v3727_v33, %v1751_v60  ;;  %v1949_v33 = vadd.f32 %v3613_v20, %v3594_v23 }
 0x315   : > { %v3747_v55 = vpop.permute.xlu1 %1765  ;;  %v3749_v7 = vpop.permute.xlu0 %1997 }
 0x319   : > { %v3767_v30 = vpop.permute.xlu1 %1999  ;;  %v3769_v8 = vpop.permute.xlu0 %2001 }
 0x31a   : > { %4102 = vst [vmem:[#allocation22_spill] sm:$0xff] %v3769_v8  ;;  %v4113_v8 = vld [vmem:[#allocation78_spill] sm:$0xff] }
 0x31b   : > { %v1024_v58 = vadd.f32 %v4113_v8, %v1005_v4  ;;  %v1044_v8 = vadd.f32 %v4121_v52, %v1025_v9  ;;  %v4122_v4 = vld [vmem:[#allocation80_spill] sm:$0xff]  ;;  %v4127_v9 = vld [vmem:[#allocation83_spill] sm:$0xff] }
 0x31c   : > { %v1026_v38 = vadd.f32 %v4122_v4, %v1007_v48  ;;  %v4128_v48 = vld [vmem:[#allocation116_spill] sm:$0xff]  ;;  %v1305_v4 = vrot.slane %v1298_v63, 3 }
 0x31d   : > { %v1781_v41 = vpop.permute.xlu1 %1780  ;;  %v1783_v59 = vpop.permute.xlu0 %1782  ;;  %v1043_v39 = vadd.f32 %v4120_v35, %v1024_v58  ;;  %v795_v58 = vrot.slane %v788_v47, 1  ;;  %v1281_v35 = vadd.f32 %v4128_v48, %v1262_v15  ;;  %v1051_v57 = vrot.slane %v1044_v8, 2 }
 0x31e   : > { %v1045_v0 = vadd.f32 %v4127_v9, %v1026_v38  ;;  %v1715_v47 = vadd.f32 %v3611_v16, %v3592_v40  ;;  %v1752_v38 = vadd.f32 %v3674_v1, %v1733_v51  ;;  %v4131_v40 = vld [vmem:[#allocation21_spill] sm:$0xff]  ;;  %v1307_v1 = vsel %vm1304_vm7, %v1305_v4, %v1306_v19 }
 0x31f   : > { %v1050_v25 = vrot.slane %v1043_v39, 2  ;;  %v1300_v21 = vadd.f32 %v4129_v13, %v1281_v35  ;;  %v797_v50 = vsel %vm794_vm5, %v795_v58, %v796_v28  ;;  %v4130_v39 = vld [vmem:[#allocation20_spill] sm:$0xff]  ;;  %v546_v16 = vadd.f32 %v4131_v40, %v533_v34 }
 0x320   : > { %v545_v8 = vadd.f32 %v4130_v39, %v532_v44  ;;  %v1053_v11 = vrot.slane %v1045_v0, 2  ;;  %v1734_v63 = vadd.f32 %v3643_v14, %v1715_v47  ;;  %v1771_v42 = vadd.f32 %v3729_v36, %v1752_v38 }
 0x321   : > { %v1785_v17 = vpop.permute.xlu1 %1784  ;;  %v3802_v52 = vpop.permute.xlu0 %2016  ;;  %v1052_v62 = vsel %vm1049_vm6, %v1050_v25, %v1051_v57  ;;  %v1308_v10 = vrot.slane %v1300_v21, 3  ;;  %v1931_v44 = vadd.f32 %v3596_v37, %v3582_v32  ;;  %v1789_v5 = vadd.f32 %v1781_v41, %v1770_v53 }
 0x322   : > { %v802_v27 = vadd.f32 %v797_v50, %v545_v8  ;;  %v1753_v28 = vadd.f32 %v3687_v18, %v1734_v63  ;;  %v1790_v24 = vadd.f32 %v1783_v59, %v1771_v42  ;;  %v803_v26 = vadd.f32 %v799_v49, %v546_v16  ;;  %v4132_v8 = vld [vmem:[#allocation22_spill] sm:$0xff] }
 0x323   : > { %v1054_v14 = vsel %vm1049_vm6, %v1051_v57, %v1053_v11  ;;  %v1950_v9 = vadd.f32 %v3622_v6, %v1931_v44  ;;  %v1309_v37 = vsel %vm1304_vm7, %v1306_v19, %v1308_v10  ;;  %v1968_v18 = vadd.f32 %v3645_v54, %v1949_v33 }
 0x324   : > { %v1057_v58 = vadd.f32 %v1052_v62, %v802_v27  ;;  %v1772_v0 = vadd.f32 %v3747_v55, %v1753_v28  ;;  %v1058_v23 = vadd.f32 %v1054_v14, %v803_v26  ;;  %v1951_v6 = vadd.f32 %v3624_v61, %v3600_v22 }
 0x325   : > { %v2019_v43 = vpop.permute.xlu1 %2018  ;;  %v2021_v15 = vpop.permute.xlu0 %2020  ;;  %v1969_v41 = vadd.f32 %v3656_v12, %v1950_v9  ;;  %v1987_v51 = vadd.f32 %v3689_v29, %v1968_v18 }
 0x326   : > { %v1312_v32 = vadd.f32 %v1307_v1, %v1057_v58  ;;  %v1791_v59 = vadd.f32 %v1785_v17, %v1772_v0  ;;  %v1313_v13 = vadd.f32 %v1309_v37, %v1058_v23  ;;  %v1970_v17 = vadd.f32 %v3658_v45, %v1951_v6 }
 0x327   : > { %v1988_v4 = vadd.f32 %v3705_v3, %v1969_v41  ;;  %v2006_v21 = vadd.f32 %v3749_v7, %v1987_v51 }
 0x328   : > { %v1567_v20 = vadd.f32 %v3533_v2, %v1312_v32  ;;  %v1568_v22 = vadd.f32 %v3544_v46, %v1313_v13  ;;  %v1989_v29 = vadd.f32 %v3707_v56, %v1970_v17 }
 0x329   : > { %v1800_v36 = vpop.permute.xlu1 %1799  ;;  %v1802_v34 = vpop.permute.xlu0 %1801  ;;  %v2007_v2 = vadd.f32 %v3767_v30, %v1988_v4  ;;  %v2025_v3 = vadd.f32 %v3802_v52, %v2006_v21 }
 0x32a   : > { %v1808_v48 = vadd.f32 %v1800_v36, %v1789_v5  ;;  %v1809_v35 = vadd.f32 %v1802_v34, %v1790_v24  ;;  %v2008_v49 = vadd.f32 %v4132_v8, %v1989_v29 }
 0x32b   : > { %v2026_v60 = vadd.f32 %v2019_v43, %v2007_v2 }
 0x32c   : > { %v1815_v25 = vrot.slane %v1808_v48, 5  ;;  %v1816_v57 = vrot.slane %v1809_v35, 5  ;;  %v2027_v30 = vadd.f32 %v2021_v15, %v2008_v49 }
 0x32d   : > { %v1804_v55 = vpop.permute.xlu1 %1803  ;;  %v2036_v31 = vpop.permute.xlu0 %2035 }
 0x32e   : > { %v1817_v54 = vsel %vm1814_vm8, %v1815_v25, %v1816_v57  ;;  %v1810_v19 = vadd.f32 %v1804_v55, %v1791_v59  ;;  %v2044_v45 = vadd.f32 %v2036_v31, %v2025_v3 }
 0x32f   : > { %v1822_v12 = vadd.f32 %v1817_v54, %v1567_v20 }
 0x330   : > { %v1818_v50 = vrot.slane %v1810_v19, 5 }
 0x331   : > { %v2038_v61 = vpop.permute.xlu1 %2037  ;;  %v2040_v47 = vpop.permute.xlu0 %2039 }
 0x332   : > { %v1819_v38 = vsel %vm1814_vm8, %v1816_v57, %v1818_v50  ;;  %v2045_v11 = vadd.f32 %v2038_v61, %v2026_v60  ;;  %v2046_v46 = vadd.f32 %v2040_v47, %v2027_v30 }
 0x333   : > { %v1823_v39 = vadd.f32 %v1819_v38, %v1568_v22 }
 0x335   : > { %v2055_v7 = vpop.permute.xlu1 %2054  ;;  %v2057_v62 = vpop.permute.xlu0 %2056 }
 0x336   : > { %v2063_v63 = vadd.f32 %v2055_v7, %v2044_v45  ;;  %v2064_v53 = vadd.f32 %v2057_v62, %v2045_v11 }
 0x338   : > { %v2070_v42 = vrot.slane %v2063_v63, 6  ;;  %v2071_v40 = vrot.slane %v2064_v53, 6 }
 0x339   : > { %v2059_v56 = vpop.permute.xlu1 %2058 }
 0x33a   : > { %v2072_v16 = vsel %vm2069_vm9, %v2070_v42, %v2071_v40  ;;  %v2065_v52 = vadd.f32 %v2059_v56, %v2046_v46 }
 0x33b   : > { %v2077_v43 = vadd.f32 %v2072_v16, %v1822_v12 }
 0x33c   : > { %v2073_v27 = vrot.slane %v2065_v52, 6 }
 0x33d   : > { %v2318_v1 = vmul.f32 -1.442695, %v2077_v43 }
 0x33e   : > { %v2074_v10 = vsel %vm2069_vm9, %v2071_v40, %v2073_v27 }
 0x33f   : > { %2413 = vpow2.f32 %v2318_v1  ;;  %v2078_v44 = vadd.f32 %v2074_v10, %v1823_v39 }
 0x341   : > { %v2319_v28 = vmul.f32 -1.442695, %v2078_v44 }
 0x343   : > { %2415 = vpow2.f32 %v2319_v28 }
 0x349   : > { %v2414_v15 = vpop.eup %2413 }
 0x34a   : > { %v2085_v5 = vadd.f32 1.0, %v2414_v15 }
 0x34c   : > { %2417 = vrcp.f32 %v2085_v5 }
 0x34d   : > { %v2416_v24 = vpop.eup %2415 }
 0x34e   : > { %v2086_v58 = vadd.f32 1.0, %v2416_v24 }
 0x350   : > { %2419 = vrcp.f32 %v2086_v58 }
 0x356   : > { %v2418_v26 = vpop.eup %2417 }
 0x357   : > { %2091 = vst.msk [vmem:[%s192_s15] sm:$0xff] %vm198_vm0, %v2418_v26 }
 0x35a   : > { %v2420_v14 = vpop.eup %2419 }
 0x35b   : > { %2092 = vst.msk [vmem:[%s192_s15 + $0x8] sm:$0xff] %vm198_vm0, %v2420_v14 }
 0x35c   : > { %2487 = shalt.err (!%p2484_p8)
}
 0x35d   : > { %s2488_s30 = scalar_lea.hbm %s3851_s17, 256  ;;  %s2492_s3 = scalar_lea.hbm %s3905_s2, 512 }
 0x35e   : > { %p2489_p4 = scmp.ne.s32.totalorder %s3851_s17, %s2488_s30  ;;  %p2493_p5 = scmp.lt.u32.totalorder %s3851_s17, %s3905_s2 }
 0x35f   : > { %p2494_p13 = scmp.lt.u32.totalorder %s2492_s3, %s2488_s30  ;;  %p2496_p7 = scmp.lt.u32.totalorder %s2488_s30, %s3851_s17 }
 0x360   : > { %p2490_p10 = pnand %p2489_p4, %p4133_p12 }
 0x361   : > { %p2495_p3 = por %p2494_p13, %p2493_p5 }
 0x362   : > { %p2491_p11 = pneg %p2490_p10 }
 0x363   : > { %p2497_p2 = por %p2496_p7, %p2495_p3 }
 0x365   : > { %p2498_p6 = pnand %p2497_p2, %p2491_p11 }
 0x367   : > { %2501 = shalt.err (!%p2498_p6)
}
 0x368   : > { %s2576_s26 = smov 128   ;;  %s2577_s27 = smov 8  }
 0x369   : > { %2333 = dma.vmem_to_hbm [thread:$0]  (%p4133_p12), %s3853_s19, 256, %s3851_s17, %s2094_s23, %s2576_s26, %s2576_s26, %s2577_s27  }
 0x36a PF: > { %s2122_s15 = sand.u32 1, %s2540_s9   ;;  %p4134_p0 = scmp.ne.s32.totalorder %s3914_s22, 0 }
 0x36b   : > { %p4135_p1 = scmp.ge.s32.totalorder %s2560_s14, 2  ;;  %s2123_s24 = scalar_lea.sflag [#allocation8], %s2122_s15 }
 0x36d   : > { %p2344_p9 = pnand %p4135_p1, %p4134_p0 }
 0x36f   : > { %2535 = dma.done.wait (!%p2344_p9), %s2123_s24, 256  }
 0x370   : > { %2537 = vsyncadd (!%p2344_p9), %s2123_s24, 4294967040  ;;  %s19_s14 = sadd.s32 1, %s2560_s14   ;;  %s4136_s9 = smov %s2544_s10 }
 0x371   : > { %p16_p8 = scmp.ge.s32.totalorder %s19_s14, 4   ;;  %s4137_s10 = smov %s2548_s11 }
 0x372   : > { %s4138_s11 = smov %s2703_s25  ;;  %s4139_s12 = smov %s2556_s13 }
 0x373   : > { %s4140_s13 = smov %s4142_s29  ;;  %18 = sbr.rel (!%p16_p8) target bundleno = 7 (0x7), region = 89 }
 0x37a   :  { %2128 = vsyncpa [#allocation7], 1 }
 0x37b   :  { %2130 = vsyncpa [#allocation7 + $0x1], 1 }
 0x37c   :  { %2131 = vsyncpa [#allocation8], 1 }
 0x37d   :  { %2133 = vsyncpa [#allocation8 + $0x1], 1 }
 0x37e   :  { %2134 = vsyncpa [#allocation9], 1 }
 0x37f   :  { %2136 = vsyncpa [#allocation9 + $0x1], 1 }

</bundles_post_ra>
